<compile_context>
chip_gen: v6e
topology: v6e:2x2x1
jax: 0.10.0
libtpu: 0.0.40
codegen_flags: <defaults>
</compile_context>

<pallas_src>
import functools

import jax
import jax.numpy as jnp
from jax import lax
from jax.experimental import pallas as pl
from jax.experimental.pallas import tpu as pltpu


# ----------------------------------------------------------------------------
# Geometry helpers
# ----------------------------------------------------------------------------
def _geom(H, W):
    WP, HP = W + 2, H + 2                 # padded spatial extents (pad=1)
    SPL = HP * WP                         # flattened padded image length
    MARGIN = WP + 1                       # max |tap offset| for a 3x3 kernel
    LB = SPL + 2 * MARGIN                 # scratch lane length (margins stay 0)
    Ho = (H + 2 - 3) // 2 + 1             # k=3, s=2, p=1
    Wo = (W + 2 - 3) // 2 + 1
    return WP, SPL, MARGIN, LB, Ho, Wo


# ----------------------------------------------------------------------------
# Fused kernel: stage1 + n x Rep_2 + stride-2 down conv, all resident in VMEM
# ----------------------------------------------------------------------------
def _make_fused_kernel(H, W, Cin, C2, n_rep):
    WP, SPL, MARGIN, LB, Ho, Wo = _geom(H, W)
    # flat offset of conv tap (dh, dw) relative to the output pixel
    OFFS = [(dh - 1) * WP + (dw - 1) for dh in range(3) for dw in range(3)]

    def kernel(x_ref, mask_ref, sel_ref,
               w1a_ref, w1b_ref, s1_ref, b1_ref,
               wra_ref, wrb_ref, sr_ref, br_ref,
               wda_ref, sd_ref, bd_ref,
               o_ref,
               xbuf, ya, yb):
        f32 = jnp.float32

        # ---- hoisted constants (loaded / broadcast once per grid step) ----
        interior = jnp.broadcast_to(mask_ref[...].astype(f32), (C2, SPL))
        sel = sel_ref[...].astype(f32)                      # (SPL, Ho*Wo)

        def bcol(r):                                        # (C2,1)->(C2,SPL)
            return jnp.broadcast_to(r[...].astype(f32), (C2, SPL))

        s1, b1 = bcol(s1_ref), bcol(b1_ref)
        sr, br = bcol(sr_ref), bcol(br_ref)
        sd, bd = bcol(sd_ref), bcol(bd_ref)

        taps1 = [w1a_ref[t].astype(f32) for t in range(9)]  # (C2, Cin) each
        tapsr = [wra_ref[t].astype(f32) for t in range(9)]  # (C2, C2)
        tapsd = [wda_ref[t].astype(f32) for t in range(9)]  # (C2, C2)
        w1b = w1b_ref[...].astype(f32)                      # 1x1 taps
        wrb = wrb_ref[...].astype(f32)

        # ---- in-kernel halo: zero the padded scratches, copy x interior ---
        xbuf[...] = jnp.zeros_like(xbuf)
        ya[...] = jnp.zeros_like(ya)
        yb[...] = jnp.zeros_like(yb)
        for h in range(H):                                  # static unroll
            dst = MARGIN + (h + 1) * WP + 1
            xbuf[:, pl.ds(dst, W)] = x_ref[0, :, pl.ds(h * W, W)].astype(f32)

        # ---- one conv stage:  act?( BN( conv3x3 (+ conv1x1) ) ), masked ---
        def conv_stage(src, taps3, tap1, scale, shift, act):
            acc = jnp.zeros((C2, SPL), f32)
            for t in range(9):  # whole-image matmul per tap (lane-dense N=SPL)
                win = src[:, pl.ds(MARGIN + OFFS[t], SPL)]  # (Csrc, SPL)
                acc = acc + jnp.dot(taps3[t], win,
                                    preferred_element_type=f32)
            if tap1 is not None:                            # 1x1 branch
                acc = acc + jnp.dot(tap1, src[:, pl.ds(MARGIN, SPL)],
                                    preferred_element_type=f32)
            y = acc * scale + shift
            if act:  # SiLU; reciprocal goes to the EUP slot
                y = y * pl.reciprocal(1.0 + jnp.exp(-y), approx=True)
            return y * interior     # keep the zero halo for the next conv

        # stage 1: y = BN(conv1_3x3(x) + conv2_1x1(x))      (no activation)
        ya[:, pl.ds(MARGIN, SPL)] = conv_stage(xbuf, taps1, w1b, s1, b1, False)

        # n x Rep_2 (shared weights), ping-pong between two VMEM buffers
        bufs, cur = [ya, yb], 0
        for _ in range(n_rep):
            bufs[1 - cur][:, pl.ds(MARGIN, SPL)] = conv_stage(
                bufs[cur], tapsr, wrb, sr, br, True)
            cur = 1 - cur

        # down: full-res conv3x3 + BN + SiLU, then ONE stride-2 selection dot
        dfull = conv_stage(bufs[cur], tapsd, None, sd, bd, True)   # (C2, SPL)
        o_ref[0] = jnp.dot(dfull, sel,
                           preferred_element_type=f32).astype(o_ref.dtype)

    return kernel


# ----------------------------------------------------------------------------
# Wrapper
# ----------------------------------------------------------------------------
def _fold_bn(gamma, beta, mean, var, eps, conv_bias):
    scale = gamma * lax.rsqrt(var + eps)
    shift = (conv_bias - mean) * scale + beta
    return scale.astype(jnp.float32), shift.astype(jnp.float32)


@functools.partial(jax.jit, static_argnames=("n",))
def rvb2_n_forward(x_nchw, params, n, eps=1e-5):
    p = params
    N, Cin, H, W = x_nchw.shape
    C2 = p["conv1_w"].shape[-1]
    WP, SPL, MARGIN, LB, Ho, Wo = _geom(H, W)

    # ---- fold BatchNorm (+ conv biases) into per-channel scale/shift ------
    # TODO(synk): BatchNorm2d is implemented in inference mode (running stats
    #             folded to scale/shift), not training-batch statistics.
    s1, b1 = _fold_bn(p["bn_g"], p["bn_b"], p["bn_m"], p["bn_v"], eps,
                      p["conv1_b"] + p["conv2_b"])
    sr, br = _fold_bn(p["rep_bn_g"], p["rep_bn_b"], p["rep_bn_m"],
                      p["rep_bn_v"], eps, p["rep_b3"] + p["rep_b1"])
    sd, bd = _fold_bn(p["down_bn_g"], p["down_bn_b"], p["down_bn_m"],
                      p["down_bn_v"], eps, jnp.zeros_like(p["down_bn_b"]))

    col = lambda v: v.reshape(C2, 1)

    # ---- repack conv weights as tap-major (9, Cout, Cin) matrices ---------
    w1a = jnp.transpose(p["conv1_w"], (0, 1, 3, 2)).reshape(9, C2, Cin)
    w1b = p["conv2_w"].T
    wra = jnp.transpose(p["rep_w3"], (0, 1, 3, 2)).reshape(9, C2, C2)
    wrb = p["rep_w1"].T
    wda = jnp.transpose(p["down_w"], (0, 1, 3, 2)).reshape(9, C2, C2)

    # ---- tiny constant tables (halo-interior mask, stride-2 selector) -----
    s_idx = jnp.arange(SPL, dtype=jnp.int32)
    hh, ww = s_idx // WP, s_idx % WP
    mask = ((hh >= 1) & (hh <= H) & (ww >= 1) & (ww <= W))
    mask = mask.astype(jnp.float32).reshape(1, SPL)
    q_idx = jnp.arange(Ho * Wo, dtype=jnp.int32)
    tgt = (2 * (q_idx // Wo) + 1) * WP + (2 * (q_idx % Wo) + 1)
    sel = (s_idx[:, None] == tgt[None, :]).astype(jnp.float32)   # (SPL, HoWo)

    kernel = _make_fused_kernel(H, W, Cin, C2, n)

    def rep_spec(a):  # weight / table replicated across the batch grid
        if a.ndim == 2:
            return pl.BlockSpec(a.shape, lambda i: (0, 0))
        return pl.BlockSpec(a.shape, lambda i: (0, 0, 0))

    args = (x_nchw.reshape(N, Cin, H * W), mask, sel,
            w1a, w1b, col(s1), col(b1),
            wra, wrb, col(sr), col(br),
            wda, col(sd), col(bd))

    in_specs = [pl.BlockSpec((1, Cin, H * W), lambda i: (i, 0, 0))]
    in_specs += [rep_spec(a) for a in args[1:]]

    out_flat = pl.pallas_call(
        kernel,
        out_shape=jax.ShapeDtypeStruct((N, C2, Ho * Wo), x_nchw.dtype),
        grid_spec=pltpu.PrefetchScalarGridSpec(
            num_scalar_prefetch=0,
            grid=(N,),
            in_specs=in_specs,
            out_specs=pl.BlockSpec((1, C2, Ho * Wo), lambda i: (i, 0, 0)),
            scratch_shapes=[
                pltpu.VMEM((Cin, LB), jnp.float32),   # padded, flattened x
                pltpu.VMEM((C2, LB), jnp.float32),    # activation ping
                pltpu.VMEM((C2, LB), jnp.float32),    # activation pong
            ],
        ),
        # TODO(synk): at realistic sizes, add a parallel H-tile grid axis
        #             (v7x megacore when N is small) and set vmem_limit_bytes.
        compiler_params=pltpu.CompilerParams(
            dimension_semantics=("parallel",)),
    )(*args)

    return out_flat.reshape(N, C2, Ho, Wo)


# ----------------------------------------------------------------------------
# Pure-JAX reference (for correctness check)
# ----------------------------------------------------------------------------
def _ref_forward(x_nchw, p, n, eps=1e-5):
    dn = ("NHWC", "HWIO", "NHWC")
    x = jnp.transpose(x_nchw, (0, 2, 3, 1))

    def conv3(z, w, stride):
        return lax.conv_general_dilated(z, w, (stride, stride),
                                        ((1, 1), (1, 1)), dimension_numbers=dn)

    def conv1x1(z, w):
        return lax.conv_general_dilated(z, w.reshape(1, 1, *w.shape), (1, 1),
                                        ((0, 0), (0, 0)), dimension_numbers=dn)

    def bn(z, g, b, m, v):
        return (z - m) / jnp.sqrt(v + eps) * g + b

    def silu(z):
        return z * jax.nn.sigmoid(z)

    y = bn(conv3(x, p["conv1_w"], 1) + p["conv1_b"]
           + conv1x1(x, p["conv2_w"]) + p["conv2_b"],
           p["bn_g"], p["bn_b"], p["bn_m"], p["bn_v"])
    for _ in range(n):
        y = silu(bn(conv3(y, p["rep_w3"], 1) + p["rep_b3"]
                    + conv1x1(y, p["rep_w1"]) + p["rep_b1"],
                    p["rep_bn_g"], p["rep_bn_b"], p["rep_bn_m"], p["rep_bn_v"]))
    y = silu(bn(conv3(y, p["down_w"], 2),
                p["down_bn_g"], p["down_bn_b"], p["down_bn_m"], p["down_bn_v"]))
    return jnp.transpose(y, (0, 3, 1, 2))


if __name__ == "__main__":
    c1, c2, n = 4, 4, 2
    N, H, W = 2, 16, 16

    key = jax.random.PRNGKey(0)
    ks = jax.random.split(key, 24)

    def rnd(k, shape, scale=1.0):
        return scale * jax.random.normal(k, shape, dtype=jnp.float32)

    x = rnd(ks[0], (N, c1, H, W))

    params = dict(
        conv1_w=rnd(ks[1], (3, 3, c1, c2), 0.25),
        conv1_b=rnd(ks[2], (c2,), 0.1),
        conv2_w=rnd(ks[3], (c1, c2), 0.25),
        conv2_b=rnd(ks[4], (c2,), 0.1),
        bn_g=1.0 + rnd(ks[5], (c2,), 0.1),
        bn_b=rnd(ks[6], (c2,), 0.1),
        bn_m=rnd(ks[7], (c2,), 0.1),
        bn_v=0.5 + jnp.abs(rnd(ks[8], (c2,))),
        rep_w3=rnd(ks[9], (3, 3, c2, c2), 0.25),
        rep_b3=rnd(ks[10], (c2,), 0.1),
        rep_w1=rnd(ks[11], (c2, c2), 0.25),
        rep_b1=rnd(ks[12], (c2,), 0.1),
        rep_bn_g=1.0 + rnd(ks[13], (c2,), 0.1),
        rep_bn_b=rnd(ks[14], (c2,), 0.1),
        rep_bn_m=rnd(ks[15], (c2,), 0.1),
        rep_bn_v=0.5 + jnp.abs(rnd(ks[16], (c2,))),
        down_w=rnd(ks[17], (3, 3, c2, c2), 0.25),
        down_bn_g=1.0 + rnd(ks[18], (c2,), 0.1),
        down_bn_b=rnd(ks[19], (c2,), 0.1),
        down_bn_m=rnd(ks[20], (c2,), 0.1),
        down_bn_v=0.5 + jnp.abs(rnd(ks[21], (c2,))),
    )

    out = rvb2_n_forward(x, params, n=n)
    out = jax.block_until_ready(out)

    ref = _ref_forward(x, params, n)
    assert out.shape == (N, c2, H // 2, W // 2), out.shape
    assert out.dtype == x.dtype
    err = float(jnp.max(jnp.abs(out - ref)))
    # Tolerance accounts for the EUP approximate reciprocal in SiLU.
    assert err < 5e-2, f"max abs err {err}"

    print("KERNEL_OK")
</pallas_src>

<mosaic_0001>
module attributes {stable_mosaic.version = 11 : i64} {
  func.func @kernel(%arg0: i32, %arg1: memref<1x4x256xf32, #tpu.memory_space<vmem>>, %arg2: memref<1x324xf32, #tpu.memory_space<vmem>>, %arg3: memref<324x64xf32, #tpu.memory_space<vmem>>, %arg4: memref<9x4x4xf32, #tpu.memory_space<vmem>>, %arg5: memref<4x4xf32, #tpu.memory_space<vmem>>, %arg6: memref<4x1xf32, #tpu.memory_space<vmem>>, %arg7: memref<4x1xf32, #tpu.memory_space<vmem>>, %arg8: memref<9x4x4xf32, #tpu.memory_space<vmem>>, %arg9: memref<4x4xf32, #tpu.memory_space<vmem>>, %arg10: memref<4x1xf32, #tpu.memory_space<vmem>>, %arg11: memref<4x1xf32, #tpu.memory_space<vmem>>, %arg12: memref<9x4x4xf32, #tpu.memory_space<vmem>>, %arg13: memref<4x1xf32, #tpu.memory_space<vmem>>, %arg14: memref<4x1xf32, #tpu.memory_space<vmem>>, %arg15: memref<1x4x64xf32, #tpu.memory_space<vmem>>, %arg16: memref<4x362xf32, #tpu.memory_space<vmem>>, %arg17: memref<4x362xf32, #tpu.memory_space<vmem>>, %arg18: memref<4x362xf32, #tpu.memory_space<vmem>>) attributes {dimension_semantics = [#tpu.dimension_semantics<parallel>], iteration_bounds = array<i64: 2>, scalar_prefetch = 0 : i64, scratch_operands = 3 : i64, tpu.core_type = #tpu.core_type<tc>, window_params = [{transform_indices = @transform_0, window_bounds = array<i64: 1, 4, 256>}, {pipeline_mode = #tpu.pipeline_mode<synchronous>, transform_indices = @transform_1, window_bounds = array<i64: 1, 324>}, {pipeline_mode = #tpu.pipeline_mode<synchronous>, transform_indices = @transform_2, window_bounds = array<i64: 324, 64>}, {pipeline_mode = #tpu.pipeline_mode<synchronous>, transform_indices = @transform_3, window_bounds = array<i64: 9, 4, 4>}, {pipeline_mode = #tpu.pipeline_mode<synchronous>, transform_indices = @transform_4, window_bounds = array<i64: 4, 4>}, {pipeline_mode = #tpu.pipeline_mode<synchronous>, transform_indices = @transform_5, window_bounds = array<i64: 4, 1>}, {pipeline_mode = #tpu.pipeline_mode<synchronous>, transform_indices = @transform_6, window_bounds = array<i64: 4, 1>}, {pipeline_mode = #tpu.pipeline_mode<synchronous>, transform_indices = @transform_7, window_bounds = array<i64: 9, 4, 4>}, {pipeline_mode = #tpu.pipeline_mode<synchronous>, transform_indices = @transform_8, window_bounds = array<i64: 4, 4>}, {pipeline_mode = #tpu.pipeline_mode<synchronous>, transform_indices = @transform_9, window_bounds = array<i64: 4, 1>}, {pipeline_mode = #tpu.pipeline_mode<synchronous>, transform_indices = @transform_10, window_bounds = array<i64: 4, 1>}, {pipeline_mode = #tpu.pipeline_mode<synchronous>, transform_indices = @transform_11, window_bounds = array<i64: 9, 4, 4>}, {pipeline_mode = #tpu.pipeline_mode<synchronous>, transform_indices = @transform_12, window_bounds = array<i64: 4, 1>}, {pipeline_mode = #tpu.pipeline_mode<synchronous>, transform_indices = @transform_13, window_bounds = array<i64: 4, 1>}, {transform_indices = @transform_14, window_bounds = array<i64: 1, 4, 64>}]} {
    %c0 = arith.constant 0 : index
    %c0_0 = arith.constant 0 : index
    %0 = vector.load %arg2[%c0, %c0_0] : memref<1x324xf32, #tpu.memory_space<vmem>>, vector<1x324xf32>
    %1 = vector.shape_cast %0 : vector<1x324xf32> to vector<1x324xf32>
    %2 = vector.broadcast %1 : vector<1x324xf32> to vector<4x324xf32>
    %c0_1 = arith.constant 0 : index
    %c0_2 = arith.constant 0 : index
    %3 = vector.load %arg3[%c0_1, %c0_2] : memref<324x64xf32, #tpu.memory_space<vmem>>, vector<324x64xf32>
    %c0_3 = arith.constant 0 : index
    %c0_4 = arith.constant 0 : index
    %4 = vector.load %arg6[%c0_3, %c0_4] : memref<4x1xf32, #tpu.memory_space<vmem>>, vector<4x1xf32>
    %5 = vector.shape_cast %4 : vector<4x1xf32> to vector<4x1xf32>
    %6 = vector.broadcast %5 : vector<4x1xf32> to vector<4x324xf32>
    %c0_5 = arith.constant 0 : index
    %c0_6 = arith.constant 0 : index
    %7 = vector.load %arg7[%c0_5, %c0_6] : memref<4x1xf32, #tpu.memory_space<vmem>>, vector<4x1xf32>
    %8 = vector.shape_cast %7 : vector<4x1xf32> to vector<4x1xf32>
    %9 = vector.broadcast %8 : vector<4x1xf32> to vector<4x324xf32>
    %c0_7 = arith.constant 0 : index
    %c0_8 = arith.constant 0 : index
    %10 = vector.load %arg10[%c0_7, %c0_8] : memref<4x1xf32, #tpu.memory_space<vmem>>, vector<4x1xf32>
    %11 = vector.shape_cast %10 : vector<4x1xf32> to vector<4x1xf32>
    %12 = vector.broadcast %11 : vector<4x1xf32> to vector<4x324xf32>
    %c0_9 = arith.constant 0 : index
    %c0_10 = arith.constant 0 : index
    %13 = vector.load %arg11[%c0_9, %c0_10] : memref<4x1xf32, #tpu.memory_space<vmem>>, vector<4x1xf32>
    %14 = vector.shape_cast %13 : vector<4x1xf32> to vector<4x1xf32>
    %15 = vector.broadcast %14 : vector<4x1xf32> to vector<4x324xf32>
    %c0_11 = arith.constant 0 : index
    %c0_12 = arith.constant 0 : index
    %16 = vector.load %arg13[%c0_11, %c0_12] : memref<4x1xf32, #tpu.memory_space<vmem>>, vector<4x1xf32>
    %17 = vector.shape_cast %16 : vector<4x1xf32> to vector<4x1xf32>
    %18 = vector.broadcast %17 : vector<4x1xf32> to vector<4x324xf32>
    %c0_13 = arith.constant 0 : index
    %c0_14 = arith.constant 0 : index
    %19 = vector.load %arg14[%c0_13, %c0_14] : memref<4x1xf32, #tpu.memory_space<vmem>>, vector<4x1xf32>
    %20 = vector.shape_cast %19 : vector<4x1xf32> to vector<4x1xf32>
    %21 = vector.broadcast %20 : vector<4x1xf32> to vector<4x324xf32>
    %c0_15 = arith.constant 0 : index
    %c0_16 = arith.constant 0 : index
    %c0_17 = arith.constant 0 : index
    %22 = vector.load %arg4[%c0_15, %c0_16, %c0_17] : memref<9x4x4xf32, #tpu.memory_space<vmem>>, vector<1x4x4xf32>
    %23 = vector.shape_cast %22 : vector<1x4x4xf32> to vector<4x4xf32>
    %c1 = arith.constant 1 : index
    %c0_18 = arith.constant 0 : index
    %c0_19 = arith.constant 0 : index
    %24 = vector.load %arg4[%c1, %c0_18, %c0_19] : memref<9x4x4xf32, #tpu.memory_space<vmem>>, vector<1x4x4xf32>
    %25 = vector.shape_cast %24 : vector<1x4x4xf32> to vector<4x4xf32>
    %c2 = arith.constant 2 : index
    %c0_20 = arith.constant 0 : index
    %c0_21 = arith.constant 0 : index
    %26 = vector.load %arg4[%c2, %c0_20, %c0_21] : memref<9x4x4xf32, #tpu.memory_space<vmem>>, vector<1x4x4xf32>
    %27 = vector.shape_cast %26 : vector<1x4x4xf32> to vector<4x4xf32>
    %c3 = arith.constant 3 : index
    %c0_22 = arith.constant 0 : index
    %c0_23 = arith.constant 0 : index
    %28 = vector.load %arg4[%c3, %c0_22, %c0_23] : memref<9x4x4xf32, #tpu.memory_space<vmem>>, vector<1x4x4xf32>
    %29 = vector.shape_cast %28 : vector<1x4x4xf32> to vector<4x4xf32>
    %c4 = arith.constant 4 : index
    %c0_24 = arith.constant 0 : index
    %c0_25 = arith.constant 0 : index
    %30 = vector.load %arg4[%c4, %c0_24, %c0_25] : memref<9x4x4xf32, #tpu.memory_space<vmem>>, vector<1x4x4xf32>
    %31 = vector.shape_cast %30 : vector<1x4x4xf32> to vector<4x4xf32>
    %c5 = arith.constant 5 : index
    %c0_26 = arith.constant 0 : index
    %c0_27 = arith.constant 0 : index
    %32 = vector.load %arg4[%c5, %c0_26, %c0_27] : memref<9x4x4xf32, #tpu.memory_space<vmem>>, vector<1x4x4xf32>
    %33 = vector.shape_cast %32 : vector<1x4x4xf32> to vector<4x4xf32>
    %c6 = arith.constant 6 : index
    %c0_28 = arith.constant 0 : index
    %c0_29 = arith.constant 0 : index
    %34 = vector.load %arg4[%c6, %c0_28, %c0_29] : memref<9x4x4xf32, #tpu.memory_space<vmem>>, vector<1x4x4xf32>
    %35 = vector.shape_cast %34 : vector<1x4x4xf32> to vector<4x4xf32>
    %c7 = arith.constant 7 : index
    %c0_30 = arith.constant 0 : index
    %c0_31 = arith.constant 0 : index
    %36 = vector.load %arg4[%c7, %c0_30, %c0_31] : memref<9x4x4xf32, #tpu.memory_space<vmem>>, vector<1x4x4xf32>
    %37 = vector.shape_cast %36 : vector<1x4x4xf32> to vector<4x4xf32>
    %c8 = arith.constant 8 : index
    %c0_32 = arith.constant 0 : index
    %c0_33 = arith.constant 0 : index
    %38 = vector.load %arg4[%c8, %c0_32, %c0_33] : memref<9x4x4xf32, #tpu.memory_space<vmem>>, vector<1x4x4xf32>
    %39 = vector.shape_cast %38 : vector<1x4x4xf32> to vector<4x4xf32>
    %c0_34 = arith.constant 0 : index
    %c0_35 = arith.constant 0 : index
    %c0_36 = arith.constant 0 : index
    %40 = vector.load %arg8[%c0_34, %c0_35, %c0_36] : memref<9x4x4xf32, #tpu.memory_space<vmem>>, vector<1x4x4xf32>
    %41 = vector.shape_cast %40 : vector<1x4x4xf32> to vector<4x4xf32>
    %c1_37 = arith.constant 1 : index
    %c0_38 = arith.constant 0 : index
    %c0_39 = arith.constant 0 : index
    %42 = vector.load %arg8[%c1_37, %c0_38, %c0_39] : memref<9x4x4xf32, #tpu.memory_space<vmem>>, vector<1x4x4xf32>
    %43 = vector.shape_cast %42 : vector<1x4x4xf32> to vector<4x4xf32>
    %c2_40 = arith.constant 2 : index
    %c0_41 = arith.constant 0 : index
    %c0_42 = arith.constant 0 : index
    %44 = vector.load %arg8[%c2_40, %c0_41, %c0_42] : memref<9x4x4xf32, #tpu.memory_space<vmem>>, vector<1x4x4xf32>
    %45 = vector.shape_cast %44 : vector<1x4x4xf32> to vector<4x4xf32>
    %c3_43 = arith.constant 3 : index
    %c0_44 = arith.constant 0 : index
    %c0_45 = arith.constant 0 : index
    %46 = vector.load %arg8[%c3_43, %c0_44, %c0_45] : memref<9x4x4xf32, #tpu.memory_space<vmem>>, vector<1x4x4xf32>
    %47 = vector.shape_cast %46 : vector<1x4x4xf32> to vector<4x4xf32>
    %c4_46 = arith.constant 4 : index
    %c0_47 = arith.constant 0 : index
    %c0_48 = arith.constant 0 : index
    %48 = vector.load %arg8[%c4_46, %c0_47, %c0_48] : memref<9x4x4xf32, #tpu.memory_space<vmem>>, vector<1x4x4xf32>
    %49 = vector.shape_cast %48 : vector<1x4x4xf32> to vector<4x4xf32>
    %c5_49 = arith.constant 5 : index
    %c0_50 = arith.constant 0 : index
    %c0_51 = arith.constant 0 : index
    %50 = vector.load %arg8[%c5_49, %c0_50, %c0_51] : memref<9x4x4xf32, #tpu.memory_space<vmem>>, vector<1x4x4xf32>
    %51 = vector.shape_cast %50 : vector<1x4x4xf32> to vector<4x4xf32>
    %c6_52 = arith.constant 6 : index
    %c0_53 = arith.constant 0 : index
    %c0_54 = arith.constant 0 : index
    %52 = vector.load %arg8[%c6_52, %c0_53, %c0_54] : memref<9x4x4xf32, #tpu.memory_space<vmem>>, vector<1x4x4xf32>
    %53 = vector.shape_cast %52 : vector<1x4x4xf32> to vector<4x4xf32>
    %c7_55 = arith.constant 7 : index
    %c0_56 = arith.constant 0 : index
    %c0_57 = arith.constant 0 : index
    %54 = vector.load %arg8[%c7_55, %c0_56, %c0_57] : memref<9x4x4xf32, #tpu.memory_space<vmem>>, vector<1x4x4xf32>
    %55 = vector.shape_cast %54 : vector<1x4x4xf32> to vector<4x4xf32>
    %c8_58 = arith.constant 8 : index
    %c0_59 = arith.constant 0 : index
    %c0_60 = arith.constant 0 : index
    %56 = vector.load %arg8[%c8_58, %c0_59, %c0_60] : memref<9x4x4xf32, #tpu.memory_space<vmem>>, vector<1x4x4xf32>
    %57 = vector.shape_cast %56 : vector<1x4x4xf32> to vector<4x4xf32>
    %c0_61 = arith.constant 0 : index
    %c0_62 = arith.constant 0 : index
    %c0_63 = arith.constant 0 : index
    %58 = vector.load %arg12[%c0_61, %c0_62, %c0_63] : memref<9x4x4xf32, #tpu.memory_space<vmem>>, vector<1x4x4xf32>
    %59 = vector.shape_cast %58 : vector<1x4x4xf32> to vector<4x4xf32>
    %c1_64 = arith.constant 1 : index
    %c0_65 = arith.constant 0 : index
    %c0_66 = arith.constant 0 : index
    %60 = vector.load %arg12[%c1_64, %c0_65, %c0_66] : memref<9x4x4xf32, #tpu.memory_space<vmem>>, vector<1x4x4xf32>
    %61 = vector.shape_cast %60 : vector<1x4x4xf32> to vector<4x4xf32>
    %c2_67 = arith.constant 2 : index
    %c0_68 = arith.constant 0 : index
    %c0_69 = arith.constant 0 : index
    %62 = vector.load %arg12[%c2_67, %c0_68, %c0_69] : memref<9x4x4xf32, #tpu.memory_space<vmem>>, vector<1x4x4xf32>
    %63 = vector.shape_cast %62 : vector<1x4x4xf32> to vector<4x4xf32>
    %c3_70 = arith.constant 3 : index
    %c0_71 = arith.constant 0 : index
    %c0_72 = arith.constant 0 : index
    %64 = vector.load %arg12[%c3_70, %c0_71, %c0_72] : memref<9x4x4xf32, #tpu.memory_space<vmem>>, vector<1x4x4xf32>
    %65 = vector.shape_cast %64 : vector<1x4x4xf32> to vector<4x4xf32>
    %c4_73 = arith.constant 4 : index
    %c0_74 = arith.constant 0 : index
    %c0_75 = arith.constant 0 : index
    %66 = vector.load %arg12[%c4_73, %c0_74, %c0_75] : memref<9x4x4xf32, #tpu.memory_space<vmem>>, vector<1x4x4xf32>
    %67 = vector.shape_cast %66 : vector<1x4x4xf32> to vector<4x4xf32>
    %c5_76 = arith.constant 5 : index
    %c0_77 = arith.constant 0 : index
    %c0_78 = arith.constant 0 : index
    %68 = vector.load %arg12[%c5_76, %c0_77, %c0_78] : memref<9x4x4xf32, #tpu.memory_space<vmem>>, vector<1x4x4xf32>
    %69 = vector.shape_cast %68 : vector<1x4x4xf32> to vector<4x4xf32>
    %c6_79 = arith.constant 6 : index
    %c0_80 = arith.constant 0 : index
    %c0_81 = arith.constant 0 : index
    %70 = vector.load %arg12[%c6_79, %c0_80, %c0_81] : memref<9x4x4xf32, #tpu.memory_space<vmem>>, vector<1x4x4xf32>
    %71 = vector.shape_cast %70 : vector<1x4x4xf32> to vector<4x4xf32>
    %c7_82 = arith.constant 7 : index
    %c0_83 = arith.constant 0 : index
    %c0_84 = arith.constant 0 : index
    %72 = vector.load %arg12[%c7_82, %c0_83, %c0_84] : memref<9x4x4xf32, #tpu.memory_space<vmem>>, vector<1x4x4xf32>
    %73 = vector.shape_cast %72 : vector<1x4x4xf32> to vector<4x4xf32>
    %c8_85 = arith.constant 8 : index
    %c0_86 = arith.constant 0 : index
    %c0_87 = arith.constant 0 : index
    %74 = vector.load %arg12[%c8_85, %c0_86, %c0_87] : memref<9x4x4xf32, #tpu.memory_space<vmem>>, vector<1x4x4xf32>
    %75 = vector.shape_cast %74 : vector<1x4x4xf32> to vector<4x4xf32>
    %c0_88 = arith.constant 0 : index
    %c0_89 = arith.constant 0 : index
    %76 = vector.load %arg5[%c0_88, %c0_89] : memref<4x4xf32, #tpu.memory_space<vmem>>, vector<4x4xf32>
    %c0_90 = arith.constant 0 : index
    %c0_91 = arith.constant 0 : index
    %77 = vector.load %arg9[%c0_90, %c0_91] : memref<4x4xf32, #tpu.memory_space<vmem>>, vector<4x4xf32>
    %cst = arith.constant 0.000000e+00 : f32
    %78 = vector.broadcast %cst : f32 to vector<4x362xf32>
    %c0_92 = arith.constant 0 : index
    %c0_93 = arith.constant 0 : index
    %79 = vector.load %arg16[%c0_92, %c0_93] : memref<4x362xf32, #tpu.memory_space<vmem>>, vector<4x362xf32>
    tpu.vector_store %arg16[%c0_92, %c0_93], %78 {strides = array<i32>} : memref<4x362xf32, #tpu.memory_space<vmem>>, vector<4x362xf32>,
    %cst_94 = arith.constant 0.000000e+00 : f32
    %80 = vector.broadcast %cst_94 : f32 to vector<4x362xf32>
    %c0_95 = arith.constant 0 : index
    %c0_96 = arith.constant 0 : index
    %81 = vector.load %arg17[%c0_95, %c0_96] : memref<4x362xf32, #tpu.memory_space<vmem>>, vector<4x362xf32>
    tpu.vector_store %arg17[%c0_95, %c0_96], %80 {strides = array<i32>} : memref<4x362xf32, #tpu.memory_space<vmem>>, vector<4x362xf32>,
    %cst_97 = arith.constant 0.000000e+00 : f32
    %82 = vector.broadcast %cst_97 : f32 to vector<4x362xf32>
    %c0_98 = arith.constant 0 : index
    %c0_99 = arith.constant 0 : index
    %83 = vector.load %arg18[%c0_98, %c0_99] : memref<4x362xf32, #tpu.memory_space<vmem>>, vector<4x362xf32>
    tpu.vector_store %arg18[%c0_98, %c0_99], %82 {strides = array<i32>} : memref<4x362xf32, #tpu.memory_space<vmem>>, vector<4x362xf32>,
    %c0_100 = arith.constant 0 : index
    %c0_101 = arith.constant 0 : index
    %c0_102 = arith.constant 0 : index
    %84 = vector.load %arg1[%c0_100, %c0_101, %c0_102] : memref<1x4x256xf32, #tpu.memory_space<vmem>>, vector<1x4x16xf32>
    %85 = vector.shape_cast %84 : vector<1x4x16xf32> to vector<4x16xf32>
    %c0_103 = arith.constant 0 : index
    %c38 = arith.constant 38 : index
    %86 = vector.load %arg16[%c0_103, %c38] : memref<4x362xf32, #tpu.memory_space<vmem>>, vector<4x16xf32>
    tpu.vector_store %arg16[%c0_103, %c38], %85 {strides = array<i32>} : memref<4x362xf32, #tpu.memory_space<vmem>>, vector<4x16xf32>,
    %c0_104 = arith.constant 0 : index
    %c0_105 = arith.constant 0 : index
    %c16 = arith.constant 16 : index
    %87 = vector.load %arg1[%c0_104, %c0_105, %c16] : memref<1x4x256xf32, #tpu.memory_space<vmem>>, vector<1x4x16xf32>
    %88 = vector.shape_cast %87 : vector<1x4x16xf32> to vector<4x16xf32>
    %c0_106 = arith.constant 0 : index
    %c56 = arith.constant 56 : index
    %89 = vector.load %arg16[%c0_106, %c56] : memref<4x362xf32, #tpu.memory_space<vmem>>, vector<4x16xf32>
    tpu.vector_store %arg16[%c0_106, %c56], %88 {strides = array<i32>} : memref<4x362xf32, #tpu.memory_space<vmem>>, vector<4x16xf32>,
    %c0_107 = arith.constant 0 : index
    %c0_108 = arith.constant 0 : index
    %c32 = arith.constant 32 : index
    %90 = vector.load %arg1[%c0_107, %c0_108, %c32] : memref<1x4x256xf32, #tpu.memory_space<vmem>>, vector<1x4x16xf32>
    %91 = vector.shape_cast %90 : vector<1x4x16xf32> to vector<4x16xf32>
    %c0_109 = arith.constant 0 : index
    %c74 = arith.constant 74 : index
    %92 = vector.load %arg16[%c0_109, %c74] : memref<4x362xf32, #tpu.memory_space<vmem>>, vector<4x16xf32>
    tpu.vector_store %arg16[%c0_109, %c74], %91 {strides = array<i32>} : memref<4x362xf32, #tpu.memory_space<vmem>>, vector<4x16xf32>,
    %c0_110 = arith.constant 0 : index
    %c0_111 = arith.constant 0 : index
    %c48 = arith.constant 48 : index
    %93 = vector.load %arg1[%c0_110, %c0_111, %c48] : memref<1x4x256xf32, #tpu.memory_space<vmem>>, vector<1x4x16xf32>
    %94 = vector.shape_cast %93 : vector<1x4x16xf32> to vector<4x16xf32>
    %c0_112 = arith.constant 0 : index
    %c92 = arith.constant 92 : index
    %95 = vector.load %arg16[%c0_112, %c92] : memref<4x362xf32, #tpu.memory_space<vmem>>, vector<4x16xf32>
    tpu.vector_store %arg16[%c0_112, %c92], %94 {strides = array<i32>} : memref<4x362xf32, #tpu.memory_space<vmem>>, vector<4x16xf32>,
    %c0_113 = arith.constant 0 : index
    %c0_114 = arith.constant 0 : index
    %c64 = arith.constant 64 : index
    %96 = vector.load %arg1[%c0_113, %c0_114, %c64] : memref<1x4x256xf32, #tpu.memory_space<vmem>>, vector<1x4x16xf32>
    %97 = vector.shape_cast %96 : vector<1x4x16xf32> to vector<4x16xf32>
    %c0_115 = arith.constant 0 : index
    %c110 = arith.constant 110 : index
    %98 = vector.load %arg16[%c0_115, %c110] : memref<4x362xf32, #tpu.memory_space<vmem>>, vector<4x16xf32>
    tpu.vector_store %arg16[%c0_115, %c110], %97 {strides = array<i32>} : memref<4x362xf32, #tpu.memory_space<vmem>>, vector<4x16xf32>,
    %c0_116 = arith.constant 0 : index
    %c0_117 = arith.constant 0 : index
    %c80 = arith.constant 80 : index
    %99 = vector.load %arg1[%c0_116, %c0_117, %c80] : memref<1x4x256xf32, #tpu.memory_space<vmem>>, vector<1x4x16xf32>
    %100 = vector.shape_cast %99 : vector<1x4x16xf32> to vector<4x16xf32>
    %c0_118 = arith.constant 0 : index
    %c128 = arith.constant 128 : index
    %101 = vector.load %arg16[%c0_118, %c128] : memref<4x362xf32, #tpu.memory_space<vmem>>, vector<4x16xf32>
    tpu.vector_store %arg16[%c0_118, %c128], %100 {strides = array<i32>} : memref<4x362xf32, #tpu.memory_space<vmem>>, vector<4x16xf32>,
    %c0_119 = arith.constant 0 : index
    %c0_120 = arith.constant 0 : index
    %c96 = arith.constant 96 : index
    %102 = vector.load %arg1[%c0_119, %c0_120, %c96] : memref<1x4x256xf32, #tpu.memory_space<vmem>>, vector<1x4x16xf32>
    %103 = vector.shape_cast %102 : vector<1x4x16xf32> to vector<4x16xf32>
    %c0_121 = arith.constant 0 : index
    %c146 = arith.constant 146 : index
    %104 = vector.load %arg16[%c0_121, %c146] : memref<4x362xf32, #tpu.memory_space<vmem>>, vector<4x16xf32>
    tpu.vector_store %arg16[%c0_121, %c146], %103 {strides = array<i32>} : memref<4x362xf32, #tpu.memory_space<vmem>>, vector<4x16xf32>,
    %c0_122 = arith.constant 0 : index
    %c0_123 = arith.constant 0 : index
    %c112 = arith.constant 112 : index
    %105 = vector.load %arg1[%c0_122, %c0_123, %c112] : memref<1x4x256xf32, #tpu.memory_space<vmem>>, vector<1x4x16xf32>
    %106 = vector.shape_cast %105 : vector<1x4x16xf32> to vector<4x16xf32>
    %c0_124 = arith.constant 0 : index
    %c164 = arith.constant 164 : index
    %107 = vector.load %arg16[%c0_124, %c164] : memref<4x362xf32, #tpu.memory_space<vmem>>, vector<4x16xf32>
    tpu.vector_store %arg16[%c0_124, %c164], %106 {strides = array<i32>} : memref<4x362xf32, #tpu.memory_space<vmem>>, vector<4x16xf32>,
    %c0_125 = arith.constant 0 : index
    %c0_126 = arith.constant 0 : index
    %c128_127 = arith.constant 128 : index
    %108 = vector.load %arg1[%c0_125, %c0_126, %c128_127] : memref<1x4x256xf32, #tpu.memory_space<vmem>>, vector<1x4x16xf32>
    %109 = vector.shape_cast %108 : vector<1x4x16xf32> to vector<4x16xf32>
    %c0_128 = arith.constant 0 : index
    %c182 = arith.constant 182 : index
    %110 = vector.load %arg16[%c0_128, %c182] : memref<4x362xf32, #tpu.memory_space<vmem>>, vector<4x16xf32>
    tpu.vector_store %arg16[%c0_128, %c182], %109 {strides = array<i32>} : memref<4x362xf32, #tpu.memory_space<vmem>>, vector<4x16xf32>,
    %c0_129 = arith.constant 0 : index
    %c0_130 = arith.constant 0 : index
    %c144 = arith.constant 144 : index
    %111 = vector.load %arg1[%c0_129, %c0_130, %c144] : memref<1x4x256xf32, #tpu.memory_space<vmem>>, vector<1x4x16xf32>
    %112 = vector.shape_cast %111 : vector<1x4x16xf32> to vector<4x16xf32>
    %c0_131 = arith.constant 0 : index
    %c200 = arith.constant 200 : index
    %113 = vector.load %arg16[%c0_131, %c200] : memref<4x362xf32, #tpu.memory_space<vmem>>, vector<4x16xf32>
    tpu.vector_store %arg16[%c0_131, %c200], %112 {strides = array<i32>} : memref<4x362xf32, #tpu.memory_space<vmem>>, vector<4x16xf32>,
    %c0_132 = arith.constant 0 : index
    %c0_133 = arith.constant 0 : index
    %c160 = arith.constant 160 : index
    %114 = vector.load %arg1[%c0_132, %c0_133, %c160] : memref<1x4x256xf32, #tpu.memory_space<vmem>>, vector<1x4x16xf32>
    %115 = vector.shape_cast %114 : vector<1x4x16xf32> to vector<4x16xf32>
    %c0_134 = arith.constant 0 : index
    %c218 = arith.constant 218 : index
    %116 = vector.load %arg16[%c0_134, %c218] : memref<4x362xf32, #tpu.memory_space<vmem>>, vector<4x16xf32>
    tpu.vector_store %arg16[%c0_134, %c218], %115 {strides = array<i32>} : memref<4x362xf32, #tpu.memory_space<vmem>>, vector<4x16xf32>,
    %c0_135 = arith.constant 0 : index
    %c0_136 = arith.constant 0 : index
    %c176 = arith.constant 176 : index
    %117 = vector.load %arg1[%c0_135, %c0_136, %c176] : memref<1x4x256xf32, #tpu.memory_space<vmem>>, vector<1x4x16xf32>
    %118 = vector.shape_cast %117 : vector<1x4x16xf32> to vector<4x16xf32>
    %c0_137 = arith.constant 0 : index
    %c236 = arith.constant 236 : index
    %119 = vector.load %arg16[%c0_137, %c236] : memref<4x362xf32, #tpu.memory_space<vmem>>, vector<4x16xf32>
    tpu.vector_store %arg16[%c0_137, %c236], %118 {strides = array<i32>} : memref<4x362xf32, #tpu.memory_space<vmem>>, vector<4x16xf32>,
    %c0_138 = arith.constant 0 : index
    %c0_139 = arith.constant 0 : index
    %c192 = arith.constant 192 : index
    %120 = vector.load %arg1[%c0_138, %c0_139, %c192] : memref<1x4x256xf32, #tpu.memory_space<vmem>>, vector<1x4x16xf32>
    %121 = vector.shape_cast %120 : vector<1x4x16xf32> to vector<4x16xf32>
    %c0_140 = arith.constant 0 : index
    %c254 = arith.constant 254 : index
    %122 = vector.load %arg16[%c0_140, %c254] : memref<4x362xf32, #tpu.memory_space<vmem>>, vector<4x16xf32>
    tpu.vector_store %arg16[%c0_140, %c254], %121 {strides = array<i32>} : memref<4x362xf32, #tpu.memory_space<vmem>>, vector<4x16xf32>,
    %c0_141 = arith.constant 0 : index
    %c0_142 = arith.constant 0 : index
    %c208 = arith.constant 208 : index
    %123 = vector.load %arg1[%c0_141, %c0_142, %c208] : memref<1x4x256xf32, #tpu.memory_space<vmem>>, vector<1x4x16xf32>
    %124 = vector.shape_cast %123 : vector<1x4x16xf32> to vector<4x16xf32>
    %c0_143 = arith.constant 0 : index
    %c272 = arith.constant 272 : index
    %125 = vector.load %arg16[%c0_143, %c272] : memref<4x362xf32, #tpu.memory_space<vmem>>, vector<4x16xf32>
    tpu.vector_store %arg16[%c0_143, %c272], %124 {strides = array<i32>} : memref<4x362xf32, #tpu.memory_space<vmem>>, vector<4x16xf32>,
    %c0_144 = arith.constant 0 : index
    %c0_145 = arith.constant 0 : index
    %c224 = arith.constant 224 : index
    %126 = vector.load %arg1[%c0_144, %c0_145, %c224] : memref<1x4x256xf32, #tpu.memory_space<vmem>>, vector<1x4x16xf32>
    %127 = vector.shape_cast %126 : vector<1x4x16xf32> to vector<4x16xf32>
    %c0_146 = arith.constant 0 : index
    %c290 = arith.constant 290 : index
    %128 = vector.load %arg16[%c0_146, %c290] : memref<4x362xf32, #tpu.memory_space<vmem>>, vector<4x16xf32>
    tpu.vector_store %arg16[%c0_146, %c290], %127 {strides = array<i32>} : memref<4x362xf32, #tpu.memory_space<vmem>>, vector<4x16xf32>,
    %c0_147 = arith.constant 0 : index
    %c0_148 = arith.constant 0 : index
    %c240 = arith.constant 240 : index
    %129 = vector.load %arg1[%c0_147, %c0_148, %c240] : memref<1x4x256xf32, #tpu.memory_space<vmem>>, vector<1x4x16xf32>
    %130 = vector.shape_cast %129 : vector<1x4x16xf32> to vector<4x16xf32>
    %c0_149 = arith.constant 0 : index
    %c308 = arith.constant 308 : index
    %131 = vector.load %arg16[%c0_149, %c308] : memref<4x362xf32, #tpu.memory_space<vmem>>, vector<4x16xf32>
    tpu.vector_store %arg16[%c0_149, %c308], %130 {strides = array<i32>} : memref<4x362xf32, #tpu.memory_space<vmem>>, vector<4x16xf32>,
    %cst_150 = arith.constant 0.000000e+00 : f32
    %132 = vector.broadcast %cst_150 : f32 to vector<4x324xf32>
    %c0_151 = arith.constant 0 : index
    %c0_152 = arith.constant 0 : index
    %133 = vector.load %arg16[%c0_151, %c0_152] : memref<4x362xf32, #tpu.memory_space<vmem>>, vector<4x324xf32>
    %cst_153 = arith.constant dense<0.000000e+00> : vector<4x324xf32>
    %134 = tpu.matmul %23, %133, %cst_153 {dimension_numbers = #tpu.dot_dimension_numbers<[1], [0], [0], [1], [0, 0, 1, 1], [], []>} : vector<4x4xf32>, vector<4x324xf32>, vector<4x324xf32> -> vector<4x324xf32>
    %135 = arith.addf %132, %134 : vector<4x324xf32>
    %c0_154 = arith.constant 0 : index
    %c1_155 = arith.constant 1 : index
    %136 = vector.load %arg16[%c0_154, %c1_155] : memref<4x362xf32, #tpu.memory_space<vmem>>, vector<4x324xf32>
    %cst_156 = arith.constant dense<0.000000e+00> : vector<4x324xf32>
    %137 = tpu.matmul %25, %136, %cst_156 {dimension_numbers = #tpu.dot_dimension_numbers<[1], [0], [0], [1], [0, 0, 1, 1], [], []>} : vector<4x4xf32>, vector<4x324xf32>, vector<4x324xf32> -> vector<4x324xf32>
    %138 = arith.addf %135, %137 : vector<4x324xf32>
    %c0_157 = arith.constant 0 : index
    %c2_158 = arith.constant 2 : index
    %139 = vector.load %arg16[%c0_157, %c2_158] : memref<4x362xf32, #tpu.memory_space<vmem>>, vector<4x324xf32>
    %cst_159 = arith.constant dense<0.000000e+00> : vector<4x324xf32>
    %140 = tpu.matmul %27, %139, %cst_159 {dimension_numbers = #tpu.dot_dimension_numbers<[1], [0], [0], [1], [0, 0, 1, 1], [], []>} : vector<4x4xf32>, vector<4x324xf32>, vector<4x324xf32> -> vector<4x324xf32>
    %141 = arith.addf %138, %140 : vector<4x324xf32>
    %c0_160 = arith.constant 0 : index
    %c18 = arith.constant 18 : index
    %142 = vector.load %arg16[%c0_160, %c18] : memref<4x362xf32, #tpu.memory_space<vmem>>, vector<4x324xf32>
    %cst_161 = arith.constant dense<0.000000e+00> : vector<4x324xf32>
    %143 = tpu.matmul %29, %142, %cst_161 {dimension_numbers = #tpu.dot_dimension_numbers<[1], [0], [0], [1], [0, 0, 1, 1], [], []>} : vector<4x4xf32>, vector<4x324xf32>, vector<4x324xf32> -> vector<4x324xf32>
    %144 = arith.addf %141, %143 : vector<4x324xf32>
    %c0_162 = arith.constant 0 : index
    %c19 = arith.constant 19 : index
    %145 = vector.load %arg16[%c0_162, %c19] : memref<4x362xf32, #tpu.memory_space<vmem>>, vector<4x324xf32>
    %cst_163 = arith.constant dense<0.000000e+00> : vector<4x324xf32>
    %146 = tpu.matmul %31, %145, %cst_163 {dimension_numbers = #tpu.dot_dimension_numbers<[1], [0], [0], [1], [0, 0, 1, 1], [], []>} : vector<4x4xf32>, vector<4x324xf32>, vector<4x324xf32> -> vector<4x324xf32>
    %147 = arith.addf %144, %146 : vector<4x324xf32>
    %c0_164 = arith.constant 0 : index
    %c20 = arith.constant 20 : index
    %148 = vector.load %arg16[%c0_164, %c20] : memref<4x362xf32, #tpu.memory_space<vmem>>, vector<4x324xf32>
    %cst_165 = arith.constant dense<0.000000e+00> : vector<4x324xf32>
    %149 = tpu.matmul %33, %148, %cst_165 {dimension_numbers = #tpu.dot_dimension_numbers<[1], [0], [0], [1], [0, 0, 1, 1], [], []>} : vector<4x4xf32>, vector<4x324xf32>, vector<4x324xf32> -> vector<4x324xf32>
    %150 = arith.addf %147, %149 : vector<4x324xf32>
    %c0_166 = arith.constant 0 : index
    %c36 = arith.constant 36 : index
    %151 = vector.load %arg16[%c0_166, %c36] : memref<4x362xf32, #tpu.memory_space<vmem>>, vector<4x324xf32>
    %cst_167 = arith.constant dense<0.000000e+00> : vector<4x324xf32>
    %152 = tpu.matmul %35, %151, %cst_167 {dimension_numbers = #tpu.dot_dimension_numbers<[1], [0], [0], [1], [0, 0, 1, 1], [], []>} : vector<4x4xf32>, vector<4x324xf32>, vector<4x324xf32> -> vector<4x324xf32>
    %153 = arith.addf %150, %152 : vector<4x324xf32>
    %c0_168 = arith.constant 0 : index
    %c37 = arith.constant 37 : index
    %154 = vector.load %arg16[%c0_168, %c37] : memref<4x362xf32, #tpu.memory_space<vmem>>, vector<4x324xf32>
    %cst_169 = arith.constant dense<0.000000e+00> : vector<4x324xf32>
    %155 = tpu.matmul %37, %154, %cst_169 {dimension_numbers = #tpu.dot_dimension_numbers<[1], [0], [0], [1], [0, 0, 1, 1], [], []>} : vector<4x4xf32>, vector<4x324xf32>, vector<4x324xf32> -> vector<4x324xf32>
    %156 = arith.addf %153, %155 : vector<4x324xf32>
    %c0_170 = arith.constant 0 : index
    %c38_171 = arith.constant 38 : index
    %157 = vector.load %arg16[%c0_170, %c38_171] : memref<4x362xf32, #tpu.memory_space<vmem>>, vector<4x324xf32>
    %cst_172 = arith.constant dense<0.000000e+00> : vector<4x324xf32>
    %158 = tpu.matmul %39, %157, %cst_172 {dimension_numbers = #tpu.dot_dimension_numbers<[1], [0], [0], [1], [0, 0, 1, 1], [], []>} : vector<4x4xf32>, vector<4x324xf32>, vector<4x324xf32> -> vector<4x324xf32>
    %159 = arith.addf %156, %158 : vector<4x324xf32>
    %c0_173 = arith.constant 0 : index
    %c19_174 = arith.constant 19 : index
    %160 = vector.load %arg16[%c0_173, %c19_174] : memref<4x362xf32, #tpu.memory_space<vmem>>, vector<4x324xf32>
    %cst_175 = arith.constant dense<0.000000e+00> : vector<4x324xf32>
    %161 = tpu.matmul %76, %160, %cst_175 {dimension_numbers = #tpu.dot_dimension_numbers<[1], [0], [0], [1], [0, 0, 1, 1], [], []>} : vector<4x4xf32>, vector<4x324xf32>, vector<4x324xf32> -> vector<4x324xf32>
    %162 = arith.addf %159, %161 : vector<4x324xf32>
    %163 = arith.mulf %162, %6 : vector<4x324xf32>
    %164 = arith.addf %163, %9 : vector<4x324xf32>
    %165 = arith.mulf %164, %2 : vector<4x324xf32>
    %c0_176 = arith.constant 0 : index
    %c19_177 = arith.constant 19 : index
    %166 = vector.load %arg17[%c0_176, %c19_177] : memref<4x362xf32, #tpu.memory_space<vmem>>, vector<4x324xf32>
    tpu.vector_store %arg17[%c0_176, %c19_177], %165 {strides = array<i32>} : memref<4x362xf32, #tpu.memory_space<vmem>>, vector<4x324xf32>,
    %cst_178 = arith.constant 0.000000e+00 : f32
    %167 = vector.broadcast %cst_178 : f32 to vector<4x324xf32>
    %c0_179 = arith.constant 0 : index
    %c0_180 = arith.constant 0 : index
    %168 = vector.load %arg17[%c0_179, %c0_180] : memref<4x362xf32, #tpu.memory_space<vmem>>, vector<4x324xf32>
    %cst_181 = arith.constant dense<0.000000e+00> : vector<4x324xf32>
    %169 = tpu.matmul %41, %168, %cst_181 {dimension_numbers = #tpu.dot_dimension_numbers<[1], [0], [0], [1], [0, 0, 1, 1], [], []>} : vector<4x4xf32>, vector<4x324xf32>, vector<4x324xf32> -> vector<4x324xf32>
    %170 = arith.addf %167, %169 : vector<4x324xf32>
    %c0_182 = arith.constant 0 : index
    %c1_183 = arith.constant 1 : index
    %171 = vector.load %arg17[%c0_182, %c1_183] : memref<4x362xf32, #tpu.memory_space<vmem>>, vector<4x324xf32>
    %cst_184 = arith.constant dense<0.000000e+00> : vector<4x324xf32>
    %172 = tpu.matmul %43, %171, %cst_184 {dimension_numbers = #tpu.dot_dimension_numbers<[1], [0], [0], [1], [0, 0, 1, 1], [], []>} : vector<4x4xf32>, vector<4x324xf32>, vector<4x324xf32> -> vector<4x324xf32>
    %173 = arith.addf %170, %172 : vector<4x324xf32>
    %c0_185 = arith.constant 0 : index
    %c2_186 = arith.constant 2 : index
    %174 = vector.load %arg17[%c0_185, %c2_186] : memref<4x362xf32, #tpu.memory_space<vmem>>, vector<4x324xf32>
    %cst_187 = arith.constant dense<0.000000e+00> : vector<4x324xf32>
    %175 = tpu.matmul %45, %174, %cst_187 {dimension_numbers = #tpu.dot_dimension_numbers<[1], [0], [0], [1], [0, 0, 1, 1], [], []>} : vector<4x4xf32>, vector<4x324xf32>, vector<4x324xf32> -> vector<4x324xf32>
    %176 = arith.addf %173, %175 : vector<4x324xf32>
    %c0_188 = arith.constant 0 : index
    %c18_189 = arith.constant 18 : index
    %177 = vector.load %arg17[%c0_188, %c18_189] : memref<4x362xf32, #tpu.memory_space<vmem>>, vector<4x324xf32>
    %cst_190 = arith.constant dense<0.000000e+00> : vector<4x324xf32>
    %178 = tpu.matmul %47, %177, %cst_190 {dimension_numbers = #tpu.dot_dimension_numbers<[1], [0], [0], [1], [0, 0, 1, 1], [], []>} : vector<4x4xf32>, vector<4x324xf32>, vector<4x324xf32> -> vector<4x324xf32>
    %179 = arith.addf %176, %178 : vector<4x324xf32>
    %c0_191 = arith.constant 0 : index
    %c19_192 = arith.constant 19 : index
    %180 = vector.load %arg17[%c0_191, %c19_192] : memref<4x362xf32, #tpu.memory_space<vmem>>, vector<4x324xf32>
    %cst_193 = arith.constant dense<0.000000e+00> : vector<4x324xf32>
    %181 = tpu.matmul %49, %180, %cst_193 {dimension_numbers = #tpu.dot_dimension_numbers<[1], [0], [0], [1], [0, 0, 1, 1], [], []>} : vector<4x4xf32>, vector<4x324xf32>, vector<4x324xf32> -> vector<4x324xf32>
    %182 = arith.addf %179, %181 : vector<4x324xf32>
    %c0_194 = arith.constant 0 : index
    %c20_195 = arith.constant 20 : index
    %183 = vector.load %arg17[%c0_194, %c20_195] : memref<4x362xf32, #tpu.memory_space<vmem>>, vector<4x324xf32>
    %cst_196 = arith.constant dense<0.000000e+00> : vector<4x324xf32>
    %184 = tpu.matmul %51, %183, %cst_196 {dimension_numbers = #tpu.dot_dimension_numbers<[1], [0], [0], [1], [0, 0, 1, 1], [], []>} : vector<4x4xf32>, vector<4x324xf32>, vector<4x324xf32> -> vector<4x324xf32>
    %185 = arith.addf %182, %184 : vector<4x324xf32>
    %c0_197 = arith.constant 0 : index
    %c36_198 = arith.constant 36 : index
    %186 = vector.load %arg17[%c0_197, %c36_198] : memref<4x362xf32, #tpu.memory_space<vmem>>, vector<4x324xf32>
    %cst_199 = arith.constant dense<0.000000e+00> : vector<4x324xf32>
    %187 = tpu.matmul %53, %186, %cst_199 {dimension_numbers = #tpu.dot_dimension_numbers<[1], [0], [0], [1], [0, 0, 1, 1], [], []>} : vector<4x4xf32>, vector<4x324xf32>, vector<4x324xf32> -> vector<4x324xf32>
    %188 = arith.addf %185, %187 : vector<4x324xf32>
    %c0_200 = arith.constant 0 : index
    %c37_201 = arith.constant 37 : index
    %189 = vector.load %arg17[%c0_200, %c37_201] : memref<4x362xf32, #tpu.memory_space<vmem>>, vector<4x324xf32>
    %cst_202 = arith.constant dense<0.000000e+00> : vector<4x324xf32>
    %190 = tpu.matmul %55, %189, %cst_202 {dimension_numbers = #tpu.dot_dimension_numbers<[1], [0], [0], [1], [0, 0, 1, 1], [], []>} : vector<4x4xf32>, vector<4x324xf32>, vector<4x324xf32> -> vector<4x324xf32>
    %191 = arith.addf %188, %190 : vector<4x324xf32>
    %c0_203 = arith.constant 0 : index
    %c38_204 = arith.constant 38 : index
    %192 = vector.load %arg17[%c0_203, %c38_204] : memref<4x362xf32, #tpu.memory_space<vmem>>, vector<4x324xf32>
    %cst_205 = arith.constant dense<0.000000e+00> : vector<4x324xf32>
    %193 = tpu.matmul %57, %192, %cst_205 {dimension_numbers = #tpu.dot_dimension_numbers<[1], [0], [0], [1], [0, 0, 1, 1], [], []>} : vector<4x4xf32>, vector<4x324xf32>, vector<4x324xf32> -> vector<4x324xf32>
    %194 = arith.addf %191, %193 : vector<4x324xf32>
    %c0_206 = arith.constant 0 : index
    %c19_207 = arith.constant 19 : index
    %195 = vector.load %arg17[%c0_206, %c19_207] : memref<4x362xf32, #tpu.memory_space<vmem>>, vector<4x324xf32>
    %cst_208 = arith.constant dense<0.000000e+00> : vector<4x324xf32>
    %196 = tpu.matmul %77, %195, %cst_208 {dimension_numbers = #tpu.dot_dimension_numbers<[1], [0], [0], [1], [0, 0, 1, 1], [], []>} : vector<4x4xf32>, vector<4x324xf32>, vector<4x324xf32> -> vector<4x324xf32>
    %197 = arith.addf %194, %196 : vector<4x324xf32>
    %198 = arith.mulf %197, %12 : vector<4x324xf32>
    %199 = arith.addf %198, %15 : vector<4x324xf32>
    %cst_209 = arith.constant 0.000000e+00 : f32
    %200 = vector.broadcast %cst_209 : f32 to vector<4x324xf32>
    %201 = arith.subf %200, %199 : vector<4x324xf32>
    %202 = math.exp %201 : vector<4x324xf32>
    %cst_210 = arith.constant 1.000000e+00 : f32
    %203 = vector.broadcast %cst_210 : f32 to vector<4x324xf32>
    %204 = arith.addf %203, %202 : vector<4x324xf32>
    %205 = tpu.reciprocal %204 {approx = true} : vector<4x324xf32> -> vector<4x324xf32>
    %206 = arith.mulf %199, %205 : vector<4x324xf32>
    %207 = arith.mulf %206, %2 : vector<4x324xf32>
    %c0_211 = arith.constant 0 : index
    %c19_212 = arith.constant 19 : index
    %208 = vector.load %arg18[%c0_211, %c19_212] : memref<4x362xf32, #tpu.memory_space<vmem>>, vector<4x324xf32>
    tpu.vector_store %arg18[%c0_211, %c19_212], %207 {strides = array<i32>} : memref<4x362xf32, #tpu.memory_space<vmem>>, vector<4x324xf32>,
    %cst_213 = arith.constant 0.000000e+00 : f32
    %209 = vector.broadcast %cst_213 : f32 to vector<4x324xf32>
    %c0_214 = arith.constant 0 : index
    %c0_215 = arith.constant 0 : index
    %210 = vector.load %arg18[%c0_214, %c0_215] : memref<4x362xf32, #tpu.memory_space<vmem>>, vector<4x324xf32>
    %cst_216 = arith.constant dense<0.000000e+00> : vector<4x324xf32>
    %211 = tpu.matmul %41, %210, %cst_216 {dimension_numbers = #tpu.dot_dimension_numbers<[1], [0], [0], [1], [0, 0, 1, 1], [], []>} : vector<4x4xf32>, vector<4x324xf32>, vector<4x324xf32> -> vector<4x324xf32>
    %212 = arith.addf %209, %211 : vector<4x324xf32>
    %c0_217 = arith.constant 0 : index
    %c1_218 = arith.constant 1 : index
    %213 = vector.load %arg18[%c0_217, %c1_218] : memref<4x362xf32, #tpu.memory_space<vmem>>, vector<4x324xf32>
    %cst_219 = arith.constant dense<0.000000e+00> : vector<4x324xf32>
    %214 = tpu.matmul %43, %213, %cst_219 {dimension_numbers = #tpu.dot_dimension_numbers<[1], [0], [0], [1], [0, 0, 1, 1], [], []>} : vector<4x4xf32>, vector<4x324xf32>, vector<4x324xf32> -> vector<4x324xf32>
    %215 = arith.addf %212, %214 : vector<4x324xf32>
    %c0_220 = arith.constant 0 : index
    %c2_221 = arith.constant 2 : index
    %216 = vector.load %arg18[%c0_220, %c2_221] : memref<4x362xf32, #tpu.memory_space<vmem>>, vector<4x324xf32>
    %cst_222 = arith.constant dense<0.000000e+00> : vector<4x324xf32>
    %217 = tpu.matmul %45, %216, %cst_222 {dimension_numbers = #tpu.dot_dimension_numbers<[1], [0], [0], [1], [0, 0, 1, 1], [], []>} : vector<4x4xf32>, vector<4x324xf32>, vector<4x324xf32> -> vector<4x324xf32>
    %218 = arith.addf %215, %217 : vector<4x324xf32>
    %c0_223 = arith.constant 0 : index
    %c18_224 = arith.constant 18 : index
    %219 = vector.load %arg18[%c0_223, %c18_224] : memref<4x362xf32, #tpu.memory_space<vmem>>, vector<4x324xf32>
    %cst_225 = arith.constant dense<0.000000e+00> : vector<4x324xf32>
    %220 = tpu.matmul %47, %219, %cst_225 {dimension_numbers = #tpu.dot_dimension_numbers<[1], [0], [0], [1], [0, 0, 1, 1], [], []>} : vector<4x4xf32>, vector<4x324xf32>, vector<4x324xf32> -> vector<4x324xf32>
    %221 = arith.addf %218, %220 : vector<4x324xf32>
    %c0_226 = arith.constant 0 : index
    %c19_227 = arith.constant 19 : index
    %222 = vector.load %arg18[%c0_226, %c19_227] : memref<4x362xf32, #tpu.memory_space<vmem>>, vector<4x324xf32>
    %cst_228 = arith.constant dense<0.000000e+00> : vector<4x324xf32>
    %223 = tpu.matmul %49, %222, %cst_228 {dimension_numbers = #tpu.dot_dimension_numbers<[1], [0], [0], [1], [0, 0, 1, 1], [], []>} : vector<4x4xf32>, vector<4x324xf32>, vector<4x324xf32> -> vector<4x324xf32>
    %224 = arith.addf %221, %223 : vector<4x324xf32>
    %c0_229 = arith.constant 0 : index
    %c20_230 = arith.constant 20 : index
    %225 = vector.load %arg18[%c0_229, %c20_230] : memref<4x362xf32, #tpu.memory_space<vmem>>, vector<4x324xf32>
    %cst_231 = arith.constant dense<0.000000e+00> : vector<4x324xf32>
    %226 = tpu.matmul %51, %225, %cst_231 {dimension_numbers = #tpu.dot_dimension_numbers<[1], [0], [0], [1], [0, 0, 1, 1], [], []>} : vector<4x4xf32>, vector<4x324xf32>, vector<4x324xf32> -> vector<4x324xf32>
    %227 = arith.addf %224, %226 : vector<4x324xf32>
    %c0_232 = arith.constant 0 : index
    %c36_233 = arith.constant 36 : index
    %228 = vector.load %arg18[%c0_232, %c36_233] : memref<4x362xf32, #tpu.memory_space<vmem>>, vector<4x324xf32>
    %cst_234 = arith.constant dense<0.000000e+00> : vector<4x324xf32>
    %229 = tpu.matmul %53, %228, %cst_234 {dimension_numbers = #tpu.dot_dimension_numbers<[1], [0], [0], [1], [0, 0, 1, 1], [], []>} : vector<4x4xf32>, vector<4x324xf32>, vector<4x324xf32> -> vector<4x324xf32>
    %230 = arith.addf %227, %229 : vector<4x324xf32>
    %c0_235 = arith.constant 0 : index
    %c37_236 = arith.constant 37 : index
    %231 = vector.load %arg18[%c0_235, %c37_236] : memref<4x362xf32, #tpu.memory_space<vmem>>, vector<4x324xf32>
    %cst_237 = arith.constant dense<0.000000e+00> : vector<4x324xf32>
    %232 = tpu.matmul %55, %231, %cst_237 {dimension_numbers = #tpu.dot_dimension_numbers<[1], [0], [0], [1], [0, 0, 1, 1], [], []>} : vector<4x4xf32>, vector<4x324xf32>, vector<4x324xf32> -> vector<4x324xf32>
    %233 = arith.addf %230, %232 : vector<4x324xf32>
    %c0_238 = arith.constant 0 : index
    %c38_239 = arith.constant 38 : index
    %234 = vector.load %arg18[%c0_238, %c38_239] : memref<4x362xf32, #tpu.memory_space<vmem>>, vector<4x324xf32>
    %cst_240 = arith.constant dense<0.000000e+00> : vector<4x324xf32>
    %235 = tpu.matmul %57, %234, %cst_240 {dimension_numbers = #tpu.dot_dimension_numbers<[1], [0], [0], [1], [0, 0, 1, 1], [], []>} : vector<4x4xf32>, vector<4x324xf32>, vector<4x324xf32> -> vector<4x324xf32>
    %236 = arith.addf %233, %235 : vector<4x324xf32>
    %c0_241 = arith.constant 0 : index
    %c19_242 = arith.constant 19 : index
    %237 = vector.load %arg18[%c0_241, %c19_242] : memref<4x362xf32, #tpu.memory_space<vmem>>, vector<4x324xf32>
    %cst_243 = arith.constant dense<0.000000e+00> : vector<4x324xf32>
    %238 = tpu.matmul %77, %237, %cst_243 {dimension_numbers = #tpu.dot_dimension_numbers<[1], [0], [0], [1], [0, 0, 1, 1], [], []>} : vector<4x4xf32>, vector<4x324xf32>, vector<4x324xf32> -> vector<4x324xf32>
    %239 = arith.addf %236, %238 : vector<4x324xf32>
    %240 = arith.mulf %239, %12 : vector<4x324xf32>
    %241 = arith.addf %240, %15 : vector<4x324xf32>
    %cst_244 = arith.constant 0.000000e+00 : f32
    %242 = vector.broadcast %cst_244 : f32 to vector<4x324xf32>
    %243 = arith.subf %242, %241 : vector<4x324xf32>
    %244 = math.exp %243 : vector<4x324xf32>
    %cst_245 = arith.constant 1.000000e+00 : f32
    %245 = vector.broadcast %cst_245 : f32 to vector<4x324xf32>
    %246 = arith.addf %245, %244 : vector<4x324xf32>
    %247 = tpu.reciprocal %246 {approx = true} : vector<4x324xf32> -> vector<4x324xf32>
    %248 = arith.mulf %241, %247 : vector<4x324xf32>
    %249 = arith.mulf %248, %2 : vector<4x324xf32>
    %c0_246 = arith.constant 0 : index
    %c19_247 = arith.constant 19 : index
    %250 = vector.load %arg17[%c0_246, %c19_247] : memref<4x362xf32, #tpu.memory_space<vmem>>, vector<4x324xf32>
    tpu.vector_store %arg17[%c0_246, %c19_247], %249 {strides = array<i32>} : memref<4x362xf32, #tpu.memory_space<vmem>>, vector<4x324xf32>,
    %cst_248 = arith.constant 0.000000e+00 : f32
    %251 = vector.broadcast %cst_248 : f32 to vector<4x324xf32>
    %c0_249 = arith.constant 0 : index
    %c0_250 = arith.constant 0 : index
    %252 = vector.load %arg17[%c0_249, %c0_250] : memref<4x362xf32, #tpu.memory_space<vmem>>, vector<4x324xf32>
    %cst_251 = arith.constant dense<0.000000e+00> : vector<4x324xf32>
    %253 = tpu.matmul %59, %252, %cst_251 {dimension_numbers = #tpu.dot_dimension_numbers<[1], [0], [0], [1], [0, 0, 1, 1], [], []>} : vector<4x4xf32>, vector<4x324xf32>, vector<4x324xf32> -> vector<4x324xf32>
    %254 = arith.addf %251, %253 : vector<4x324xf32>
    %c0_252 = arith.constant 0 : index
    %c1_253 = arith.constant 1 : index
    %255 = vector.load %arg17[%c0_252, %c1_253] : memref<4x362xf32, #tpu.memory_space<vmem>>, vector<4x324xf32>
    %cst_254 = arith.constant dense<0.000000e+00> : vector<4x324xf32>
    %256 = tpu.matmul %61, %255, %cst_254 {dimension_numbers = #tpu.dot_dimension_numbers<[1], [0], [0], [1], [0, 0, 1, 1], [], []>} : vector<4x4xf32>, vector<4x324xf32>, vector<4x324xf32> -> vector<4x324xf32>
    %257 = arith.addf %254, %256 : vector<4x324xf32>
    %c0_255 = arith.constant 0 : index
    %c2_256 = arith.constant 2 : index
    %258 = vector.load %arg17[%c0_255, %c2_256] : memref<4x362xf32, #tpu.memory_space<vmem>>, vector<4x324xf32>
    %cst_257 = arith.constant dense<0.000000e+00> : vector<4x324xf32>
    %259 = tpu.matmul %63, %258, %cst_257 {dimension_numbers = #tpu.dot_dimension_numbers<[1], [0], [0], [1], [0, 0, 1, 1], [], []>} : vector<4x4xf32>, vector<4x324xf32>, vector<4x324xf32> -> vector<4x324xf32>
    %260 = arith.addf %257, %259 : vector<4x324xf32>
    %c0_258 = arith.constant 0 : index
    %c18_259 = arith.constant 18 : index
    %261 = vector.load %arg17[%c0_258, %c18_259] : memref<4x362xf32, #tpu.memory_space<vmem>>, vector<4x324xf32>
    %cst_260 = arith.constant dense<0.000000e+00> : vector<4x324xf32>
    %262 = tpu.matmul %65, %261, %cst_260 {dimension_numbers = #tpu.dot_dimension_numbers<[1], [0], [0], [1], [0, 0, 1, 1], [], []>} : vector<4x4xf32>, vector<4x324xf32>, vector<4x324xf32> -> vector<4x324xf32>
    %263 = arith.addf %260, %262 : vector<4x324xf32>
    %c0_261 = arith.constant 0 : index
    %c19_262 = arith.constant 19 : index
    %264 = vector.load %arg17[%c0_261, %c19_262] : memref<4x362xf32, #tpu.memory_space<vmem>>, vector<4x324xf32>
    %cst_263 = arith.constant dense<0.000000e+00> : vector<4x324xf32>
    %265 = tpu.matmul %67, %264, %cst_263 {dimension_numbers = #tpu.dot_dimension_numbers<[1], [0], [0], [1], [0, 0, 1, 1], [], []>} : vector<4x4xf32>, vector<4x324xf32>, vector<4x324xf32> -> vector<4x324xf32>
    %266 = arith.addf %263, %265 : vector<4x324xf32>
    %c0_264 = arith.constant 0 : index
    %c20_265 = arith.constant 20 : index
    %267 = vector.load %arg17[%c0_264, %c20_265] : memref<4x362xf32, #tpu.memory_space<vmem>>, vector<4x324xf32>
    %cst_266 = arith.constant dense<0.000000e+00> : vector<4x324xf32>
    %268 = tpu.matmul %69, %267, %cst_266 {dimension_numbers = #tpu.dot_dimension_numbers<[1], [0], [0], [1], [0, 0, 1, 1], [], []>} : vector<4x4xf32>, vector<4x324xf32>, vector<4x324xf32> -> vector<4x324xf32>
    %269 = arith.addf %266, %268 : vector<4x324xf32>
    %c0_267 = arith.constant 0 : index
    %c36_268 = arith.constant 36 : index
    %270 = vector.load %arg17[%c0_267, %c36_268] : memref<4x362xf32, #tpu.memory_space<vmem>>, vector<4x324xf32>
    %cst_269 = arith.constant dense<0.000000e+00> : vector<4x324xf32>
    %271 = tpu.matmul %71, %270, %cst_269 {dimension_numbers = #tpu.dot_dimension_numbers<[1], [0], [0], [1], [0, 0, 1, 1], [], []>} : vector<4x4xf32>, vector<4x324xf32>, vector<4x324xf32> -> vector<4x324xf32>
    %272 = arith.addf %269, %271 : vector<4x324xf32>
    %c0_270 = arith.constant 0 : index
    %c37_271 = arith.constant 37 : index
    %273 = vector.load %arg17[%c0_270, %c37_271] : memref<4x362xf32, #tpu.memory_space<vmem>>, vector<4x324xf32>
    %cst_272 = arith.constant dense<0.000000e+00> : vector<4x324xf32>
    %274 = tpu.matmul %73, %273, %cst_272 {dimension_numbers = #tpu.dot_dimension_numbers<[1], [0], [0], [1], [0, 0, 1, 1], [], []>} : vector<4x4xf32>, vector<4x324xf32>, vector<4x324xf32> -> vector<4x324xf32>
    %275 = arith.addf %272, %274 : vector<4x324xf32>
    %c0_273 = arith.constant 0 : index
    %c38_274 = arith.constant 38 : index
    %276 = vector.load %arg17[%c0_273, %c38_274] : memref<4x362xf32, #tpu.memory_space<vmem>>, vector<4x324xf32>
    %cst_275 = arith.constant dense<0.000000e+00> : vector<4x324xf32>
    %277 = tpu.matmul %75, %276, %cst_275 {dimension_numbers = #tpu.dot_dimension_numbers<[1], [0], [0], [1], [0, 0, 1, 1], [], []>} : vector<4x4xf32>, vector<4x324xf32>, vector<4x324xf32> -> vector<4x324xf32>
    %278 = arith.addf %275, %277 : vector<4x324xf32>
    %279 = arith.mulf %278, %18 : vector<4x324xf32>
    %280 = arith.addf %279, %21 : vector<4x324xf32>
    %cst_276 = arith.constant 0.000000e+00 : f32
    %281 = vector.broadcast %cst_276 : f32 to vector<4x324xf32>
    %282 = arith.subf %281, %280 : vector<4x324xf32>
    %283 = math.exp %282 : vector<4x324xf32>
    %cst_277 = arith.constant 1.000000e+00 : f32
    %284 = vector.broadcast %cst_277 : f32 to vector<4x324xf32>
    %285 = arith.addf %284, %283 : vector<4x324xf32>
    %286 = tpu.reciprocal %285 {approx = true} : vector<4x324xf32> -> vector<4x324xf32>
    %287 = arith.mulf %280, %286 : vector<4x324xf32>
    %288 = arith.mulf %287, %2 : vector<4x324xf32>
    %cst_278 = arith.constant dense<0.000000e+00> : vector<4x64xf32>
    %289 = tpu.matmul %288, %3, %cst_278 {dimension_numbers = #tpu.dot_dimension_numbers<[1], [0], [0], [1], [0, 0, 1, 1], [], []>} : vector<4x324xf32>, vector<324x64xf32>, vector<4x64xf32> -> vector<4x64xf32>
    %c0_279 = arith.constant 0 : index
    %c0_280 = arith.constant 0 : index
    %c0_281 = arith.constant 0 : index
    %290 = vector.load %arg15[%c0_279, %c0_280, %c0_281] : memref<1x4x64xf32, #tpu.memory_space<vmem>>, vector<1x4x64xf32>
    %291 = vector.shape_cast %290 : vector<1x4x64xf32> to vector<4x64xf32>
    %292 = vector.shape_cast %289 : vector<4x64xf32> to vector<1x4x64xf32>
    tpu.vector_store %arg15[%c0_279, %c0_280, %c0_281], %292 {strides = array<i32>} : memref<1x4x64xf32, #tpu.memory_space<vmem>>, vector<1x4x64xf32>,
    return
  }
  func.func @transform_0(%arg0: i32) -> (i32, i32, i32) {
    %c0_i32 = arith.constant 0 : i32
    %c0_i32_0 = arith.constant 0 : i32
    %c0_i32_1 = arith.constant 0 : i32
    return %arg0, %c0_i32, %c0_i32_0 : i32, i32, i32
  }
  func.func @transform_1(%arg0: i32) -> (i32, i32) {
    %c0_i32 = arith.constant 0 : i32
    %c0_i32_0 = arith.constant 0 : i32
    %c0_i32_1 = arith.constant 0 : i32
    return %c0_i32, %c0_i32_0 : i32, i32
  }
  func.func @transform_2(%arg0: i32) -> (i32, i32) {
    %c0_i32 = arith.constant 0 : i32
    %c0_i32_0 = arith.constant 0 : i32
    %c0_i32_1 = arith.constant 0 : i32
    return %c0_i32, %c0_i32_0 : i32, i32
  }
  func.func @transform_3(%arg0: i32) -> (i32, i32, i32) {
    %c0_i32 = arith.constant 0 : i32
    %c0_i32_0 = arith.constant 0 : i32
    %c0_i32_1 = arith.constant 0 : i32
    %c0_i32_2 = arith.constant 0 : i32
    return %c0_i32, %c0_i32_0, %c0_i32_1 : i32, i32, i32
  }
  func.func @transform_4(%arg0: i32) -> (i32, i32) {
    %c0_i32 = arith.constant 0 : i32
    %c0_i32_0 = arith.constant 0 : i32
    %c0_i32_1 = arith.constant 0 : i32
    return %c0_i32, %c0_i32_0 : i32, i32
  }
  func.func @transform_5(%arg0: i32) -> (i32, i32) {
    %c0_i32 = arith.constant 0 : i32
    %c0_i32_0 = arith.constant 0 : i32
    %c0_i32_1 = arith.constant 0 : i32
    return %c0_i32, %c0_i32_0 : i32, i32
  }
  func.func @transform_6(%arg0: i32) -> (i32, i32) {
    %c0_i32 = arith.constant 0 : i32
    %c0_i32_0 = arith.constant 0 : i32
    %c0_i32_1 = arith.constant 0 : i32
    return %c0_i32, %c0_i32_0 : i32, i32
  }
  func.func @transform_7(%arg0: i32) -> (i32, i32, i32) {
    %c0_i32 = arith.constant 0 : i32
    %c0_i32_0 = arith.constant 0 : i32
    %c0_i32_1 = arith.constant 0 : i32
    %c0_i32_2 = arith.constant 0 : i32
    return %c0_i32, %c0_i32_0, %c0_i32_1 : i32, i32, i32
  }
  func.func @transform_8(%arg0: i32) -> (i32, i32) {
    %c0_i32 = arith.constant 0 : i32
    %c0_i32_0 = arith.constant 0 : i32
    %c0_i32_1 = arith.constant 0 : i32
    return %c0_i32, %c0_i32_0 : i32, i32
  }
  func.func @transform_9(%arg0: i32) -> (i32, i32) {
    %c0_i32 = arith.constant 0 : i32
    %c0_i32_0 = arith.constant 0 : i32
    %c0_i32_1 = arith.constant 0 : i32
    return %c0_i32, %c0_i32_0 : i32, i32
  }
  func.func @transform_10(%arg0: i32) -> (i32, i32) {
    %c0_i32 = arith.constant 0 : i32
    %c0_i32_0 = arith.constant 0 : i32
    %c0_i32_1 = arith.constant 0 : i32
    return %c0_i32, %c0_i32_0 : i32, i32
  }
  func.func @transform_11(%arg0: i32) -> (i32, i32, i32) {
    %c0_i32 = arith.constant 0 : i32
    %c0_i32_0 = arith.constant 0 : i32
    %c0_i32_1 = arith.constant 0 : i32
    %c0_i32_2 = arith.constant 0 : i32
    return %c0_i32, %c0_i32_0, %c0_i32_1 : i32, i32, i32
  }
  func.func @transform_12(%arg0: i32) -> (i32, i32) {
    %c0_i32 = arith.constant 0 : i32
    %c0_i32_0 = arith.constant 0 : i32
    %c0_i32_1 = arith.constant 0 : i32
    return %c0_i32, %c0_i32_0 : i32, i32
  }
  func.func @transform_13(%arg0: i32) -> (i32, i32) {
    %c0_i32 = arith.constant 0 : i32
    %c0_i32_0 = arith.constant 0 : i32
    %c0_i32_1 = arith.constant 0 : i32
    return %c0_i32, %c0_i32_0 : i32, i32
  }
  func.func @transform_14(%arg0: i32) -> (i32, i32, i32) {
    %c0_i32 = arith.constant 0 : i32
    %c0_i32_0 = arith.constant 0 : i32
    %c0_i32_1 = arith.constant 0 : i32
    return %arg0, %c0_i32, %c0_i32_0 : i32, i32, i32
  }
}

</mosaic_0001>

<bundles_post_ra>
// kernel: rvb2_n_forward.1
= control target key start
LH: loop header
LB: loop body
LE: loop exit
PB: predicated region body
PF: predicated region fallthrough
CT: control target
= control target key end

     0   :  { %s8161_s29 = smov 0   ;;  %s9166_s0 = inlined_call_operand.vmem [shape: f32[2,4,256], index: 0, kind: input, shape index: {}]   ;;  %s9167_s1 = inlined_call_operand.vmem [shape: f32[1,324], index: 1, kind: input, shape index: {}]   ;;  %s9168_s2 = inlined_call_operand.vmem [shape: f32[324,64], index: 2, kind: input, shape index: {}]   ;;  %s9169_s3 = inlined_call_operand.vmem [shape: f32[9,4,4], index: 3, kind: input, shape index: {}]   ;;  %s9170_s4 = inlined_call_operand.vmem [shape: f32[4,4], index: 4, kind: input, shape index: {}]   ;;  %s9171_s5 = inlined_call_operand.vmem [shape: f32[4,1], index: 5, kind: input, shape index: {}]   ;;  %s9172_s6 = inlined_call_operand.vmem [shape: f32[4,1], index: 6, kind: input, shape index: {}]   ;;  %s9173_s7 = inlined_call_operand.vmem [shape: f32[9,4,4], index: 7, kind: input, shape index: {}]   ;;  %s9174_s8 = inlined_call_operand.vmem [shape: f32[4,4], index: 8, kind: input, shape index: {}]   ;;  %s9175_s9 = inlined_call_operand.vmem [shape: f32[4,1], index: 9, kind: input, shape index: {}]   ;;  %s9176_s10 = inlined_call_operand.vmem [shape: f32[4,1], index: 10, kind: input, shape index: {}]   ;;  %s9177_s11 = inlined_call_operand.vmem [shape: f32[9,4,4], index: 11, kind: input, shape index: {}]   ;;  %s9178_s12 = inlined_call_operand.vmem [shape: f32[4,1], index: 12, kind: input, shape index: {}]   ;;  %s9179_s13 = inlined_call_operand.vmem [shape: f32[4,1], index: 13, kind: input, shape index: {}]   ;;  %s9180_s14 = inlined_call_operand.vmem [shape: f32[2,4,64], index: 14, kind: output, shape index: {}]  }
   0x1 LB: > { %s7400_s30 = sadd.s32 4294967295, %s8056_s29   ;;  %p7404_p0 = scmp.ge.s32.totalorder %s8056_s29, 1  ;;  %s8056_s29 = sphi %s8161_s29, %s24_s29  }
   0x2   : > { %p412_p1 = scmp.lt.s32.totalorder %s8056_s29, 3 }
   0x4   : > { %p413_p2 = pnand %p7404_p0, %p412_p1 }
   0x5   : > { %p457_p3 = scmp.lt.s32.totalorder (!%p413_p2), %s7400_s30, 1  ;;  %s8059_s19 = smov (!%p413_p2), 48  }
   0x6   : > { %416 = sbr.rel (%p413_p2) target bundleno = 2327 (0x917), region = 76  ;;  %s8060_s20 = smov (!%p413_p2), 52  }
   0x7   : > { %s8061_s21 = smov (!%p413_p2), 50   ;;  %s8062_s22 = smov (!%p413_p2), 54  }
   0x8   : > { %s8063_s23 = smov (!%p413_p2), 38   ;;  %s8064_s24 = smov (!%p413_p2), 56  }
   0x9   : > { %s8065_s25 = smov (!%p413_p2), 62   ;;  %s8066_s26 = smov (!%p413_p2), 40  }
   0xa   : > { %s8067_s27 = smov (!%p413_p2), 58   ;;  %s8068_s28 = smov (!%p413_p2), 42  }
   0xb   : > { %v8058_v0 = vmov 0.0   ;;  %s9187_s30 = smov (!%p457_p3, %s7400_s30), 1  ;;  %vm614_vm0 = vcmask 863232   ;;  %s8070_s16 = smov 44   ;;  %vm660_vm1 = vcmask 125952   ;;  %vm667_vm2 = vcmask 273552  }
   0xc   : > { %613 = vst [vmem:[#allocation2] sm:$0xff] %v8058_v0  ;;  %616 = vst [vmem:[#allocation3] sm:$0xff] %v8058_v0  ;;  %826 = vmatprep.mubr.f32.mxu1 %v8058_v0  ;;  %1140 = vmatprep.mubr.f32.mxu0 %v8058_v0  ;;  %s7631_s15 = sshll.u32 %s9187_s30, 3  ;;  %s8071_s17 = smov 46   ;;  %vm674_vm3 = vcmask 421152   ;;  %vm681_vm4 = vcmask 568752  }
   0xd   : > { %618 = vst [vmem:[#allocation4] sm:$0xff] %v8058_v0  ;;  %s8180_s18 = scalar_lea.vmem %s9166_s0, %s7631_s15  ;;  %615 = vst.msk [vmem:[#allocation2 + $0x8] sm:$0xf] %vm614_vm0, %v8058_v0  ;;  %s8069_s15 = smov 60   ;;  %vm625_vm5 = vcmask 437552   ;;  %vm688_vm6 = vcmask 716352  }
   0xe   : > { %v655_v1 = vld [vmem:[%s8180_s18] sm:$0xf]  ;;  %v676_v4 = vld [vmem:[%s8180_s18 + $0x4] sm:$0xf]  ;;  %617 = vst.msk [vmem:[#allocation3 + $0x8] sm:$0xf] %vm614_vm0, %v8058_v0 }
   0xf   : > { %v669_v2 = vld [vmem:[%s8180_s18] sm:$0xf]  ;;  %657 = vrot.lane.b32.xlu0 %v655_v1, %s8059_s19  ;;  %v683_v6 = vld [vmem:[%s8180_s18 + $0x4] sm:$0xf]  ;;  %619 = vst.msk [vmem:[#allocation4 + $0x8] sm:$0xf] %vm614_vm0, %v8058_v0 }
  0x10   : > { %671 = vrot.lane.b32.xlu1 %v669_v2, %s8060_s20  ;;  %v662_v3 = vld [vmem:[%s8180_s18] sm:$0xf]  ;;  %v704_v7 = vld [vmem:[%s8180_s18 + $0x4] sm:$0xf]  ;;  %s8072_s19 = smov 64   ;;  %s8073_s20 = smov 66  }
  0x11   : > { %v620_v5 = vld [vmem:[%s8180_s18] sm:$0xf]  ;;  %v690_v9 = vld [vmem:[%s8180_s18 + $0x4] sm:$0xf]  ;;  %vm632_vm7 = vcmask 585152   ;;  %vm695_vm8 = vcmask 863952  }
  0x12   : > { %v627_v8 = vld [vmem:[%s8180_s18] sm:$0xf]  ;;  %v697_v11 = vld [vmem:[%s8180_s18 + $0x4] sm:$0xf]  ;;  %vm639_vm9 = vcmask 732752   ;;  %vm712_vm10 = vcmask 1044464  }
  0x13   : > { %664 = vrot.lane.b32.xlu0 %v662_v3, %s8061_s21  ;;  %v634_v10 = vld [vmem:[%s8180_s18] sm:$0xf]  ;;  %v716_v14 = vld [vmem:[%s8180_s18 + $0x4] sm:$0xf]  ;;  %s8074_s21 = smov 68   ;;  %vm713_vm11 = vcmask 113668  }
  0x14   : > { %678 = vrot.lane.b32.xlu1 %v676_v4, %s8062_s22  ;;  %v641_v12 = vld [vmem:[%s8180_s18] sm:$0xf]  ;;  %v723_v15 = vld [vmem:[%s8180_s18 + $0x4] sm:$0xf]  ;;  %vm709_vm12 = vcmask 506880   ;;  %vm702_vm13 = vcmask 1011552   ;;  %vm714_vm15 = vmor %vm713_vm11, %vm712_vm10 }
  0x15   : > { %v648_v13 = vld [vmem:[%s8180_s18] sm:$0xf]  ;;  %v730_v16 = vld [vmem:[%s8180_s18 + $0x4] sm:$0xf]  ;;  %vm646_vm14 = vcmask 880352   ;;  %vm653_vm0 = vcmask 1027952  }
  0x16   : > { %s8075_s18 = smov 126   ;;  %s8076_s22 = smov 127   ;;  %v8083_v45 = vmov 0   ;;  %v524_v46 = vld [vmem:[%s9171_s5] sm:$0xf]  ;;  %vm1398_vm10 = vcmask 891904  }
  0x17   : > { %622 = vrot.lane.b32.xlu0 %v620_v5, %s8063_s23  ;;  %s8077_s23 = smov 110   ;;  %8008 = vset.pattern.permute.xlu1 %v8083_v45  ;;  %v530_v47 = vld [vmem:[%s9172_s6] sm:$0xf]  ;;  %v7408_v56 = vld [vmem:[%s9169_s3 + $0x4] sm:$0xf]  ;;  %vm1565_vm11 = vcmask 883712  }
  0x18   : > { %685 = vrot.lane.b32.xlu1 %v683_v6, %s8064_s24  ;;  %s8078_s24 = smov 109   ;;  %8007 = vset.pattern.permute.xlu0 %v8083_v45  ;;  %v560_v61 = vld [vmem:[%s9169_s3] sm:$0xf]  ;;  %v7409_v2 = vld [vmem:[%s9169_s3 + $0x8] sm:$0xf] }
  0x1b   : > { %706 = vrot.lane.b32.xlu0 %v704_v7, %s8065_s25  ;;  %s8079_s25 = smov 108  }
  0x1c   : > { %629 = vrot.lane.b32.xlu1 %v627_v8, %s8066_s26  ;;  %s8080_s26 = smov 92   ;;  %v7410_v8 = vld [vmem:[%s9169_s3 + $0xc] sm:$0xf] }
  0x1f   : > { %692 = vrot.lane.b32.xlu0 %v690_v9, %s8067_s27  ;;  %s9181_s27 = smov 91  }
  0x20   : > { %636 = vrot.lane.b32.xlu1 %v634_v10, %s8068_s28  ;;  %s8082_s28 = smov 90  }
  0x23   : > { %699 = vrot.lane.b32.xlu0 %v697_v11, %s8069_s15 }
  0x24   : > { %643 = vrot.lane.b32.xlu1 %v641_v12, %s8070_s16  ;;  %v7411_v12 = vld [vmem:[%s9169_s3 + $0x10] sm:$0xf] }
  0x27   : > { %650 = vrot.lane.b32.xlu0 %v648_v13, %s8071_s17  ;;  %s8085_s17 = smov 19  }
  0x28   : > { %718 = vrot.lane.b32.xlu1 %v716_v14, %s8072_s19 }
  0x2b   : > { %725 = vrot.lane.b32.xlu0 %v723_v15, %s8073_s20 }
  0x2c   : > { %732 = vrot.lane.b32.xlu1 %v730_v16, %s8074_s21 }
  0x81   : > { %v658_v17 = vpop.permute.xlu0 %657 }
  0x82   : > { %v672_v18 = vpop.permute.xlu1 %671  ;;  %661 = vst.msk [vmem:[#allocation2 + $0x4] sm:$0xf] %vm660_vm1, %v658_v17  ;;  %vm721_vm1 = vcmask 257152  }
  0x85   : > { %v665_v19 = vpop.permute.xlu0 %664 }
  0x86   : > { %v679_v20 = vpop.permute.xlu1 %678  ;;  %668 = vst.msk [vmem:[#allocation2 + $0x4] sm:$0xf] %vm667_vm2, %v665_v19  ;;  %vm728_vm2 = vcmask 404752  }
  0x87   : > { %675 = vst.msk [vmem:[#allocation2 + $0x4] sm:$0xf] %vm674_vm3, %v672_v18  ;;  %vm735_vm3 = vcmask 552352   ;;  %v7412_v18 = vld [vmem:[%s9169_s3 + $0x14] sm:$0xf] }
  0x88   : > { %682 = vst.msk [vmem:[#allocation2 + $0x4] sm:$0xf] %vm681_vm4, %v679_v20  ;;  %vm748_vm4 = vcmask 1039360  }
  0x89   : > { %v623_v21 = vpop.permute.xlu0 %622 }
  0x8a   : > { %v686_v22 = vpop.permute.xlu1 %685  ;;  %626 = vst.msk [vmem:[#allocation2] sm:$0xf] %vm625_vm5, %v623_v21  ;;  %vm755_vm5 = vcmask 1043456  }
  0x8b   : > { %689 = vst.msk [vmem:[#allocation2 + $0x4] sm:$0xf] %vm688_vm6, %v686_v22  ;;  %vm751_vm6 = vcmask 31744   ;;  %v7413_v22 = vld [vmem:[%s9169_s3 + $0x18] sm:$0xf] }
  0x8d   : > { %v707_v23 = vpop.permute.xlu0 %706 }
  0x8e   : > { %v630_v24 = vpop.permute.xlu1 %629  ;;  %v708_v27 = vrot.slane %v707_v23, 4 }
  0x8f   : > { %633 = vst.msk [vmem:[#allocation2] sm:$0xf] %vm632_vm7, %v630_v24  ;;  %vm8084_vm7 = vmmov 0  }
  0x90   : > { %v710_v30 = vsel %vm709_vm12, %v708_v27, %v707_v23  ;;  %vm1732_vm12 = vcmask 752640  }
  0x91   : > { %v693_v25 = vpop.permute.xlu0 %692 }
  0x92   : > { %v637_v26 = vpop.permute.xlu1 %636  ;;  %696 = vst.msk [vmem:[#allocation2 + $0x4] sm:$0xf] %vm695_vm8, %v693_v25  ;;  %vm1064_vm8 = vcmask 1031168  }
  0x93   : > { %640 = vst.msk [vmem:[#allocation2] sm:$0xf] %vm639_vm9, %v637_v26  ;;  %vm1231_vm9 = vcmask 900096  }
  0x95   : > { %v700_v28 = vpop.permute.xlu0 %699 }
  0x96   : > { %v644_v29 = vpop.permute.xlu1 %643  ;;  %703 = vst.msk [vmem:[#allocation2 + $0x4] sm:$0xf] %vm702_vm13, %v700_v28  ;;  %vm1899_vm13 = vcmask 744448   ;;  %v7414_v28 = vld [vmem:[%s9169_s3 + $0x1c] sm:$0xf] }
  0x97   : > { %647 = vst.msk [vmem:[#allocation2] sm:$0xf] %vm646_vm14, %v644_v29  ;;  %vm2066_vm14 = vcmask 736256  }
  0x98   : > { %715 = vst.msk [vmem:[#allocation2 + $0x4] sm:$0xff] %vm714_vm15, %v710_v30  ;;  %vm2392_vm15 = vcmask 1043608  }
  0x99   : > { %v651_v31 = vpop.permute.xlu0 %650 }
  0x9a   : > { %v719_v32 = vpop.permute.xlu1 %718  ;;  %654 = vst.msk [vmem:[#allocation2] sm:$0xf] %vm653_vm0, %v651_v31  ;;  %vm2393_vm0 = vcmask 1047556  }
  0x9b   : > { %722 = vst.msk [vmem:[#allocation2 + $0x8] sm:$0xf] %vm721_vm1, %v719_v32  ;;  %vm2387_vm1 = vcmask 154624  }
  0x9d   : > { %v726_v33 = vpop.permute.xlu0 %725 }
  0x9e   : > { %v733_v34 = vpop.permute.xlu1 %732  ;;  %729 = vst.msk [vmem:[#allocation2 + $0x8] sm:$0xf] %vm728_vm2, %v726_v33  ;;  %v7415_v33 = vld [vmem:[%s9169_s3 + $0x20] sm:$0xf]  ;;  %vm8424_vm2 = vmor %vm2393_vm0, %vm2392_vm15 }
  0x9f   : > { %736 = vst.msk [vmem:[#allocation2 + $0x8] sm:$0xf] %vm735_vm3, %v733_v34  ;;  %v611_v34 = vld [vmem:[%s9170_s4] sm:$0xf]  ;;  %vm2396_vm3 = vcmask 707584  }
  0xa1   : > { %v8201_v35 = vld [vmem:[#allocation2] sm:$0xff] }
  0xa2   : > { %1058 = vrot.lane.b32.xlu1 %v8201_v35, %s8075_s18  ;;  %742 = vrot.lane.b32.xlu0 %v8201_v35, %s8076_s22  ;;  %v8209_v36 = vcombine.high %v8201_v35, %v8201_v35 }
  0xa6   : > { %1060 = vrot.lane.b32.xlu1 %v8209_v36, %s8075_s18  ;;  %1225 = vrot.lane.b32.xlu0 %v8201_v35, %s8077_s23  ;;  %v8215_v37 = vld [vmem:[#allocation2 + $0x8] sm:$0xf] }
  0xa7   : > { %v1054_v38 = vld [vmem:[#allocation2 + $0x8] sm:$0xf] }
  0xa8   : > { %v1221_v39 = vld [vmem:[#allocation2 + $0x8] sm:$0xf] }
  0xa9   : > { %v1388_v40 = vld [vmem:[#allocation2 + $0x8] sm:$0xf] }
  0xaa   : > { %744 = vrot.lane.b32.xlu0 %v8209_v36, %s8076_s22  ;;  %746 = vrot.lane.b32.xlu1 %v8215_v37, %s8076_s22  ;;  %v1555_v41 = vld [vmem:[#allocation2 + $0x8] sm:$0xf] }
  0xab   : > { %v1722_v42 = vld [vmem:[#allocation2 + $0x8] sm:$0xf] }
  0xac   : > { %v1889_v43 = vld [vmem:[#allocation2 + $0x8] sm:$0xf] }
  0xad   : > { %v2056_v44 = vld [vmem:[#allocation2 + $0x8] sm:$0xf] }
  0xae   : > { %1227 = vrot.lane.b32.xlu0 %v8209_v36, %s8077_s23  ;;  %1394 = vrot.lane.b32.xlu1 %v8209_v36, %s8078_s24 }
  0xb2   : > { %1561 = vrot.lane.b32.xlu0 %v8209_v36, %s8079_s25  ;;  %1392 = vrot.lane.b32.xlu1 %v8201_v35, %s8078_s24 }
  0xb6   : > { %1062 = vrot.lane.b32.xlu0 %v1054_v38, %s8075_s18  ;;  %1229 = vrot.lane.b32.xlu1 %v1221_v39, %s8077_s23 }
  0xba   : > { %1559 = vrot.lane.b32.xlu0 %v8201_v35, %s8079_s25  ;;  %1728 = vrot.lane.b32.xlu1 %v8209_v36, %s8080_s26 }
  0xbe   : > { %1396 = vrot.lane.b32.xlu0 %v1388_v40, %s8078_s24  ;;  %1563 = vrot.lane.b32.xlu1 %v1555_v41, %s8079_s25 }
  0xc2   : > { %1895 = vrot.lane.b32.xlu0 %v8209_v36, %s9181_s27  ;;  %1726 = vrot.lane.b32.xlu1 %v8201_v35, %s8080_s26 }
  0xc6   : > { %1730 = vrot.lane.b32.xlu0 %v1722_v42, %s8080_s26  ;;  %1897 = vrot.lane.b32.xlu1 %v1889_v43, %s9181_s27 }
  0xca   : > { %1893 = vrot.lane.b32.xlu0 %v8201_v35, %s9181_s27  ;;  %2062 = vrot.lane.b32.xlu1 %v8209_v36, %s8082_s28 }
  0xce   : > { %2064 = vrot.lane.b32.xlu0 %v2056_v44, %s8082_s28  ;;  %2060 = vrot.lane.b32.xlu1 %v8201_v35, %s8082_s28 }
  0xd2   : > { %527 = vperm.xlu0 %8007, %v524_v46   ;;  %533 = vperm.xlu1 %8008, %v530_v47  }
 0x114   : > { %v1059_v48 = vpop.permute.xlu1 %1058  ;;  %v743_v49 = vpop.permute.xlu0 %742 }
 0x118   : > { %v1061_v50 = vpop.permute.xlu1 %1060  ;;  %v1226_v51 = vpop.permute.xlu0 %1225 }
 0x119   : > { %v1065_v3 = vsel %vm1064_vm8, %v1059_v48, %v1061_v50 }
 0x11c   : > { %v747_v52 = vpop.permute.xlu1 %746  ;;  %v745_v53 = vpop.permute.xlu0 %744 }
 0x11d   : > { %v750_v54 = vsel %vm748_vm4, %v745_v53, %v747_v52  ;;  %v749_v55 = vsel %vm748_vm4, %v743_v49, %v745_v53 }
 0x11e   : > { %7432 = vmatprep.subr.msk.mxu1 %vm755_vm5, %v750_v54 }
 0x11f   : > { %7433 = vmatpush1.msk.msra.mxu1 %vm755_vm5, %v749_v55 }
 0x120   : > { %v1395_v57 = vpop.permute.xlu1 %1394  ;;  %7434 = vmatmul.mubr.msk.f32.vlgmr.msra.gmra.mxu1 %vm751_vm6, %v7408_v56  ;;  %7755 = vmatprep.subr.mxu1 %v8058_v0  ;;  %v1228_v58 = vpop.permute.xlu0 %1227 }
 0x121   : > { %7756 = vmatpush3.msk.msra.mxu1 %vm755_vm5, %v747_v52  ;;  %7757 = vmatprep.mubr.msk.f32.mxu1 %vm8084_vm7, %v8058_v0  ;;  %v1232_v7 = vsel %vm1231_vm9, %v1226_v51, %v1228_v58 }
 0x122   : > { %7437 = vmatprep.subr.msk.mxu1 %vm755_vm5, %v8209_v36 }
 0x124   : > { %v1393_v59 = vpop.permute.xlu1 %1392  ;;  %7758 = vmatmul.mubr.msk.f32.vlgmr.msra.gmra.mxu1 %vm751_vm6, %v7408_v56  ;;  %v1562_v60 = vpop.permute.xlu0 %1561 }
 0x125   : > { %7438 = vmatpush1.msk.msra.mxu1 %vm755_vm5, %v8201_v35  ;;  %976 = vmatprep.mubr.f32.mxu1 %v8058_v0  ;;  %v8320_v13 = vsel %vm1398_vm10, %v1393_v59, %v1395_v57 }
 0x126   : > { %7760 = vmatprep.subr.mxu1 %v8058_v0 }
 0x128   : > { %v1230_v62 = vpop.permute.xlu1 %1229  ;;  %7439 = vmatmul.mubr.msk.f32.vlgmr.msra.gmra.mxu1 %vm751_vm6, %v560_v61  ;;  %v1063_v63 = vpop.permute.xlu0 %1062 }
 0x129   : > { %7761 = vmatpush3.msk.msra.mxu1 %vm755_vm5, %v8215_v37  ;;  %v1066_v1 = vsel %vm1064_vm8, %v1061_v50, %v1063_v63  ;;  %7762 = vmatprep.mubr.msk.f32.mxu1 %vm8084_vm7, %v8058_v0  ;;  %v1233_v4 = vsel %vm1231_vm9, %v1228_v58, %v1230_v62 }
 0x12a   : > { %7442 = vmatprep.subr.msk.mxu0 %vm755_vm5, %v1066_v1  ;;  %7765 = vmatprep.subr.mxu1 %v8058_v0 }
 0x12b   : > { %7443 = vmatpush1.msk.msra.mxu0 %vm755_vm5, %v1065_v3 }
 0x12c   : > { %v1729_v5 = vpop.permute.xlu1 %1728  ;;  %7763 = vmatmul.mubr.msk.f32.vlgmr.msra.gmra.mxu1 %vm751_vm6, %v560_v61  ;;  %7444 = vmatmul.mubr.msk.f32.vlgmr.msra.gmra.mxu0 %vm751_vm6, %v7409_v2  ;;  %v1560_v6 = vpop.permute.xlu0 %1559 }
 0x12d   : > { %7766 = vmatpush3.msk.msra.mxu1 %vm755_vm5, %v1063_v63  ;;  %7447 = vmatprep.subr.msk.mxu0 %vm755_vm5, %v1233_v4  ;;  %v1566_v17 = vsel %vm1565_vm11, %v1560_v6, %v1562_v60 }
 0x12e   : > { %7448 = vmatpush1.msk.msra.mxu0 %vm755_vm5, %v1232_v7  ;;  %7767 = vmatprep.mubr.msk.f32.mxu1 %vm8084_vm7, %v8058_v0 }
 0x12f   : > { %1307 = vmatprep.mubr.f32.mxu0 %v8058_v0  ;;  %7770 = vmatprep.subr.mxu1 %v8058_v0 }
 0x130   : > { %v1564_v9 = vpop.permute.xlu1 %1563  ;;  %7768 = vmatmul.mubr.msk.f32.vlgmr.msra.gmra.mxu1 %vm751_vm6, %v7409_v2  ;;  %7449 = vmatmul.mubr.msk.f32.vlgmr.msra.gmra.mxu0 %vm751_vm6, %v7410_v8  ;;  %v8307_v10 = vpop.permute.xlu0 %1396 }
 0x131   : > { %7771 = vmatpush3.msk.msra.mxu1 %vm755_vm5, %v1230_v62  ;;  %v8312_v11 = vsel %vm1398_vm10, %v1395_v57, %v8307_v10  ;;  %7772 = vmatprep.mubr.msk.f32.mxu1 %vm8084_vm7, %v8058_v0  ;;  %v1567_v14 = vsel %vm1565_vm11, %v1562_v60, %v1564_v9 }
 0x132   : > { %7452 = vmatprep.subr.msk.mxu0 %vm755_vm5, %v8312_v11  ;;  %1474 = vmatprep.mubr.f32.mxu0 %v8058_v0 }
 0x133   : > { %7453 = vmatpush1.msk.msra.mxu0 %vm755_vm5, %v8320_v13  ;;  %7775 = vmatprep.subr.mxu1 %v8058_v0 }
 0x134   : > { %v1727_v15 = vpop.permute.xlu1 %1726  ;;  %7773 = vmatmul.mubr.msk.f32.vlgmr.msra.gmra.mxu1 %vm751_vm6, %v7410_v8  ;;  %7454 = vmatmul.mubr.msk.f32.vlgmr.msra.gmra.mxu0 %vm751_vm6, %v7411_v12  ;;  %v1896_v16 = vpop.permute.xlu0 %1895 }
 0x135   : > { %7776 = vmatpush3.msk.msra.mxu1 %vm755_vm5, %v8307_v10  ;;  %7457 = vmatprep.subr.msk.mxu0 %vm755_vm5, %v1567_v14  ;;  %v1733_v23 = vsel %vm1732_vm12, %v1727_v15, %v1729_v5 }
 0x136   : > { %7458 = vmatpush1.msk.msra.mxu0 %vm755_vm5, %v1566_v17  ;;  %7777 = vmatprep.mubr.msk.f32.mxu1 %vm8084_vm7, %v8058_v0 }
 0x137   : > { %1641 = vmatprep.mubr.f32.mxu0 %v8058_v0  ;;  %7780 = vmatprep.subr.mxu1 %v8058_v0 }
 0x138   : > { %v1898_v19 = vpop.permute.xlu1 %1897  ;;  %7778 = vmatmul.mubr.msk.f32.vlgmr.msra.gmra.mxu1 %vm751_vm6, %v7411_v12  ;;  %7459 = vmatmul.mubr.msk.f32.vlgmr.msra.gmra.mxu0 %vm751_vm6, %v7412_v18  ;;  %v1731_v20 = vpop.permute.xlu0 %1730 }
 0x139   : > { %7781 = vmatpush3.msk.msra.mxu1 %vm755_vm5, %v1564_v9  ;;  %v1734_v21 = vsel %vm1732_vm12, %v1729_v5, %v1731_v20  ;;  %7782 = vmatprep.mubr.msk.f32.mxu1 %vm8084_vm7, %v8058_v0  ;;  %v1901_v24 = vsel %vm1899_vm13, %v1896_v16, %v1898_v19  ;;  %v468_v9 = vlaneseq }
 0x13a   : > { %7462 = vmatprep.subr.msk.mxu0 %vm755_vm5, %v1734_v21  ;;  %1808 = vmatprep.mubr.f32.mxu0 %v8058_v0 }
 0x13b   : > { %7463 = vmatpush1.msk.msra.mxu0 %vm755_vm5, %v1733_v23  ;;  %7785 = vmatprep.subr.mxu1 %v8058_v0 }
 0x13c   : > { %v2063_v25 = vpop.permute.xlu1 %2062  ;;  %7783 = vmatmul.mubr.msk.f32.vlgmr.msra.gmra.mxu1 %vm751_vm6, %v7412_v18  ;;  %7464 = vmatmul.mubr.msk.f32.vlgmr.msra.gmra.mxu0 %vm751_vm6, %v7413_v22  ;;  %v1894_v26 = vpop.permute.xlu0 %1893 }
 0x13d   : > { %7786 = vmatpush3.msk.msra.mxu1 %vm755_vm5, %v1731_v20  ;;  %7467 = vmatprep.subr.msk.mxu0 %vm755_vm5, %v1901_v24  ;;  %v1900_v27 = vsel %vm1899_vm13, %v1894_v26, %v1896_v16  ;;  %v469_v20 = vshrl.u32 %v468_v9, 7 }
 0x13e   : > { %7468 = vmatpush1.msk.msra.mxu0 %vm755_vm5, %v1900_v27  ;;  %7787 = vmatprep.mubr.msk.f32.mxu1 %vm8084_vm7, %v8058_v0 }
 0x13f   : > { %1975 = vmatprep.mubr.f32.mxu0 %v8058_v0  ;;  %7790 = vmatprep.subr.mxu1 %v8058_v0 }
 0x140   : > { %v2061_v29 = vpop.permute.xlu1 %2060  ;;  %7788 = vmatmul.mubr.msk.f32.vlgmr.msra.gmra.mxu1 %vm751_vm6, %v7413_v22  ;;  %7469 = vmatmul.mubr.msk.f32.vlgmr.msra.gmra.mxu0 %vm751_vm6, %v7414_v28  ;;  %v2065_v30 = vpop.permute.xlu0 %2064 }
 0x141   : > { %v2067_v31 = vsel %vm2066_vm14, %v2061_v29, %v2063_v25  ;;  %7791 = vmatpush3.msk.msra.mxu1 %vm755_vm5, %v1898_v19  ;;  %v2068_v32 = vsel %vm2066_vm14, %v2063_v25, %v2065_v30  ;;  %7792 = vmatprep.mubr.msk.f32.mxu1 %vm8084_vm7, %v8058_v0 }
 0x142   : > { %7472 = vmatprep.subr.msk.mxu0 %vm755_vm5, %v2068_v32  ;;  %2142 = vmatprep.mubr.f32.mxu0 %v8058_v0  ;;  %v470_v32 = vsub.s32 0, %v469_v20 }
 0x143   : > { %7473 = vmatpush1.msk.msra.mxu0 %vm755_vm5, %v2067_v31  ;;  %7795 = vmatprep.subr.mxu1 %v8058_v0 }
 0x144   : > { %7793 = vmatmul.mubr.msk.f32.vlgmr.msra.gmra.mxu1 %vm751_vm6, %v7414_v28  ;;  %7474 = vmatmul.mubr.msk.f32.vlgmr.msra.gmra.mxu0 %vm751_vm6, %v7415_v33 }
 0x145   : > { %7796 = vmatpush3.msk.msra.mxu1 %vm755_vm5, %v2065_v30  ;;  %7477 = vmatprep.subr.msk.mxu0 %vm755_vm5, %v8312_v11 }
 0x146   : > { %7478 = vmatpush1.msk.msra.mxu0 %vm755_vm5, %v8320_v13  ;;  %7797 = vmatprep.mubr.msk.f32.mxu1 %vm8084_vm7, %v8058_v0 }
 0x147   : > { %2289 = vmatprep.mubr.f32.mxu0 %v8058_v0  ;;  %7800 = vmatprep.subr.mxu1 %v8058_v0 }
 0x148   : > { %7798 = vmatmul.mubr.msk.f32.vlgmr.msra.gmra.mxu1 %vm751_vm6, %v7415_v33  ;;  %7479 = vmatmul.mubr.msk.f32.vlgmr.msra.gmra.mxu0 %vm751_vm6, %v611_v34 }
 0x149   : > { %7801 = vmatpush3.msk.msra.mxu1 %vm755_vm5, %v8307_v10  ;;  %7802 = vmatprep.mubr.msk.f32.mxu1 %vm8084_vm7, %v8058_v0 }
 0x14a   : > { %7805 = vmatprep.subr.mxu1 %v8058_v0  ;;  %2484 = vmatprep.mubr.f32.mxu0 %v8058_v0 }
 0x14c   : > { %7803 = vmatmul.mubr.msk.f32.vlgmr.msra.gmra.mxu1 %vm751_vm6, %v611_v34 }
 0x14d   : > { %7807 = vmatprep.mubr.msk.f32.mxu1 %vm8084_vm7, %v8058_v0  ;;  %v528_v29 = vpop.permute.xlu0 %527 }
 0x1e0   : > { %v828_v35 = vpop.f32.mrf.mxu1 }
 0x1e2   : > { %v830_v36 = vpop.f32.mrf.mxu1 }
 0x1e4   : > { %v899_v37 = vpop.f32.mrf.mxu1 }
 0x1e6   : > { %v7759_v38 = vpop.f32.mrf.mxu1 }
 0x1e7   : > { %v534_v38 = vpop.permute.xlu1 %533 }
 0x1e8   : > { %v978_v39 = vpop.f32.mrf.mxu1 }
 0x1e9   : > { %v979_v53 = vadd.f32 %v978_v39, %v828_v35 }
 0x1ea   : > { %v980_v40 = vpop.f32.mrf.mxu1 }
 0x1eb   : > { %v981_v56 = vadd.f32 %v980_v40, %v830_v36  ;;  %v466_v36 = vld [vmem:[%s9167_s1] sm:$0x7] }
 0x1ec   : > { %v1049_v41 = vpop.f32.mrf.mxu1  ;;  %v1142_v42 = vpop.f32.mrf.mxu0 }
 0x1ed   : > { %v1050_v57 = vadd.f32 %v1049_v41, %v899_v37  ;;  %v1217_v60 = vadd.f32 %v1142_v42, %v979_v53  ;;  %v474_v37 = vsub.s32 1, %v469_v20 }
 0x1ee   : > { %v7764_v43 = vpop.f32.mrf.mxu1  ;;  %v1144_v44 = vpop.f32.mrf.mxu0 }
 0x1ef   : > { %v1218_v63 = vadd.f32 %v1144_v44, %v981_v56  ;;  %v478_v44 = vsub.s32 2, %v469_v20 }
 0x1f0   : > { %v1213_v45 = vpop.f32.mrf.mxu1  ;;  %v1309_v46 = vpop.f32.mrf.mxu0 }
 0x1f1   : > { %v1219_v1 = vadd.f32 %v1213_v45, %v1050_v57  ;;  %v1384_v2 = vadd.f32 %v1309_v46, %v1217_v60  ;;  %v8413_v45 = vrot.slane %v466_v36, %v470_v32 }
 0x1f2   : > { %v7769_v47 = vpop.f32.mrf.mxu1  ;;  %v1311_v48 = vpop.f32.mrf.mxu0 }
 0x1f3   : > { %v1385_v5 = vadd.f32 %v1311_v48, %v1218_v63  ;;  %v8415_v48 = vrot.slane %v466_v36, %v474_v37 }
 0x1f4   : > { %v1380_v49 = vpop.f32.mrf.mxu1  ;;  %v1476_v50 = vpop.f32.mrf.mxu0 }
 0x1f5   : > { %v1551_v6 = vadd.f32 %v1476_v50, %v1384_v2  ;;  %v1386_v10 = vadd.f32 %v1380_v49, %v1219_v1 }
 0x1f6   : > { %v7774_v51 = vpop.f32.mrf.mxu1  ;;  %v1478_v52 = vpop.f32.mrf.mxu0 }
 0x1f7   : > { %v1552_v11 = vadd.f32 %v1478_v52, %v1385_v5 }
 0x1f8   : > { %v1547_v54 = vpop.f32.mrf.mxu1  ;;  %v1643_v55 = vpop.f32.mrf.mxu0 }
 0x1f9   : > { %v1718_v12 = vadd.f32 %v1643_v55, %v1551_v6  ;;  %v1553_v15 = vadd.f32 %v1547_v54, %v1386_v10  ;;  %v8417_v54 = vrot.slane %v466_v36, %v478_v44  ;;  %v8559_v44 = vld [vmem:[%s9173_s7 + $0x14] sm:$0xf] }
 0x1fa   : > { %v7779_v58 = vpop.f32.mrf.mxu1  ;;  %v1645_v59 = vpop.f32.mrf.mxu0 }
 0x1fb   : > { %v1719_v16 = vadd.f32 %v1645_v59, %v1552_v11 }
 0x1fc   : > { %v1714_v61 = vpop.f32.mrf.mxu1  ;;  %v1810_v62 = vpop.f32.mrf.mxu0 }
 0x1fd   : > { %v1885_v17 = vadd.f32 %v1810_v62, %v1718_v12  ;;  %v1720_v21 = vadd.f32 %v1714_v61, %v1553_v15 }
 0x1fe   : > { %v7784_v3 = vpop.f32.mrf.mxu1  ;;  %v1812_v4 = vpop.f32.mrf.mxu0 }
 0x1ff   : > { %v1886_v22 = vadd.f32 %v1812_v4, %v1719_v16 }
 0x200   : > { %v1881_v7 = vpop.f32.mrf.mxu1  ;;  %v1977_v8 = vpop.f32.mrf.mxu0 }
 0x201   : > { %v2052_v23 = vadd.f32 %v1977_v8, %v1885_v17  ;;  %v1887_v26 = vadd.f32 %v1881_v7, %v1720_v21  ;;  %v8466_v21 = vld [vmem:[%s9173_s7 + $0x4] sm:$0xf] }
 0x202   : > { %v7789_v13 = vpop.f32.mrf.mxu1  ;;  %v1979_v14 = vpop.f32.mrf.mxu0 }
 0x203   : > { %v2053_v27 = vadd.f32 %v1979_v14, %v1886_v22  ;;  %v542_v13 = vld [vmem:[%s9176_s10] sm:$0xf] }
 0x204   : > { %v2048_v18 = vpop.f32.mrf.mxu1  ;;  %v2144_v19 = vpop.f32.mrf.mxu0  ;;  %v536_v14 = vld [vmem:[%s9175_s9] sm:$0xf] }
 0x205   : > { %v2219_v28 = vadd.f32 %v2144_v19, %v2052_v23  ;;  %v2054_v33 = vadd.f32 %v2048_v18, %v1887_v26  ;;  %v8484_v26 = vld [vmem:[%s9173_s7] sm:$0xf] }
 0x206   : > { %v7794_v24 = vpop.f32.mrf.mxu1  ;;  %v2146_v25 = vpop.f32.mrf.mxu0 }
 0x207   : > { %v2220_v34 = vadd.f32 %v2146_v25, %v2053_v27 }
 0x208   : > { %v2215_v30 = vpop.f32.mrf.mxu1  ;;  %v2291_v31 = vpop.f32.mrf.mxu0 }
 0x209   : > { %v2366_v35 = vadd.f32 %v2291_v31, %v2219_v28  ;;  %v2221_v41 = vadd.f32 %v2215_v30, %v2054_v33 }
 0x20a   : > { %v7799_v39 = vpop.f32.mrf.mxu1  ;;  %v2293_v40 = vpop.f32.mrf.mxu0 }
 0x20b   : > { %v2367_v42 = vadd.f32 %v2293_v40, %v2220_v34  ;;  %v2369_v43 = vmul.f32 %v2366_v35, %v528_v29  ;;  %v8513_v34 = vld [vmem:[%s9173_s7 + $0xc] sm:$0xf]  ;;  %v8531_v39 = vld [vmem:[%s9173_s7 + $0x10] sm:$0xf] }
 0x20c   : > { %v2362_v46 = vpop.f32.mrf.mxu1 }
 0x20d   : > { %v2370_v47 = vmul.f32 %v2367_v42, %v528_v29  ;;  %v2372_v49 = vadd.f32 %v2369_v43, %v534_v38  ;;  %v2368_v50 = vadd.f32 %v2362_v46, %v2221_v41 }
 0x20e   : > { %v7804_v51 = vpop.f32.mrf.mxu1 }
 0x20f   : > { %v2373_v52 = vadd.f32 %v2370_v47, %v534_v38  ;;  %v2371_v53 = vmul.f32 %v2368_v50, %v528_v29  ;;  %v2375_v55 = vmul.f32 %v2372_v49, %v8413_v45  ;;  %v8500_v29 = vld [vmem:[%s9173_s7 + $0x8] sm:$0xf]  ;;  %v8579_v51 = vld [vmem:[%s9173_s7 + $0x18] sm:$0xf] }
 0x211   : > { %v2376_v56 = vmul.f32 %v2373_v52, %v8415_v48  ;;  %v2374_v57 = vadd.f32 %v2371_v53, %v534_v38 }
 0x213   : > { %v2377_v58 = vmul.f32 %v2374_v57, %v8417_v54  ;;  %v2381_v59 = vcombine.low %v2375_v55, %v2376_v56  ;;  %v8597_v57 = vld [vmem:[%s9173_s7 + $0x1c] sm:$0xf] }
 0x215   : > { %2384 = vrot.lane.b32.xlu0 %v2377_v58, %s8085_s17  ;;  %2382 = vrot.lane.b32.xlu1 %v2381_v59, %s8085_s17 }
 0x287   : > { %v2383_v60 = vpop.permute.xlu1 %2382  ;;  %v2385_v63 = vpop.permute.xlu0 %2384 }
 0x288   : > { %v2386_v62 = vrot.slane %v2383_v60, 4 }
 0x28a   : > { %v2388_v1 = vsel %vm2387_vm1, %v2386_v62, %v2383_v60  ;;  %v2389_v2 = vsel %vm2387_vm1, %v2386_v62, %v2385_v63  ;;  %v8615_v63 = vld [vmem:[%s9173_s7 + $0x20] sm:$0xf] }
 0x28b   : > { %2395 = vst.msk [vmem:[#allocation3] sm:$0xff] %vm8424_vm2, %v2388_v1 }
 0x28c   : > { %2397 = vst.msk [vmem:[#allocation3 + $0x8] sm:$0xf] %vm2396_vm3, %v2389_v2 }
 0x292   : > { %v2711_v3 = vld [vmem:[#allocation3] sm:$0xff] }
 0x293   : > { %2716 = vrot.lane.b32.xlu0 %v2711_v3, %s8075_s18  ;;  %2403 = vrot.lane.b32.xlu1 %v2711_v3, %s8076_s22  ;;  %v2715_v4 = vcombine.high %v2711_v3, %v2711_v3  ;;  %v2399_v5 = vld [vmem:[#allocation3 + $0x8] sm:$0xf] }
 0x294   : > { %v2878_v6 = vld [vmem:[#allocation3 + $0x8] sm:$0xf] }
 0x295   : > { %v2712_v7 = vld [vmem:[#allocation3 + $0x8] sm:$0xf] }
 0x296   : > { %v3210_v8 = vld [vmem:[#allocation3 + $0x8] sm:$0xf] }
 0x297   : > { %2718 = vrot.lane.b32.xlu0 %v2715_v4, %s8075_s18  ;;  %2882 = vrot.lane.b32.xlu1 %v2711_v3, %s8077_s23  ;;  %v3044_v9 = vld [vmem:[#allocation3 + $0x8] sm:$0xf] }
 0x298   : > { %v3542_v10 = vld [vmem:[#allocation3 + $0x8] sm:$0xf] }
 0x299   : > { %v3376_v11 = vld [vmem:[#allocation3 + $0x8] sm:$0xf] }
 0x29a   : > { %v3708_v12 = vld [vmem:[#allocation3 + $0x8] sm:$0xf] }
 0x29b   : > { %2407 = vrot.lane.b32.xlu0 %v2399_v5, %s8076_s22  ;;  %2405 = vrot.lane.b32.xlu1 %v2715_v4, %s8076_s22 }
 0x29f   : > { %3050 = vrot.lane.b32.xlu0 %v2715_v4, %s8078_s24  ;;  %2884 = vrot.lane.b32.xlu1 %v2715_v4, %s8077_s23 }
 0x2a3   : > { %3048 = vrot.lane.b32.xlu0 %v2711_v3, %s8078_s24  ;;  %3216 = vrot.lane.b32.xlu1 %v2715_v4, %s8079_s25 }
 0x2a7   : > { %2886 = vrot.lane.b32.xlu0 %v2878_v6, %s8077_s23  ;;  %2720 = vrot.lane.b32.xlu1 %v2712_v7, %s8075_s18 }
 0x2ab   : > { %3382 = vrot.lane.b32.xlu0 %v2715_v4, %s8080_s26  ;;  %3214 = vrot.lane.b32.xlu1 %v2711_v3, %s8079_s25 }
 0x2af   : > { %3218 = vrot.lane.b32.xlu0 %v3210_v8, %s8079_s25  ;;  %3052 = vrot.lane.b32.xlu1 %v3044_v9, %s8078_s24 }
 0x2b3   : > { %3380 = vrot.lane.b32.xlu0 %v2711_v3, %s8080_s26  ;;  %3548 = vrot.lane.b32.xlu1 %v2715_v4, %s9181_s27 }
 0x2b7   : > { %3550 = vrot.lane.b32.xlu0 %v3542_v10, %s9181_s27  ;;  %3384 = vrot.lane.b32.xlu1 %v3376_v11, %s8080_s26 }
 0x2bb   : > { %3714 = vrot.lane.b32.xlu0 %v2715_v4, %s8082_s28  ;;  %3546 = vrot.lane.b32.xlu1 %v2711_v3, %s9181_s27  ;;  %s9185_s27 = smov 91  }
 0x2bf   : > { %3712 = vrot.lane.b32.xlu0 %v2711_v3, %s8082_s28  ;;  %3716 = vrot.lane.b32.xlu1 %v3708_v12, %s8082_s28 }
 0x2c3   : > { %545 = vperm.xlu0 %8007, %v542_v13   ;;  %539 = vperm.xlu1 %8008, %v536_v14  }
 0x305   : > { %v2717_v15 = vpop.permute.xlu0 %2716  ;;  %v2404_v16 = vpop.permute.xlu1 %2403 }
 0x309   : > { %v2719_v17 = vpop.permute.xlu0 %2718  ;;  %v2883_v18 = vpop.permute.xlu1 %2882 }
 0x30a   : > { %v2722_v33 = vsel %vm1064_vm8, %v2717_v15, %v2719_v17 }
 0x30d   : > { %v2408_v19 = vpop.permute.xlu0 %2407  ;;  %v2406_v20 = vpop.permute.xlu1 %2405 }
 0x30e   : > { %v2409_v22 = vsel %vm748_vm4, %v2404_v16, %v2406_v20  ;;  %v2410_v23 = vsel %vm748_vm4, %v2406_v20, %v2408_v19  ;;  %7806 = vmatpush3.msk.msra.mxu1 %vm755_vm5, %v2408_v19 }
 0x30f   : > { %7482 = vmatprep.subr.msk.mxu0 %vm755_vm5, %v2410_v23  ;;  %7810 = vmatprep.subr.mxu1 %v8058_v0 }
 0x310   : > { %7483 = vmatpush1.msk.msra.mxu0 %vm755_vm5, %v2409_v22  ;;  %7808 = vmatmul.mubr.msk.f32.vlgmr.msra.gmra.mxu1 %vm751_vm6, %v8466_v21 }
 0x311   : > { %7811 = vmatpush3.msk.msra.mxu1 %vm755_vm5, %v2399_v5  ;;  %v3051_v24 = vpop.permute.xlu0 %3050  ;;  %7484 = vmatmul.mubr.msk.f32.vlgmr.msra.gmra.mxu0 %vm751_vm6, %v8466_v21  ;;  %v2885_v25 = vpop.permute.xlu1 %2884  ;;  %v8633_v5 = vld [vmem:[%s9174_s8] sm:$0xf] }
 0x312   : > { %7487 = vmatprep.subr.msk.mxu0 %vm755_vm5, %v2715_v4  ;;  %2634 = vmatprep.mubr.f32.mxu0 %v8058_v0  ;;  %v2888_v38 = vsel %vm1231_vm9, %v2883_v18, %v2885_v25 }
 0x313   : > { %7488 = vmatpush1.msk.msra.mxu0 %vm755_vm5, %v2711_v3  ;;  %7812 = vmatprep.mubr.msk.f32.mxu1 %vm8084_vm7, %v8058_v0 }
 0x314   : > { %7813 = vmatmul.mubr.msk.f32.vlgmr.msra.gmra.mxu1 %vm751_vm6, %v8484_v26  ;;  %7815 = vmatprep.subr.mxu1 %v8058_v0 }
 0x315   : > { %v3049_v27 = vpop.permute.xlu0 %3048  ;;  %7489 = vmatmul.mubr.msk.f32.vlgmr.msra.gmra.mxu0 %vm751_vm6, %v8484_v26  ;;  %v3217_v28 = vpop.permute.xlu1 %3216  ;;  %7817 = vmatprep.mubr.msk.f32.mxu1 %vm8084_vm7, %v8058_v0 }
 0x316   : > { %2797 = vmatprep.mubr.f32.mxu0 %v8058_v0  ;;  %v8547_v43 = vsel %vm1398_vm10, %v3049_v27, %v3051_v24 }
 0x319   : > { %v2887_v30 = vpop.permute.xlu0 %2886  ;;  %v2721_v31 = vpop.permute.xlu1 %2720 }
 0x31a   : > { %v2723_v32 = vsel %vm1064_vm8, %v2719_v17, %v2721_v31  ;;  %7816 = vmatpush3.msk.msra.mxu1 %vm755_vm5, %v2721_v31  ;;  %v2889_v35 = vsel %vm1231_vm9, %v2885_v25, %v2887_v30 }
 0x31b   : > { %7492 = vmatprep.subr.msk.mxu0 %vm755_vm5, %v2723_v32  ;;  %7818 = vmatmul.mubr.msk.f32.vlgmr.msra.gmra.mxu1 %vm751_vm6, %v8500_v29 }
 0x31c   : > { %7820 = vmatprep.subr.mxu1 %v8058_v0  ;;  %7493 = vmatpush1.msk.msra.mxu0 %vm755_vm5, %v2722_v33 }
 0x31d   : > { %7821 = vmatpush3.msk.msra.mxu1 %vm755_vm5, %v2887_v30  ;;  %v3383_v36 = vpop.permute.xlu0 %3382  ;;  %7494 = vmatmul.mubr.msk.f32.vlgmr.msra.gmra.mxu0 %vm751_vm6, %v8500_v29  ;;  %v3215_v37 = vpop.permute.xlu1 %3214 }
 0x31e   : > { %7497 = vmatprep.subr.msk.mxu0 %vm755_vm5, %v2889_v35  ;;  %7822 = vmatprep.mubr.msk.f32.mxu1 %vm8084_vm7, %v8058_v0  ;;  %v3220_v50 = vsel %vm1565_vm11, %v3215_v37, %v3217_v28 }
 0x31f   : > { %7498 = vmatpush1.msk.msra.mxu0 %vm755_vm5, %v2888_v38  ;;  %7823 = vmatmul.mubr.msk.f32.vlgmr.msra.gmra.mxu1 %vm751_vm6, %v8513_v34 }
 0x320   : > { %2963 = vmatprep.mubr.f32.mxu0 %v8058_v0  ;;  %7825 = vmatprep.subr.mxu1 %v8058_v0 }
 0x321   : > { %v3219_v40 = vpop.permute.xlu0 %3218  ;;  %7499 = vmatmul.mubr.msk.f32.vlgmr.msra.gmra.mxu0 %vm751_vm6, %v8513_v34  ;;  %v8535_v41 = vpop.permute.xlu1 %3052  ;;  %7827 = vmatprep.mubr.msk.f32.mxu1 %vm8084_vm7, %v8058_v0 }
 0x322   : > { %7826 = vmatpush3.msk.msra.mxu1 %vm755_vm5, %v8535_v41  ;;  %v8543_v42 = vsel %vm1398_vm10, %v3051_v24, %v8535_v41  ;;  %3129 = vmatprep.mubr.f32.mxu0 %v8058_v0  ;;  %v3221_v46 = vsel %vm1565_vm11, %v3217_v28, %v3219_v40 }
 0x323   : > { %7502 = vmatprep.subr.msk.mxu0 %vm755_vm5, %v8543_v42  ;;  %7828 = vmatmul.mubr.msk.f32.vlgmr.msra.gmra.mxu1 %vm751_vm6, %v8531_v39 }
 0x324   : > { %7830 = vmatprep.subr.mxu1 %v8058_v0  ;;  %7503 = vmatpush1.msk.msra.mxu0 %vm755_vm5, %v8547_v43  ;;  %v8567_v0 = vld [vmem:[#allocation4] sm:$0xff] }
 0x325   : > { %7831 = vmatpush3.msk.msra.mxu1 %vm755_vm5, %v3219_v40  ;;  %v3381_v47 = vpop.permute.xlu0 %3380  ;;  %7504 = vmatmul.mubr.msk.f32.vlgmr.msra.gmra.mxu0 %vm751_vm6, %v8531_v39  ;;  %v3549_v49 = vpop.permute.xlu1 %3548 }
 0x326   : > { %7507 = vmatprep.subr.msk.mxu0 %vm755_vm5, %v3221_v46  ;;  %7832 = vmatprep.mubr.msk.f32.mxu1 %vm8084_vm7, %v8567_v0  ;;  %v3386_v56 = vsel %vm1732_vm12, %v3381_v47, %v3383_v36 }
 0x327   : > { %7508 = vmatpush1.msk.msra.mxu0 %vm755_vm5, %v3220_v50  ;;  %7833 = vmatmul.mubr.msk.f32.vlgmr.msra.gmra.mxu1 %vm751_vm6, %v8559_v44 }
 0x328   : > { %3295 = vmatprep.mubr.f32.mxu0 %v8567_v0  ;;  %7835 = vmatprep.subr.mxu1 %v8567_v0 }
 0x329   : > { %v3551_v52 = vpop.permute.xlu0 %3550  ;;  %7509 = vmatmul.mubr.msk.f32.vlgmr.msra.gmra.mxu0 %vm751_vm6, %v8559_v44  ;;  %v3385_v53 = vpop.permute.xlu1 %3384  ;;  %7837 = vmatprep.mubr.msk.f32.mxu1 %vm8084_vm7, %v8567_v0 }
 0x32a   : > { %v3387_v55 = vsel %vm1732_vm12, %v3383_v36, %v3385_v53  ;;  %7836 = vmatpush3.msk.msra.mxu1 %vm755_vm5, %v3385_v53  ;;  %3461 = vmatprep.mubr.f32.mxu0 %v8567_v0  ;;  %v3553_v58 = vsel %vm1899_vm13, %v3549_v49, %v3551_v52 }
 0x32b   : > { %7512 = vmatprep.subr.msk.mxu0 %vm755_vm5, %v3387_v55  ;;  %7838 = vmatmul.mubr.msk.f32.vlgmr.msra.gmra.mxu1 %vm751_vm6, %v8579_v51 }
 0x32c   : > { %7840 = vmatprep.subr.mxu1 %v8567_v0  ;;  %7513 = vmatpush1.msk.msra.mxu0 %vm755_vm5, %v3386_v56 }
 0x32d   : > { %7841 = vmatpush3.msk.msra.mxu1 %vm755_vm5, %v3551_v52  ;;  %v3715_v59 = vpop.permute.xlu0 %3714  ;;  %7514 = vmatmul.mubr.msk.f32.vlgmr.msra.gmra.mxu0 %vm751_vm6, %v8579_v51  ;;  %v3547_v60 = vpop.permute.xlu1 %3546 }
 0x32e   : > { %7517 = vmatprep.subr.msk.mxu0 %vm755_vm5, %v3553_v58  ;;  %v3552_v62 = vsel %vm1899_vm13, %v3547_v60, %v3549_v49  ;;  %7842 = vmatprep.mubr.msk.f32.mxu1 %vm8084_vm7, %v8567_v0 }
 0x32f   : > { %7518 = vmatpush1.msk.msra.mxu0 %vm755_vm5, %v3552_v62  ;;  %7843 = vmatmul.mubr.msk.f32.vlgmr.msra.gmra.mxu1 %vm751_vm6, %v8597_v57 }
 0x330   : > { %3627 = vmatprep.mubr.f32.mxu0 %v8567_v0  ;;  %7845 = vmatprep.subr.mxu1 %v8567_v0 }
 0x331   : > { %v3713_v1 = vpop.permute.xlu0 %3712  ;;  %7519 = vmatmul.mubr.msk.f32.vlgmr.msra.gmra.mxu0 %vm751_vm6, %v8597_v57  ;;  %v3717_v2 = vpop.permute.xlu1 %3716  ;;  %7847 = vmatprep.mubr.msk.f32.mxu1 %vm8084_vm7, %v8567_v0 }
 0x332   : > { %v3718_v3 = vsel %vm2066_vm14, %v3713_v1, %v3715_v59  ;;  %v3719_v4 = vsel %vm2066_vm14, %v3715_v59, %v3717_v2  ;;  %7846 = vmatpush3.msk.msra.mxu1 %vm755_vm5, %v3717_v2  ;;  %3793 = vmatprep.mubr.f32.mxu0 %v8567_v0 }
 0x333   : > { %7522 = vmatprep.subr.msk.mxu0 %vm755_vm5, %v3719_v4  ;;  %7848 = vmatmul.mubr.msk.f32.vlgmr.msra.gmra.mxu1 %vm751_vm6, %v8615_v63 }
 0x334   : > { %7850 = vmatprep.subr.mxu1 %v8567_v0  ;;  %7523 = vmatpush1.msk.msra.mxu0 %vm755_vm5, %v3718_v3 }
 0x335   : > { %7851 = vmatpush3.msk.msra.mxu1 %vm755_vm5, %v8535_v41  ;;  %7524 = vmatmul.mubr.msk.f32.vlgmr.msra.gmra.mxu0 %vm751_vm6, %v8615_v63 }
 0x336   : > { %7527 = vmatprep.subr.msk.mxu0 %vm755_vm5, %v8543_v42  ;;  %7852 = vmatprep.mubr.msk.f32.mxu1 %vm8084_vm7, %v8567_v0 }
 0x337   : > { %7528 = vmatpush1.msk.msra.mxu0 %vm755_vm5, %v8547_v43  ;;  %7853 = vmatmul.mubr.msk.f32.vlgmr.msra.gmra.mxu1 %vm751_vm6, %v8633_v5 }
 0x338   : > { %3940 = vmatprep.mubr.f32.mxu0 %v8567_v0  ;;  %7855 = vmatprep.subr.mxu1 %v8567_v0 }
 0x339   : > { %7529 = vmatmul.mubr.msk.f32.vlgmr.msra.gmra.mxu0 %vm751_vm6, %v8633_v5  ;;  %7857 = vmatprep.mubr.msk.f32.mxu1 %vm8084_vm7, %v8567_v0 }
 0x33a   : > { %4145 = vmatprep.mubr.f32.mxu0 %v8567_v0 }
 0x3d0   : > { %v2557_v6 = vpop.f32.mrf.mxu1 }
 0x3d1   : > { %v2486_v7 = vpop.f32.mrf.mxu0 }
 0x3d2   : > { %v7809_v8 = vpop.f32.mrf.mxu1 }
 0x3d3   : > { %v2488_v9 = vpop.f32.mrf.mxu0 }
 0x3d4   : > { %v2707_v10 = vpop.f32.mrf.mxu1 }
 0x3d5   : > { %v2636_v12 = vpop.f32.mrf.mxu0  ;;  %v2708_v22 = vadd.f32 %v2707_v10, %v2557_v6 }
 0x3d6   : > { %v7814_v11 = vpop.f32.mrf.mxu1  ;;  %v2637_v35 = vadd.f32 %v2636_v12, %v2486_v7 }
 0x3d7   : > { %v2638_v13 = vpop.f32.mrf.mxu0 }
 0x3d8   : > { %v2639_v40 = vadd.f32 %v2638_v13, %v2488_v9 }
 0x3db   : > { %v2870_v14 = vpop.f32.mrf.mxu1 }
 0x3dc   : > { %v2876_v28 = vadd.f32 %v2870_v14, %v2708_v22 }
 0x3dd   : > { %v2799_v15 = vpop.f32.mrf.mxu0  ;;  %v7819_v16 = vpop.f32.mrf.mxu1 }
 0x3de   : > { %v2874_v41 = vadd.f32 %v2799_v15, %v2637_v35  ;;  %v8654_v15 = vpop.permute.xlu1 %539 }
 0x3df   : > { %v2801_v17 = vpop.f32.mrf.mxu0  ;;  %v3036_v18 = vpop.f32.mrf.mxu1 }
 0x3e0   : > { %v3042_v36 = vadd.f32 %v3036_v18, %v2876_v28  ;;  %v2875_v46 = vadd.f32 %v2801_v17, %v2639_v40 }
 0x3e1   : > { %v2965_v19 = vpop.f32.mrf.mxu0  ;;  %v7824_v20 = vpop.f32.mrf.mxu1 }
 0x3e2   : > { %v3040_v47 = vadd.f32 %v2965_v19, %v2874_v41 }
 0x3e3   : > { %v2967_v23 = vpop.f32.mrf.mxu0  ;;  %v3202_v24 = vpop.f32.mrf.mxu1 }
 0x3e4   : > { %v3208_v49 = vadd.f32 %v3202_v24, %v3042_v36  ;;  %v3041_v53 = vadd.f32 %v2967_v23, %v2875_v46 }
 0x3e5   : > { %v3131_v25 = vpop.f32.mrf.mxu0  ;;  %v7829_v27 = vpop.f32.mrf.mxu1 }
 0x3e6   : > { %v3206_v55 = vadd.f32 %v3131_v25, %v3040_v47  ;;  %v8657_v25 = vpop.permute.xlu0 %545 }
 0x3e7   : > { %v3133_v30 = vpop.f32.mrf.mxu0  ;;  %v3368_v31 = vpop.f32.mrf.mxu1 }
 0x3e8   : > { %v3374_v56 = vadd.f32 %v3368_v31, %v3208_v49  ;;  %v3207_v60 = vadd.f32 %v3133_v30, %v3041_v53 }
 0x3e9   : > { %v3297_v32 = vpop.f32.mrf.mxu0  ;;  %v7834_v33 = vpop.f32.mrf.mxu1 }
 0x3ea   : > { %v3372_v62 = vadd.f32 %v3297_v32, %v3206_v55 }
 0x3eb   : > { %v3299_v37 = vpop.f32.mrf.mxu0  ;;  %v3534_v38 = vpop.f32.mrf.mxu1 }
 0x3ec   : > { %v3540_v1 = vadd.f32 %v3534_v38, %v3374_v56  ;;  %v3373_v4 = vadd.f32 %v3299_v37, %v3207_v60 }
 0x3ed   : > { %v3463_v42 = vpop.f32.mrf.mxu0  ;;  %v7839_v43 = vpop.f32.mrf.mxu1 }
 0x3ee   : > { %v3538_v6 = vadd.f32 %v3463_v42, %v3372_v62 }
 0x3ef   : > { %v3465_v50 = vpop.f32.mrf.mxu0  ;;  %v3700_v52 = vpop.f32.mrf.mxu1 }
 0x3f0   : > { %v3706_v7 = vadd.f32 %v3700_v52, %v3540_v1  ;;  %v3539_v10 = vadd.f32 %v3465_v50, %v3373_v4 }
 0x3f1   : > { %v3629_v58 = vpop.f32.mrf.mxu0  ;;  %v7844_v59 = vpop.f32.mrf.mxu1 }
 0x3f2   : > { %v3704_v11 = vadd.f32 %v3629_v58, %v3538_v6 }
 0x3f3   : > { %v3631_v2 = vpop.f32.mrf.mxu0  ;;  %v3866_v3 = vpop.f32.mrf.mxu1 }
 0x3f4   : > { %v3872_v12 = vadd.f32 %v3866_v3, %v3706_v7  ;;  %v3705_v16 = vadd.f32 %v3631_v2, %v3539_v10 }
 0x3f5   : > { %v3795_v8 = vpop.f32.mrf.mxu0  ;;  %v7849_v9 = vpop.f32.mrf.mxu1 }
 0x3f6   : > { %v3870_v17 = vadd.f32 %v3795_v8, %v3704_v11 }
 0x3f7   : > { %v3797_v13 = vpop.f32.mrf.mxu0  ;;  %v4013_v14 = vpop.f32.mrf.mxu1 }
 0x3f8   : > { %v4019_v18 = vadd.f32 %v4013_v14, %v3872_v12  ;;  %v3871_v22 = vadd.f32 %v3797_v13, %v3705_v16 }
 0x3f9   : > { %v3942_v19 = vpop.f32.mrf.mxu0  ;;  %v7854_v20 = vpop.f32.mrf.mxu1 }
 0x3fa   : > { %v4022_v23 = vmul.f32 %v4019_v18, %v8654_v15  ;;  %v4017_v24 = vadd.f32 %v3942_v19, %v3870_v17 }
 0x3fb   : > { %v3944_v27 = vpop.f32.mrf.mxu0 }
 0x3fc   : > { %v4025_v28 = vadd.f32 %v4022_v23, %v8657_v25  ;;  %v4020_v30 = vmul.f32 %v4017_v24, %v8654_v15  ;;  %v4018_v31 = vadd.f32 %v3944_v27, %v3871_v22 }
 0x3fe   : > { %v4028_v32 = vsub.f32 0.0, %v4025_v28  ;;  %v4023_v33 = vadd.f32 %v4020_v30, %v8657_v25  ;;  %v4021_v35 = vmul.f32 %v4018_v31, %v8654_v15 }
 0x400   : > { %v4033_v36 = vmul.f32 1.442695, %v4028_v32  ;;  %v4026_v37 = vsub.f32 0.0, %v4023_v33  ;;  %v4024_v38 = vadd.f32 %v4021_v35, %v8657_v25 }
 0x402   : > { %8013 = vpow2.f32 %v4033_v36  ;;  %v4029_v40 = vmul.f32 1.442695, %v4026_v37  ;;  %v4027_v41 = vsub.f32 0.0, %v4024_v38 }
 0x404   : > { %8015 = vpow2.f32 %v4029_v40  ;;  %v4031_v42 = vmul.f32 1.442695, %v4027_v41 }
 0x406   : > { %8017 = vpow2.f32 %v4031_v42 }
 0x40f   : > { %v8014_v43 = vpop.eup %8013 }
 0x410   : > { %v4037_v46 = vadd.f32 1.0, %v8014_v43 }
 0x411   : > { %v8016_v47 = vpop.eup %8015 }
 0x412   : > { %8019 = vrcp.f32 %v4037_v46  ;;  %v4035_v49 = vadd.f32 1.0, %v8016_v47 }
 0x413   : > { %v8018_v50 = vpop.eup %8017 }
 0x414   : > { %8021 = vrcp.f32 %v4035_v49  ;;  %v4036_v52 = vadd.f32 1.0, %v8018_v50 }
 0x416   : > { %8023 = vrcp.f32 %v4036_v52 }
 0x41f   : > { %v8020_v53 = vpop.eup %8019 }
 0x420   : > { %v4043_v55 = vmul.f32 %v8020_v53, %v4025_v28 }
 0x421   : > { %v8022_v56 = vpop.eup %8021 }
 0x422   : > { %v4041_v58 = vmul.f32 %v8022_v56, %v4023_v33  ;;  %v4046_v59 = vmul.f32 %v4043_v55, %v8417_v54 }
 0x423   : > { %v8024_v60 = vpop.eup %8023 }
 0x424   : > { %v4042_v62 = vmul.f32 %v8024_v60, %v4024_v38  ;;  %4053 = vrot.lane.b32.xlu0 %v4046_v59, %s8085_s17  ;;  %v4044_v1 = vmul.f32 %v4041_v58, %v8413_v45 }
 0x426   : > { %v4045_v2 = vmul.f32 %v4042_v62, %v8415_v48 }
 0x428   : > { %v4050_v3 = vcombine.low %v4044_v1, %v4045_v2 }
 0x42a   : > { %4051 = vrot.lane.b32.xlu1 %v4050_v3, %s8085_s17 }
 0x496   : > { %v4054_v7 = vpop.permute.xlu0 %4053 }
 0x49c   : > { %v4052_v4 = vpop.permute.xlu1 %4051 }
 0x49d   : > { %v4055_v6 = vrot.slane %v4052_v4, 4 }
 0x49f   : > { %v4056_v8 = vsel %vm2387_vm1, %v4055_v6, %v4052_v4  ;;  %v4057_v9 = vsel %vm2387_vm1, %v4055_v6, %v4054_v7 }
 0x4a0   : > { %4060 = vst.msk [vmem:[#allocation4] sm:$0xff] %vm8424_vm2, %v4056_v8 }
 0x4a1   : > { %4061 = vst.msk [vmem:[#allocation4 + $0x8] sm:$0xf] %vm2396_vm3, %v4057_v9 }
 0x4a7   : > { %v8674_v11 = vld [vmem:[#allocation4] sm:$0xff] }
 0x4a8   : > { %v4063_v10 = vld [vmem:[#allocation4 + $0x8] sm:$0xf]  ;;  %4067 = vrot.lane.b32.xlu1 %v8674_v11, %s8076_s22  ;;  %v4373_v14 = vcombine.high %v8674_v11, %v8674_v11 }
 0x4a9   : > { %4071 = vrot.lane.b32.xlu0 %v4063_v10, %s8076_s22  ;;  %v4370_v12 = vld [vmem:[#allocation4 + $0x8] sm:$0xf] }
 0x4aa   : > { %v4533_v13 = vld [vmem:[#allocation4 + $0x8] sm:$0xf] }
 0x4ab   : > { %v4696_v16 = vld [vmem:[#allocation4 + $0x8] sm:$0xf] }
 0x4ac   : > { %4378 = vrot.lane.b32.xlu1 %v4370_v12, %s8075_s18  ;;  %v4859_v17 = vld [vmem:[#allocation4 + $0x8] sm:$0xf] }
 0x4ad   : > { %4374 = vrot.lane.b32.xlu0 %v8674_v11, %s8075_s18  ;;  %v5022_v18 = vld [vmem:[#allocation4 + $0x8] sm:$0xf] }
 0x4ae   : > { %v5185_v19 = vld [vmem:[#allocation4 + $0x8] sm:$0xf] }
 0x4af   : > { %v5348_v20 = vld [vmem:[#allocation4 + $0x8] sm:$0xf] }
 0x4b0   : > { %4537 = vrot.lane.b32.xlu1 %v8674_v11, %s8077_s23 }
 0x4b1   : > { %4541 = vrot.lane.b32.xlu0 %v4533_v13, %s8077_s23 }
 0x4b4   : > { %4069 = vrot.lane.b32.xlu1 %v4373_v14, %s8076_s22 }
 0x4b5   : > { %4700 = vrot.lane.b32.xlu0 %v8674_v11, %s8078_s24 }
 0x4b8   : > { %4704 = vrot.lane.b32.xlu1 %v4696_v16, %s8078_s24 }
 0x4b9   : > { %4376 = vrot.lane.b32.xlu0 %v4373_v14, %s8075_s18 }
 0x4bc   : > { %4863 = vrot.lane.b32.xlu1 %v8674_v11, %s8079_s25 }
 0x4bd   : > { %4867 = vrot.lane.b32.xlu0 %v4859_v17, %s8079_s25 }
 0x4c0   : > { %4539 = vrot.lane.b32.xlu1 %v4373_v14, %s8077_s23 }
 0x4c1   : > { %4702 = vrot.lane.b32.xlu0 %v4373_v14, %s8078_s24 }
 0x4c4   : > { %5030 = vrot.lane.b32.xlu1 %v5022_v18, %s8080_s26 }
 0x4c5   : > { %5026 = vrot.lane.b32.xlu0 %v8674_v11, %s8080_s26 }
 0x4c8   : > { %4865 = vrot.lane.b32.xlu1 %v4373_v14, %s8079_s25 }
 0x4c9   : > { %5028 = vrot.lane.b32.xlu0 %v4373_v14, %s8080_s26 }
 0x4cc   : > { %5189 = vrot.lane.b32.xlu1 %v8674_v11, %s9185_s27 }
 0x4cd   : > { %5193 = vrot.lane.b32.xlu0 %v5185_v19, %s9185_s27 }
 0x4d0   : > { %5191 = vrot.lane.b32.xlu1 %v4373_v14, %s9185_s27 }
 0x4d1   : > { %5354 = vrot.lane.b32.xlu0 %v4373_v14, %s8082_s28 }
 0x4d4   : > { %5356 = vrot.lane.b32.xlu1 %v5348_v20, %s8082_s28 }
 0x4d5   : > { %5352 = vrot.lane.b32.xlu0 %v8674_v11, %s8082_s28 }
 0x51a   : > { %v4068_v23 = vpop.permute.xlu1 %4067 }
 0x51b   : > { %v4072_v22 = vpop.permute.xlu0 %4071 }
 0x51c   : > { %7856 = vmatpush3.msk.msra.mxu1 %vm755_vm5, %v4072_v22 }
 0x51d   : > { %7858 = vmatmul.mubr.msk.f32.vlgmr.msra.gmra.mxu1 %vm751_vm6, %v8466_v21  ;;  %7860 = vmatprep.subr.mxu1 %v8567_v0 }
 0x51e   : > { %7861 = vmatpush3.msk.msra.mxu1 %vm755_vm5, %v4063_v10  ;;  %7862 = vmatprep.mubr.msk.f32.mxu1 %vm8084_vm7, %v8567_v0  ;;  %v4379_v27 = vpop.permute.xlu1 %4378 }
 0x51f   : > { %v4375_v24 = vpop.permute.xlu0 %4374  ;;  %7865 = vmatprep.subr.mxu1 %v8567_v0 }
 0x521   : > { %7863 = vmatmul.mubr.msk.f32.vlgmr.msra.gmra.mxu1 %vm751_vm6, %v8484_v26 }
 0x522   : > { %7866 = vmatpush3.msk.msra.mxu1 %vm755_vm5, %v4379_v27  ;;  %7867 = vmatprep.mubr.msk.f32.mxu1 %vm8084_vm7, %v8567_v0  ;;  %v4538_v30 = vpop.permute.xlu1 %4537 }
 0x523   : > { %v4542_v28 = vpop.permute.xlu0 %4541  ;;  %7870 = vmatprep.subr.mxu1 %v8567_v0 }
 0x525   : > { %7868 = vmatmul.mubr.msk.f32.vlgmr.msra.gmra.mxu1 %vm751_vm6, %v8500_v29 }
 0x526   : > { %7871 = vmatpush3.msk.msra.mxu1 %vm755_vm5, %v4542_v28  ;;  %7872 = vmatprep.mubr.msk.f32.mxu1 %vm8084_vm7, %v8567_v0  ;;  %v4070_v32 = vpop.permute.xlu1 %4069 }
 0x527   : > { %v4701_v31 = vpop.permute.xlu0 %4700  ;;  %7875 = vmatprep.subr.mxu1 %v8567_v0  ;;  %v4073_v33 = vsel %vm748_vm4, %v4068_v23, %v4070_v32  ;;  %v4074_v35 = vsel %vm748_vm4, %v4070_v32, %v4072_v22 }
 0x528   : > { %7532 = vmatprep.subr.msk.mxu0 %vm755_vm5, %v4074_v35 }
 0x529   : > { %7873 = vmatmul.mubr.msk.f32.vlgmr.msra.gmra.mxu1 %vm751_vm6, %v8513_v34  ;;  %7533 = vmatpush1.msk.msra.mxu0 %vm755_vm5, %v4073_v33 }
 0x52a   : > { %7877 = vmatprep.mubr.msk.f32.mxu1 %vm8084_vm7, %v8567_v0  ;;  %7534 = vmatmul.mubr.msk.f32.vlgmr.msra.gmra.mxu0 %vm751_vm6, %v8466_v21  ;;  %v8741_v37 = vpop.permute.xlu1 %4704 }
 0x52b   : > { %v4377_v36 = vpop.permute.xlu0 %4376  ;;  %7537 = vmatprep.subr.msk.mxu0 %vm755_vm5, %v4373_v14  ;;  %7876 = vmatpush3.msk.msra.mxu1 %vm755_vm5, %v8741_v37 }
 0x52c   : > { %v4381_v38 = vsel %vm1064_vm8, %v4377_v36, %v4379_v27  ;;  %7538 = vmatpush1.msk.msra.mxu0 %vm755_vm5, %v8674_v11  ;;  %4292 = vmatprep.mubr.f32.mxu0 %v8567_v0  ;;  %v4380_v21 = vsel %vm1064_vm8, %v4375_v24, %v4377_v36 }
 0x52d   : > { %7542 = vmatprep.subr.msk.mxu0 %vm755_vm5, %v4381_v38  ;;  %7880 = vmatprep.subr.mxu1 %v8567_v0 }
 0x52e   : > { %7878 = vmatmul.mubr.msk.f32.vlgmr.msra.gmra.mxu1 %vm751_vm6, %v8531_v39  ;;  %7539 = vmatmul.mubr.msk.f32.vlgmr.msra.gmra.mxu0 %vm751_vm6, %v8484_v26  ;;  %v4864_v41 = vpop.permute.xlu1 %4863 }
 0x52f   : > { %v4868_v40 = vpop.permute.xlu0 %4867  ;;  %7882 = vmatprep.mubr.msk.f32.mxu1 %vm8084_vm7, %v8567_v0  ;;  %7543 = vmatpush1.msk.msra.mxu0 %vm755_vm5, %v4380_v21 }
 0x530   : > { %7881 = vmatpush3.msk.msra.mxu1 %vm755_vm5, %v4868_v40  ;;  %4452 = vmatprep.mubr.f32.mxu0 %v8567_v0 }
 0x531   : > { %7885 = vmatprep.subr.mxu1 %v8567_v0 }
 0x532   : > { %7883 = vmatmul.mubr.msk.f32.vlgmr.msra.gmra.mxu1 %vm751_vm6, %v8559_v44  ;;  %7544 = vmatmul.mubr.msk.f32.vlgmr.msra.gmra.mxu0 %vm751_vm6, %v8500_v29  ;;  %v4540_v26 = vpop.permute.xlu1 %4539 }
 0x533   : > { %v4703_v42 = vpop.permute.xlu0 %4702  ;;  %7887 = vmatprep.mubr.msk.f32.mxu1 %vm8084_vm7, %v8567_v0  ;;  %v4543_v43 = vsel %vm1231_vm9, %v4538_v30, %v4540_v26  ;;  %v4544_v46 = vsel %vm1231_vm9, %v4540_v26, %v4542_v28  ;;  %4615 = vmatprep.mubr.f32.mxu0 %v8567_v0 }
 0x534   : > { %7547 = vmatprep.subr.msk.mxu0 %vm755_vm5, %v4544_v46  ;;  %v4707_v47 = vsel %vm1398_vm10, %v4703_v42, %v8741_v37  ;;  %v4706_v49 = vsel %vm1398_vm10, %v4701_v31, %v4703_v42 }
 0x535   : > { %7548 = vmatpush1.msk.msra.mxu0 %vm755_vm5, %v4543_v43 }
 0x536   : > { %7549 = vmatmul.mubr.msk.f32.vlgmr.msra.gmra.mxu0 %vm751_vm6, %v8513_v34  ;;  %7552 = vmatprep.subr.msk.mxu0 %vm755_vm5, %v4707_v47  ;;  %v5031_v50 = vpop.permute.xlu1 %5030 }
 0x537   : > { %v5027_v29 = vpop.permute.xlu0 %5026  ;;  %7553 = vmatpush1.msk.msra.mxu0 %vm755_vm5, %v4706_v49  ;;  %7886 = vmatpush3.msk.msra.mxu1 %vm755_vm5, %v5031_v50 }
 0x538   : > { %4778 = vmatprep.mubr.f32.mxu0 %v8567_v0  ;;  %7888 = vmatmul.mubr.msk.f32.vlgmr.msra.gmra.mxu1 %vm751_vm6, %v8579_v51 }
 0x539   : > { %7890 = vmatprep.subr.mxu1 %v8567_v0  ;;  %7892 = vmatprep.mubr.msk.f32.mxu1 %vm8084_vm7, %v8567_v0 }
 0x53a   : > { %7554 = vmatmul.mubr.msk.f32.vlgmr.msra.gmra.mxu0 %vm751_vm6, %v8531_v39  ;;  %v4866_v34 = vpop.permute.xlu1 %4865 }
 0x53b   : > { %v5029_v52 = vpop.permute.xlu0 %5028  ;;  %v4869_v53 = vsel %vm1565_vm11, %v4864_v41, %v4866_v34  ;;  %v4870_v55 = vsel %vm1565_vm11, %v4866_v34, %v4868_v40  ;;  %4941 = vmatprep.mubr.f32.mxu0 %v8567_v0 }
 0x53c   : > { %7557 = vmatprep.subr.msk.mxu0 %vm755_vm5, %v4870_v55  ;;  %v5033_v56 = vsel %vm1732_vm12, %v5029_v52, %v5031_v50  ;;  %v5032_v58 = vsel %vm1732_vm12, %v5027_v29, %v5029_v52 }
 0x53d   : > { %7558 = vmatpush1.msk.msra.mxu0 %vm755_vm5, %v4869_v53 }
 0x53e   : > { %7559 = vmatmul.mubr.msk.f32.vlgmr.msra.gmra.mxu0 %vm751_vm6, %v8559_v44  ;;  %7562 = vmatprep.subr.msk.mxu0 %vm755_vm5, %v5033_v56  ;;  %v5190_v39 = vpop.permute.xlu1 %5189 }
 0x53f   : > { %v5194_v59 = vpop.permute.xlu0 %5193  ;;  %7563 = vmatpush1.msk.msra.mxu0 %vm755_vm5, %v5032_v58  ;;  %5104 = vmatprep.mubr.f32.mxu0 %v8567_v0 }
 0x540   : > { %7891 = vmatpush3.msk.msra.mxu1 %vm755_vm5, %v5194_v59 }
 0x541   : > { %7893 = vmatmul.mubr.msk.f32.vlgmr.msra.gmra.mxu1 %vm751_vm6, %v8597_v57  ;;  %7895 = vmatprep.subr.mxu1 %v8567_v0 }
 0x542   : > { %7897 = vmatprep.mubr.msk.f32.mxu1 %vm8084_vm7, %v8567_v0  ;;  %7564 = vmatmul.mubr.msk.f32.vlgmr.msra.gmra.mxu0 %vm751_vm6, %v8579_v51  ;;  %v5192_v44 = vpop.permute.xlu1 %5191 }
 0x543   : > { %v5355_v60 = vpop.permute.xlu0 %5354  ;;  %v5195_v62 = vsel %vm1899_vm13, %v5190_v39, %v5192_v44  ;;  %v5196_v1 = vsel %vm1899_vm13, %v5192_v44, %v5194_v59  ;;  %5267 = vmatprep.mubr.f32.mxu0 %v8567_v0 }
 0x544   : > { %7567 = vmatprep.subr.msk.mxu0 %vm755_vm5, %v5196_v1 }
 0x545   : > { %7568 = vmatpush1.msk.msra.mxu0 %vm755_vm5, %v5195_v62 }
 0x546   : > { %7569 = vmatmul.mubr.msk.f32.vlgmr.msra.gmra.mxu0 %vm751_vm6, %v8597_v57  ;;  %v5357_v3 = vpop.permute.xlu1 %5356 }
 0x547   : > { %v5353_v2 = vpop.permute.xlu0 %5352  ;;  %v5359_v51 = vsel %vm2066_vm14, %v5355_v60, %v5357_v3  ;;  %7896 = vmatpush3.msk.msra.mxu1 %vm755_vm5, %v5357_v3  ;;  %5430 = vmatprep.mubr.f32.mxu0 %v8567_v0 }
 0x548   : > { %v5358_v4 = vsel %vm2066_vm14, %v5353_v2, %v5355_v60  ;;  %7572 = vmatprep.subr.msk.mxu0 %vm755_vm5, %v5359_v51  ;;  %7898 = vmatmul.mubr.msk.f32.vlgmr.msra.gmra.mxu1 %vm751_vm6, %v8615_v63 }
 0x549   : > { %7900 = vmatprep.subr.mxu1 %v8567_v0  ;;  %7573 = vmatpush1.msk.msra.mxu0 %vm755_vm5, %v5358_v4 }
 0x54a   : > { %7901 = vmatpush3.msk.msra.mxu1 %vm755_vm5, %v8741_v37  ;;  %7574 = vmatmul.mubr.msk.f32.vlgmr.msra.gmra.mxu0 %vm751_vm6, %v8615_v63 }
 0x54b   : > { %7577 = vmatprep.subr.msk.mxu0 %vm755_vm5, %v4707_v47  ;;  %7902 = vmatprep.mubr.msk.f32.mxu1 %vm8084_vm7, %v8567_v0 }
 0x54c   : > { %7578 = vmatpush1.msk.msra.mxu0 %vm755_vm5, %v4706_v49  ;;  %7903 = vmatmul.mubr.msk.f32.vlgmr.msra.gmra.mxu1 %vm751_vm6, %v8633_v5 }
 0x54d   : > { %5574 = vmatprep.mubr.f32.mxu0 %v8567_v0  ;;  %7905 = vmatprep.subr.mxu1 %v8567_v0 }
 0x54e   : > { %7579 = vmatmul.mubr.msk.f32.vlgmr.msra.gmra.mxu0 %vm751_vm6, %v8633_v5  ;;  %7907 = vmatprep.mubr.msk.f32.mxu1 %vm8084_vm7, %v8567_v0 }
 0x54f   : > { %5782 = vmatprep.mubr.f32.mxu0 %v8567_v0 }
 0x5dd   : > { %v4218_v57 = vpop.f32.mrf.mxu1 }
 0x5df   : > { %v7859_v63 = vpop.f32.mrf.mxu1 }
 0x5e1   : > { %v4365_v6 = vpop.f32.mrf.mxu1 }
 0x5e2   : > { %v4366_v20 = vadd.f32 %v4365_v6, %v4218_v57 }
 0x5e3   : > { %v7864_v7 = vpop.f32.mrf.mxu1 }
 0x5e5   : > { %v4525_v8 = vpop.f32.mrf.mxu1 }
 0x5e6   : > { %v4531_v27 = vadd.f32 %v4525_v8, %v4366_v20 }
 0x5e7   : > { %v7869_v9 = vpop.f32.mrf.mxu1 }
 0x5e9   : > { %v4688_v10 = vpop.f32.mrf.mxu1 }
 0x5ea   : > { %v4147_v11 = vpop.f32.mrf.mxu0  ;;  %v4694_v33 = vadd.f32 %v4688_v10, %v4531_v27 }
 0x5eb   : > { %v7874_v12 = vpop.f32.mrf.mxu1 }
 0x5ec   : > { %v4149_v13 = vpop.f32.mrf.mxu0 }
 0x5ee   : > { %v4851_v14 = vpop.f32.mrf.mxu1  ;;  %v4294_v16 = vpop.f32.mrf.mxu0 }
 0x5ef   : > { %v4295_v37 = vadd.f32 %v4294_v16, %v4147_v11  ;;  %v4857_v38 = vadd.f32 %v4851_v14, %v4694_v33 }
 0x5f0   : > { %v7879_v17 = vpop.f32.mrf.mxu1  ;;  %v4296_v18 = vpop.f32.mrf.mxu0 }
 0x5f1   : > { %v4297_v41 = vadd.f32 %v4296_v18, %v4149_v13 }
 0x5f2   : > { %v5014_v5 = vpop.f32.mrf.mxu1  ;;  %v4454_v19 = vpop.f32.mrf.mxu0 }
 0x5f3   : > { %v4529_v42 = vadd.f32 %v4454_v19, %v4295_v37  ;;  %v5020_v49 = vadd.f32 %v5014_v5, %v4857_v38 }
 0x5f4   : > { %v7884_v22 = vpop.f32.mrf.mxu1  ;;  %v4456_v23 = vpop.f32.mrf.mxu0 }
 0x5f5   : > { %v4530_v46 = vadd.f32 %v4456_v23, %v4297_v41 }
 0x5f6   : > { %v4617_v24 = vpop.f32.mrf.mxu0 }
 0x5f7   : > { %v4692_v47 = vadd.f32 %v4617_v24, %v4529_v42 }
 0x5f8   : > { %v4619_v28 = vpop.f32.mrf.mxu0  ;;  %v5177_v30 = vpop.f32.mrf.mxu1 }
 0x5f9   : > { %v4693_v50 = vadd.f32 %v4619_v28, %v4530_v46  ;;  %v5183_v53 = vadd.f32 %v5177_v30, %v5020_v49 }
 0x5fa   : > { %v4780_v31 = vpop.f32.mrf.mxu0  ;;  %v7889_v32 = vpop.f32.mrf.mxu1 }
 0x5fb   : > { %v4855_v52 = vadd.f32 %v4780_v31, %v4692_v47 }
 0x5fc   : > { %v4782_v35 = vpop.f32.mrf.mxu0 }
 0x5fd   : > { %v4856_v55 = vadd.f32 %v4782_v35, %v4693_v50 }
 0x5fe   : > { %v4943_v36 = vpop.f32.mrf.mxu0 }
 0x5ff   : > { %v5018_v56 = vadd.f32 %v4943_v36, %v4855_v52 }
 0x600   : > { %v4945_v21 = vpop.f32.mrf.mxu0 }
 0x601   : > { %v5340_v40 = vpop.f32.mrf.mxu1  ;;  %v5019_v39 = vadd.f32 %v4945_v21, %v4856_v55 }
 0x602   : > { %v5106_v26 = vpop.f32.mrf.mxu0  ;;  %v5346_v60 = vadd.f32 %v5340_v40, %v5183_v53 }
 0x603   : > { %v7894_v43 = vpop.f32.mrf.mxu1  ;;  %v5181_v44 = vadd.f32 %v5106_v26, %v5018_v56 }
 0x604   : > { %v5108_v29 = vpop.f32.mrf.mxu0 }
 0x605   : > { %v5182_v2 = vadd.f32 %v5108_v29, %v5019_v39 }
 0x606   : > { %v5269_v34 = vpop.f32.mrf.mxu0 }
 0x607   : > { %v5344_v3 = vadd.f32 %v5269_v34, %v5181_v44  ;;  %v554_v44 = vld [vmem:[%s9179_s13] sm:$0xf] }
 0x608   : > { %v5271_v58 = vpop.f32.mrf.mxu0  ;;  %v5503_v59 = vpop.f32.mrf.mxu1 }
 0x609   : > { %v5509_v4 = vadd.f32 %v5503_v59, %v5346_v60  ;;  %v5345_v63 = vadd.f32 %v5271_v58, %v5182_v2 }
 0x60a   : > { %v5432_v62 = vpop.f32.mrf.mxu0  ;;  %v7899_v1 = vpop.f32.mrf.mxu1 }
 0x60b   : > { %v5507_v6 = vadd.f32 %v5432_v62, %v5344_v3  ;;  %v548_v62 = vld [vmem:[%s9178_s12] sm:$0xf]  ;;  %v7424_v1 = vld [vmem:[%s9177_s11 + $0x4] sm:$0xf] }
 0x60c   : > { %v5434_v51 = vpop.f32.mrf.mxu0  ;;  %v5647_v57 = vpop.f32.mrf.mxu1 }
 0x60d   : > { %v5653_v7 = vadd.f32 %v5647_v57, %v5509_v4  ;;  %v5508_v10 = vadd.f32 %v5434_v51, %v5345_v63  ;;  %v594_v4 = vld [vmem:[%s9177_s11] sm:$0xf]  ;;  %v7425_v63 = vld [vmem:[%s9177_s11 + $0x8] sm:$0xf] }
 0x60e   : > { %v5576_v8 = vpop.f32.mrf.mxu0  ;;  %v7904_v9 = vpop.f32.mrf.mxu1 }
 0x60f   : > { %v5656_v11 = vmul.f32 %v5653_v7, %v8654_v15  ;;  %v5651_v12 = vadd.f32 %v5576_v8, %v5507_v6  ;;  %v7426_v8 = vld [vmem:[%s9177_s11 + $0xc] sm:$0xf] }
 0x610   : > { %v5578_v13 = vpop.f32.mrf.mxu0 }
 0x611   : > { %v5659_v14 = vadd.f32 %v5656_v11, %v8657_v25  ;;  %v5654_v16 = vmul.f32 %v5651_v12, %v8654_v15  ;;  %v5652_v17 = vadd.f32 %v5578_v13, %v5508_v10 }
 0x613   : > { %v5662_v18 = vsub.f32 0.0, %v5659_v14  ;;  %v5657_v5 = vadd.f32 %v5654_v16, %v8657_v25  ;;  %v5655_v19 = vmul.f32 %v5652_v17, %v8654_v15  ;;  %v7427_v16 = vld [vmem:[%s9177_s11 + $0x10] sm:$0xf] }
 0x615   : > { %v5667_v20 = vmul.f32 1.442695, %v5662_v18  ;;  %v5660_v22 = vsub.f32 0.0, %v5657_v5  ;;  %v5658_v23 = vadd.f32 %v5655_v19, %v8657_v25 }
 0x617   : > { %8025 = vpow2.f32 %v5667_v20  ;;  %v5663_v24 = vmul.f32 1.442695, %v5660_v22  ;;  %v5661_v27 = vsub.f32 0.0, %v5658_v23  ;;  %v7428_v20 = vld [vmem:[%s9177_s11 + $0x14] sm:$0xf] }
 0x619   : > { %8027 = vpow2.f32 %v5663_v24  ;;  %v5665_v28 = vmul.f32 1.442695, %v5661_v27 }
 0x61b   : > { %8029 = vpow2.f32 %v5665_v28 }
 0x624   : > { %v8026_v30 = vpop.eup %8025 }
 0x625   : > { %v5671_v31 = vadd.f32 1.0, %v8026_v30  ;;  %v7429_v30 = vld [vmem:[%s9177_s11 + $0x18] sm:$0xf] }
 0x626   : > { %v8028_v32 = vpop.eup %8027 }
 0x627   : > { %8031 = vrcp.f32 %v5671_v31  ;;  %v5669_v33 = vadd.f32 1.0, %v8028_v32 }
 0x628   : > { %v8030_v35 = vpop.eup %8029 }
 0x629   : > { %8033 = vrcp.f32 %v5669_v33  ;;  %v5670_v36 = vadd.f32 1.0, %v8030_v35 }
 0x62b   : > { %8035 = vrcp.f32 %v5670_v36 }
 0x634   : > { %v8032_v15 = vpop.eup %8031 }
 0x635   : > { %v5677_v37 = vmul.f32 %v8032_v15, %v5659_v14 }
 0x636   : > { %v8034_v38 = vpop.eup %8033 }
 0x637   : > { %v5675_v21 = vmul.f32 %v8034_v38, %v5657_v5  ;;  %v5680_v25 = vmul.f32 %v5677_v37, %v8417_v54 }
 0x638   : > { %v8036_v40 = vpop.eup %8035 }
 0x639   : > { %v5676_v41 = vmul.f32 %v8036_v40, %v5658_v23  ;;  %5687 = vrot.lane.b32.xlu0 %v5680_v25, %s8085_s17  ;;  %v5678_v42 = vmul.f32 %v5675_v21, %v8413_v45  ;;  %v7430_v21 = vld [vmem:[%s9177_s11 + $0x1c] sm:$0xf] }
 0x63b   : > { %v5679_v26 = vmul.f32 %v5676_v41, %v8415_v48 }
 0x63d   : > { %v5684_v43 = vcombine.low %v5678_v42, %v5679_v26 }
 0x63f   : > { %5685 = vrot.lane.b32.xlu1 %v5684_v43, %s8085_s17 }
 0x6ab   : > { %v5688_v49 = vpop.permute.xlu0 %5687 }
 0x6b1   : > { %v5686_v46 = vpop.permute.xlu1 %5685 }
 0x6b2   : > { %v5689_v47 = vrot.slane %v5686_v46, 4 }
 0x6b4   : > { %v5690_v29 = vsel %vm2387_vm1, %v5689_v47, %v5686_v46  ;;  %v5691_v50 = vsel %vm2387_vm1, %v5689_v47, %v5688_v49  ;;  %v7431_v47 = vld [vmem:[%s9177_s11 + $0x20] sm:$0xf] }
 0x6b5   : > { %5694 = vst.msk [vmem:[#allocation3] sm:$0xff] %vm8424_vm2, %v5690_v29 }
 0x6b6   : > { %5695 = vst.msk [vmem:[#allocation3 + $0x8] sm:$0xf] %vm2396_vm3, %v5691_v50 }
 0x6bc   : > { %v8858_v34 = vld [vmem:[#allocation3] sm:$0xff] }
 0x6bd   : > { %v5697_v52 = vld [vmem:[#allocation3 + $0x8] sm:$0xf]  ;;  %5701 = vrot.lane.b32.xlu1 %v8858_v34, %s8076_s22  ;;  %v5700_v61 = vcombine.high %v8858_v34, %v8858_v34 }
 0x6be   : > { %5705 = vrot.lane.b32.xlu0 %v5697_v52, %s8076_s22  ;;  %v6010_v53 = vld [vmem:[#allocation3 + $0x8] sm:$0xf] }
 0x6bf   : > { %v6176_v55 = vld [vmem:[#allocation3 + $0x8] sm:$0xf] }
 0x6c0   : > { %v6342_v56 = vld [vmem:[#allocation3 + $0x8] sm:$0xf] }
 0x6c1   : > { %6018 = vrot.lane.b32.xlu1 %v6010_v53, %s8075_s18  ;;  %v6508_v58 = vld [vmem:[#allocation3 + $0x8] sm:$0xf]  ;;  %v498_v53 = vld [vmem:[%s9168_s2 + $0x78] sm:$0xff] }
 0x6c2   : > { %6014 = vrot.lane.b32.xlu0 %v8858_v34, %s8075_s18  ;;  %v6674_v59 = vld [vmem:[#allocation3 + $0x8] sm:$0xf] }
 0x6c3   : > { %v6840_v39 = vld [vmem:[#allocation3 + $0x8] sm:$0xf] }
 0x6c4   : > { %v7006_v60 = vld [vmem:[#allocation3 + $0x8] sm:$0xf] }
 0x6c5   : > { %6180 = vrot.lane.b32.xlu1 %v8858_v34, %s8077_s23 }
 0x6c6   : > { %6184 = vrot.lane.b32.xlu0 %v6176_v55, %s8077_s23  ;;  %v513_v55 = vld [vmem:[%s9168_s2 + $0xf0] sm:$0xff] }
 0x6c9   : > { %5703 = vrot.lane.b32.xlu1 %v5700_v61, %s8076_s22 }
 0x6ca   : > { %6346 = vrot.lane.b32.xlu0 %v8858_v34, %s8078_s24 }
 0x6cd   : > { %6350 = vrot.lane.b32.xlu1 %v6342_v56, %s8078_s24  ;;  %v512_v56 = vld [vmem:[%s9168_s2 + $0xe8] sm:$0xff] }
 0x6ce   : > { %6016 = vrot.lane.b32.xlu0 %v5700_v61, %s8075_s18 }
 0x6d1   : > { %6512 = vrot.lane.b32.xlu1 %v8858_v34, %s8079_s25 }
 0x6d2   : > { %6516 = vrot.lane.b32.xlu0 %v6508_v58, %s8079_s25  ;;  %v496_v58 = vld [vmem:[%s9168_s2 + $0x68] sm:$0xff] }
 0x6d5   : > { %6182 = vrot.lane.b32.xlu1 %v5700_v61, %s8077_s23 }
 0x6d6   : > { %6348 = vrot.lane.b32.xlu0 %v5700_v61, %s8078_s24 }
 0x6d9   : > { %6682 = vrot.lane.b32.xlu1 %v6674_v59, %s8080_s26  ;;  %v511_v59 = vld [vmem:[%s9168_s2 + $0xe0] sm:$0xff] }
 0x6da   : > { %6678 = vrot.lane.b32.xlu0 %v8858_v34, %s8080_s26 }
 0x6dd   : > { %6514 = vrot.lane.b32.xlu1 %v5700_v61, %s8079_s25 }
 0x6de   : > { %6680 = vrot.lane.b32.xlu0 %v5700_v61, %s8080_s26 }
 0x6e1   : > { %6844 = vrot.lane.b32.xlu1 %v8858_v34, %s9185_s27 }
 0x6e2   : > { %6848 = vrot.lane.b32.xlu0 %v6840_v39, %s9185_s27  ;;  %v495_v39 = vld [vmem:[%s9168_s2 + $0x60] sm:$0xff] }
 0x6e5   : > { %6846 = vrot.lane.b32.xlu1 %v5700_v61, %s9185_s27 }
 0x6e6   : > { %7012 = vrot.lane.b32.xlu0 %v5700_v61, %s8082_s28 }
 0x6e9   : > { %7014 = vrot.lane.b32.xlu1 %v7006_v60, %s8082_s28  ;;  %v510_v60 = vld [vmem:[%s9168_s2 + $0xd8] sm:$0xff] }
 0x6ea   : > { %7010 = vrot.lane.b32.xlu0 %v8858_v34, %s8082_s28  ;;  %s7407_s28 = sshll.u32 %s9187_s30, 2 }
 0x6eb   : > { %s465_s20 = scalar_lea.vmem %s9180_s14, %s7407_s28 }
 0x6ed   : > { %551 = vperm.xlu1 %8008, %v548_v62   ;;  %v509_v62 = vld [vmem:[%s9168_s2 + $0xd0] sm:$0xff] }
 0x6ee   : > { %557 = vperm.xlu0 %8007, %v554_v44   ;;  %v494_v44 = vld [vmem:[%s9168_s2 + $0x58] sm:$0xff] }
 0x72f   : > { %v5702_v3 = vpop.permute.xlu1 %5701 }
 0x730   : > { %v5706_v2 = vpop.permute.xlu0 %5705 }
 0x731   : > { %7906 = vmatpush3.msk.msra.mxu1 %vm755_vm5, %v5706_v2 }
 0x732   : > { %7908 = vmatmul.mubr.msk.f32.vlgmr.msra.gmra.mxu1 %vm751_vm6, %v7424_v1  ;;  %7910 = vmatprep.subr.mxu1 %v8567_v0 }
 0x733   : > { %7911 = vmatpush3.msk.msra.mxu1 %vm755_vm5, %v5697_v52  ;;  %7912 = vmatprep.mubr.msk.f32.mxu1 %vm8084_vm7, %v8567_v0  ;;  %v6019_v57 = vpop.permute.xlu1 %6018 }
 0x734   : > { %v6015_v51 = vpop.permute.xlu0 %6014  ;;  %7915 = vmatprep.subr.mxu1 %v8567_v0 }
 0x736   : > { %7913 = vmatmul.mubr.msk.f32.vlgmr.msra.gmra.mxu1 %vm751_vm6, %v594_v4 }
 0x737   : > { %7916 = vmatpush3.msk.msra.mxu1 %vm755_vm5, %v6019_v57  ;;  %7917 = vmatprep.mubr.msk.f32.mxu1 %vm8084_vm7, %v8567_v0  ;;  %v6181_v7 = vpop.permute.xlu1 %6180 }
 0x738   : > { %v6185_v6 = vpop.permute.xlu0 %6184  ;;  %7920 = vmatprep.subr.mxu1 %v8567_v0 }
 0x73a   : > { %7918 = vmatmul.mubr.msk.f32.vlgmr.msra.gmra.mxu1 %vm751_vm6, %v7425_v63 }
 0x73b   : > { %7921 = vmatpush3.msk.msra.mxu1 %vm755_vm5, %v6185_v6  ;;  %7922 = vmatprep.mubr.msk.f32.mxu1 %vm8084_vm7, %v8567_v0  ;;  %v5704_v10 = vpop.permute.xlu1 %5703 }
 0x73c   : > { %v6347_v9 = vpop.permute.xlu0 %6346  ;;  %7925 = vmatprep.subr.mxu1 %v8567_v0  ;;  %v5707_v11 = vsel %vm748_vm4, %v5702_v3, %v5704_v10  ;;  %v5708_v12 = vsel %vm748_vm4, %v5704_v10, %v5706_v2  ;;  %v493_v2 = vld [vmem:[%s9168_s2 + $0x50] sm:$0xff]  ;;  %v508_v3 = vld [vmem:[%s9168_s2 + $0xc8] sm:$0xff]  ;;  %vm7198_vm4 = vcmask 556032  }
 0x73d   : > { %7582 = vmatprep.subr.msk.mxu0 %vm755_vm5, %v5708_v12  ;;  %v505_v10 = vld [vmem:[%s9168_s2 + $0xb0] sm:$0xff] }
 0x73e   : > { %7923 = vmatmul.mubr.msk.f32.vlgmr.msra.gmra.mxu1 %vm751_vm6, %v7426_v8  ;;  %7583 = vmatpush1.msk.msra.mxu0 %vm755_vm5, %v5707_v11  ;;  %v519_v11 = vld [vmem:[%s9168_s2 + $0x120] sm:$0xff]  ;;  %v489_v12 = vld [vmem:[%s9168_s2 + $0x30] sm:$0xff] }
 0x73f   : > { %7927 = vmatprep.mubr.msk.f32.mxu1 %vm8084_vm7, %v8567_v0  ;;  %7584 = vmatmul.mubr.msk.f32.vlgmr.msra.gmra.mxu0 %vm751_vm6, %v7424_v1  ;;  %v6351_v14 = vpop.permute.xlu1 %6350  ;;  %v523_v1 = vld [vmem:[%s9168_s2 + $0x140] sm:$0xf] }
 0x740   : > { %v6017_v13 = vpop.permute.xlu0 %6016  ;;  %7587 = vmatprep.subr.msk.mxu0 %vm755_vm5, %v5700_v61  ;;  %7926 = vmatpush3.msk.msra.mxu1 %vm755_vm5, %v6351_v14  ;;  %v497_v61 = vld [vmem:[%s9168_s2 + $0x70] sm:$0xff] }
 0x741   : > { %v6021_v17 = vsel %vm1064_vm8, %v6017_v13, %v6019_v57  ;;  %7588 = vmatpush1.msk.msra.mxu0 %vm755_vm5, %v8858_v34  ;;  %5932 = vmatprep.mubr.f32.mxu0 %v8567_v0  ;;  %v6020_v18 = vsel %vm1064_vm8, %v6015_v51, %v6017_v13  ;;  %v514_v34 = vld [vmem:[%s9168_s2 + $0xf8] sm:$0xff]  ;;  %v492_v51 = vld [vmem:[%s9168_s2 + $0x48] sm:$0xff]  ;;  %v507_v57 = vld [vmem:[%s9168_s2 + $0xc0] sm:$0xff] }
 0x742   : > { %7592 = vmatprep.subr.msk.mxu0 %vm755_vm5, %v6021_v17  ;;  %7930 = vmatprep.subr.mxu1 %v8567_v0  ;;  %v504_v13 = vld [vmem:[%s9168_s2 + $0xa8] sm:$0xff]  ;;  %v503_v17 = vld [vmem:[%s9168_s2 + $0xa0] sm:$0xff] }
 0x743   : > { %7928 = vmatmul.mubr.msk.f32.vlgmr.msra.gmra.mxu1 %vm751_vm6, %v7427_v16  ;;  %7589 = vmatmul.mubr.msk.f32.vlgmr.msra.gmra.mxu0 %vm751_vm6, %v594_v4  ;;  %v6513_v19 = vpop.permute.xlu1 %6512  ;;  %v522_v4 = vld [vmem:[%s9168_s2 + $0x138] sm:$0xff] }
 0x744   : > { %v6517_v5 = vpop.permute.xlu0 %6516  ;;  %7932 = vmatprep.mubr.msk.f32.mxu1 %vm8084_vm7, %v8567_v0  ;;  %7593 = vmatpush1.msk.msra.mxu0 %vm755_vm5, %v6020_v18  ;;  %v517_v18 = vld [vmem:[%s9168_s2 + $0x110] sm:$0xff] }
 0x745   : > { %7931 = vmatpush3.msk.msra.mxu1 %vm755_vm5, %v6517_v5  ;;  %6095 = vmatprep.mubr.f32.mxu0 %v8567_v0 }
 0x746   : > { %7935 = vmatprep.subr.mxu1 %v8567_v0 }
 0x747   : > { %7933 = vmatmul.mubr.msk.f32.vlgmr.msra.gmra.mxu1 %vm751_vm6, %v7428_v20  ;;  %7594 = vmatmul.mubr.msk.f32.vlgmr.msra.gmra.mxu0 %vm751_vm6, %v7425_v63  ;;  %v6183_v23 = vpop.permute.xlu1 %6182  ;;  %v521_v63 = vld [vmem:[%s9168_s2 + $0x130] sm:$0xff] }
 0x748   : > { %v6349_v22 = vpop.permute.xlu0 %6348  ;;  %7937 = vmatprep.mubr.msk.f32.mxu1 %vm8084_vm7, %v8567_v0  ;;  %v6186_v24 = vsel %vm1231_vm9, %v6181_v7, %v6183_v23  ;;  %v6187_v27 = vsel %vm1231_vm9, %v6183_v23, %v6185_v6  ;;  %6261 = vmatprep.mubr.f32.mxu0 %v8567_v0  ;;  %v491_v6 = vld [vmem:[%s9168_s2 + $0x40] sm:$0xff]  ;;  %v506_v7 = vld [vmem:[%s9168_s2 + $0xb8] sm:$0xff]  ;;  %v501_v23 = vld [vmem:[%s9168_s2 + $0x90] sm:$0xff] }
 0x749   : > { %7597 = vmatprep.subr.msk.mxu0 %vm755_vm5, %v6187_v27  ;;  %v6353_v28 = vsel %vm1398_vm10, %v6349_v22, %v6351_v14  ;;  %v6352_v31 = vsel %vm1398_vm10, %v6347_v9, %v6349_v22  ;;  %v490_v9 = vld [vmem:[%s9168_s2 + $0x38] sm:$0xff]  ;;  %v485_v27 = vld [vmem:[%s9168_s2 + $0x10] sm:$0xff] }
 0x74a   : > { %7598 = vmatpush1.msk.msra.mxu0 %vm755_vm5, %v6186_v24  ;;  %v518_v14 = vld [vmem:[%s9168_s2 + $0x118] sm:$0xff]  ;;  %v515_v24 = vld [vmem:[%s9168_s2 + $0x100] sm:$0xff] }
 0x74b   : > { %7599 = vmatmul.mubr.msk.f32.vlgmr.msra.gmra.mxu0 %vm751_vm6, %v7426_v8  ;;  %7602 = vmatprep.subr.msk.mxu0 %vm755_vm5, %v6353_v28  ;;  %v6683_v33 = vpop.permute.xlu1 %6682  ;;  %v520_v8 = vld [vmem:[%s9168_s2 + $0x128] sm:$0xff]  ;;  %v486_v22 = vld [vmem:[%s9168_s2 + $0x18] sm:$0xff] }
 0x74c   : > { %v6679_v32 = vpop.permute.xlu0 %6678  ;;  %7603 = vmatpush1.msk.msra.mxu0 %vm755_vm5, %v6352_v31  ;;  %7936 = vmatpush3.msk.msra.mxu1 %vm755_vm5, %v6683_v33  ;;  %v500_v28 = vld [vmem:[%s9168_s2 + $0x88] sm:$0xff]  ;;  %v499_v31 = vld [vmem:[%s9168_s2 + $0x80] sm:$0xff] }
 0x74d   : > { %6427 = vmatprep.mubr.f32.mxu0 %v8567_v0  ;;  %7938 = vmatmul.mubr.msk.f32.vlgmr.msra.gmra.mxu1 %vm751_vm6, %v7429_v30 }
 0x74e   : > { %7940 = vmatprep.subr.mxu1 %v8567_v0  ;;  %7942 = vmatprep.mubr.msk.f32.mxu1 %vm8084_vm7, %v8567_v0 }
 0x74f   : > { %7604 = vmatmul.mubr.msk.f32.vlgmr.msra.gmra.mxu0 %vm751_vm6, %v7427_v16  ;;  %v6515_v36 = vpop.permute.xlu1 %6514  ;;  %v488_v16 = vld [vmem:[%s9168_s2 + $0x28] sm:$0xff] }
 0x750   : > { %v6681_v35 = vpop.permute.xlu0 %6680  ;;  %v6518_v15 = vsel %vm1565_vm11, %v6513_v19, %v6515_v36  ;;  %v6519_v37 = vsel %vm1565_vm11, %v6515_v36, %v6517_v5  ;;  %6593 = vmatprep.mubr.f32.mxu0 %v8567_v0  ;;  %v487_v5 = vld [vmem:[%s9168_s2 + $0x20] sm:$0xff]  ;;  %v502_v19 = vld [vmem:[%s9168_s2 + $0x98] sm:$0xff] }
 0x751   : > { %7607 = vmatprep.subr.msk.mxu0 %vm755_vm5, %v6519_v37  ;;  %v6685_v38 = vsel %vm1732_vm12, %v6681_v35, %v6683_v33  ;;  %v6684_v25 = vsel %vm1732_vm12, %v6679_v32, %v6681_v35 }
 0x752   : > { %7608 = vmatpush1.msk.msra.mxu0 %vm755_vm5, %v6518_v15 }
 0x753   : > { %7609 = vmatmul.mubr.msk.f32.vlgmr.msra.gmra.mxu0 %vm751_vm6, %v7428_v20  ;;  %7612 = vmatprep.subr.msk.mxu0 %vm755_vm5, %v6685_v38  ;;  %v6845_v41 = vpop.permute.xlu1 %6844  ;;  %v516_v20 = vld [vmem:[%s9168_s2 + $0x108] sm:$0xff] }
 0x754   : > { %v6849_v40 = vpop.permute.xlu0 %6848  ;;  %7613 = vmatpush1.msk.msra.mxu0 %vm755_vm5, %v6684_v25  ;;  %6759 = vmatprep.mubr.f32.mxu0 %v8567_v0 }
 0x755   : > { %7941 = vmatpush3.msk.msra.mxu1 %vm755_vm5, %v6849_v40 }
 0x756   : > { %7943 = vmatmul.mubr.msk.f32.vlgmr.msra.gmra.mxu1 %vm751_vm6, %v7430_v21  ;;  %7945 = vmatprep.subr.mxu1 %v8567_v0 }
 0x757   : > { %7947 = vmatprep.mubr.msk.f32.mxu1 %vm8084_vm7, %v8567_v0  ;;  %7614 = vmatmul.mubr.msk.f32.vlgmr.msra.gmra.mxu0 %vm751_vm6, %v7429_v30  ;;  %v6847_v26 = vpop.permute.xlu1 %6846  ;;  %v484_v30 = vld [vmem:[%s9168_s2 + $0x8] sm:$0xff] }
 0x758   : > { %v7013_v42 = vpop.permute.xlu0 %7012  ;;  %v6850_v43 = vsel %vm1899_vm13, %v6845_v41, %v6847_v26  ;;  %v6851_v46 = vsel %vm1899_vm13, %v6847_v26, %v6849_v40  ;;  %6925 = vmatprep.mubr.f32.mxu0 %v8567_v0 }
 0x759   : > { %7617 = vmatprep.subr.msk.mxu0 %vm755_vm5, %v6851_v46 }
 0x75a   : > { %7618 = vmatpush1.msk.msra.mxu0 %vm755_vm5, %v6850_v43 }
 0x75b   : > { %7619 = vmatmul.mubr.msk.f32.vlgmr.msra.gmra.mxu0 %vm751_vm6, %v7430_v21  ;;  %v7015_v29 = vpop.permute.xlu1 %7014 }
 0x75c   : > { %v7011_v49 = vpop.permute.xlu0 %7010  ;;  %v7017_v52 = vsel %vm2066_vm14, %v7013_v42, %v7015_v29  ;;  %7946 = vmatpush3.msk.msra.mxu1 %vm755_vm5, %v7015_v29  ;;  %7091 = vmatprep.mubr.f32.mxu0 %v8567_v0 }
 0x75d   : > { %v7016_v50 = vsel %vm2066_vm14, %v7011_v49, %v7013_v42  ;;  %7622 = vmatprep.subr.msk.mxu0 %vm755_vm5, %v7017_v52  ;;  %7948 = vmatmul.mubr.msk.f32.vlgmr.msra.gmra.mxu1 %vm751_vm6, %v7431_v47 }
 0x75e   : > { %7623 = vmatpush1.msk.msra.mxu0 %vm755_vm5, %v7016_v50  ;;  %7950 = vmatprep.subr.mxu1 %v8567_v0 }
 0x75f   : > { %7624 = vmatmul.mubr.msk.f32.vlgmr.msra.gmra.mxu0 %vm751_vm6, %v7431_v47  ;;  %7968 = vmatprep.mubr.msk.f32.mxu1 %vm8084_vm7, %v8567_v0 }
 0x760   : > { %7710 = vmatprep.subr.mxu0 %v514_v34  ;;  %7951 = vmatpush3.msk.msra.mxu1 %vm755_vm5, %v523_v1  ;;  %vm7345_vm5 = vcmask 519168  }
 0x761   : > { %7711 = vmatpush3.msra.mxu0 %v498_v53  ;;  %7952 = vmatprep.subr.mxu1 %v8567_v0 }
 0x762   : > { %7712 = vmatprep.subr.mxu0 %v513_v55  ;;  %7953 = vmatpush3.msra.mxu1 %v522_v4 }
 0x763   : > { %7713 = vmatpush3.msra.mxu0 %v497_v61  ;;  %7954 = vmatprep.subr.mxu1 %v8567_v0 }
 0x764   : > { %7714 = vmatprep.subr.mxu0 %v512_v56  ;;  %7955 = vmatpush3.msra.mxu1 %v521_v63 }
 0x765   : > { %7715 = vmatpush3.msra.mxu0 %v496_v58  ;;  %7956 = vmatprep.subr.mxu1 %v8567_v0 }
 0x766   : > { %7716 = vmatprep.subr.mxu0 %v511_v59  ;;  %7957 = vmatpush3.msra.mxu1 %v520_v8 }
 0x767   : > { %7717 = vmatpush3.msra.mxu0 %v495_v39  ;;  %7958 = vmatprep.subr.mxu1 %v8567_v0 }
 0x768   : > { %7718 = vmatprep.subr.mxu0 %v510_v60  ;;  %7959 = vmatpush3.msra.mxu1 %v519_v11 }
 0x769   : > { %7719 = vmatpush3.msra.mxu0 %v494_v44  ;;  %7960 = vmatprep.subr.mxu1 %v8567_v0 }
 0x76a   : > { %7720 = vmatprep.subr.mxu0 %v509_v62  ;;  %7961 = vmatpush3.msra.mxu1 %v518_v14 }
 0x76b   : > { %7721 = vmatpush3.msra.mxu0 %v493_v2  ;;  %7962 = vmatprep.subr.mxu1 %v8567_v0 }
 0x76c   : > { %7722 = vmatprep.subr.mxu0 %v508_v3  ;;  %7963 = vmatpush3.msra.mxu1 %v517_v18 }
 0x76d   : > { %7723 = vmatpush3.msra.mxu0 %v492_v51  ;;  %7964 = vmatprep.subr.mxu1 %v8567_v0 }
 0x76e   : > { %7724 = vmatprep.subr.mxu0 %v507_v57  ;;  %7965 = vmatpush3.msra.mxu1 %v516_v20 }
 0x76f   : > { %7725 = vmatpush3.msra.mxu0 %v491_v6  ;;  %7966 = vmatprep.subr.mxu1 %v8567_v0  ;;  %v483_v0 = vld [vmem:[%s9168_s2] sm:$0xff] }
 0x770   : > { %7726 = vmatprep.subr.mxu0 %v506_v7  ;;  %7967 = vmatpush3.msra.mxu1 %v515_v24 }
 0x771   : > { %7727 = vmatpush3.msra.mxu0 %v490_v9 }
 0x772   : > { %7728 = vmatprep.subr.mxu0 %v505_v10 }
 0x773   : > { %7729 = vmatpush3.msra.mxu0 %v489_v12 }
 0x774   : > { %7730 = vmatprep.subr.mxu0 %v504_v13 }
 0x775   : > { %7731 = vmatpush3.msra.mxu0 %v488_v16 }
 0x776   : > { %7732 = vmatprep.subr.mxu0 %v503_v17 }
 0x777   : > { %7733 = vmatpush3.msra.mxu0 %v487_v5 }
 0x778   : > { %7734 = vmatprep.subr.mxu0 %v502_v19  ;;  %v552_v19 = vpop.permute.xlu1 %551 }
 0x779   : > { %7735 = vmatpush3.msra.mxu0 %v486_v22 }
 0x77a   : > { %7736 = vmatprep.subr.mxu0 %v501_v23 }
 0x77b   : > { %7737 = vmatpush3.msra.mxu0 %v485_v27 }
 0x77c   : > { %7738 = vmatprep.subr.mxu0 %v500_v28 }
 0x77d   : > { %7739 = vmatpush3.msra.mxu0 %v484_v30 }
 0x77e   : > { %7740 = vmatprep.subr.mxu0 %v499_v31 }
 0x77f   : > { %7741 = vmatpush3.msra.mxu0 %v483_v0  ;;  %v558_v0 = vpop.permute.xlu0 %557 }
 0x7f2   : > { %v5855_v32 = vpop.f32.mrf.mxu1 }
 0x7f4   : > { %v7909_v33 = vpop.f32.mrf.mxu1 }
 0x7f6   : > { %v6005_v35 = vpop.f32.mrf.mxu1 }
 0x7f7   : > { %v6006_v46 = vadd.f32 %v6005_v35, %v5855_v32 }
 0x7f8   : > { %v7914_v36 = vpop.f32.mrf.mxu1 }
 0x7fa   : > { %v6168_v15 = vpop.f32.mrf.mxu1 }
 0x7fb   : > { %v6174_v52 = vadd.f32 %v6168_v15, %v6006_v46 }
 0x7fc   : > { %v7919_v37 = vpop.f32.mrf.mxu1 }
 0x7fe   : > { %v6334_v38 = vpop.f32.mrf.mxu1 }
 0x7ff   : > { %v5784_v21 = vpop.f32.mrf.mxu0  ;;  %v6340_v61 = vadd.f32 %v6334_v38, %v6174_v52 }
 0x800   : > { %v7924_v25 = vpop.f32.mrf.mxu1 }
 0x801   : > { %v5786_v40 = vpop.f32.mrf.mxu0 }
 0x803   : > { %v6500_v41 = vpop.f32.mrf.mxu1  ;;  %v5934_v42 = vpop.f32.mrf.mxu0 }
 0x804   : > { %v5935_v39 = vadd.f32 %v5934_v42, %v5784_v21  ;;  %v6506_v60 = vadd.f32 %v6500_v41, %v6340_v61 }
 0x805   : > { %v7929_v26 = vpop.f32.mrf.mxu1  ;;  %v5936_v43 = vpop.f32.mrf.mxu0 }
 0x806   : > { %v5937_v62 = vadd.f32 %v5936_v43, %v5786_v40 }
 0x807   : > { %v6666_v47 = vpop.f32.mrf.mxu1  ;;  %v6097_v49 = vpop.f32.mrf.mxu0 }
 0x808   : > { %v6172_v1 = vadd.f32 %v6097_v49, %v5935_v39  ;;  %v6672_v57 = vadd.f32 %v6666_v47, %v6506_v60 }
 0x809   : > { %v7934_v29 = vpop.f32.mrf.mxu1  ;;  %v6099_v50 = vpop.f32.mrf.mxu0 }
 0x80a   : > { %v6173_v4 = vadd.f32 %v6099_v50, %v5937_v62 }
 0x80b   : > { %v6263_v34 = vpop.f32.mrf.mxu0 }
 0x80c   : > { %v6338_v51 = vadd.f32 %v6263_v34, %v6172_v1 }
 0x80d   : > { %v6265_v53 = vpop.f32.mrf.mxu0  ;;  %v6832_v55 = vpop.f32.mrf.mxu1 }
 0x80e   : > { %v6339_v7 = vadd.f32 %v6265_v53, %v6173_v4  ;;  %v6838_v11 = vadd.f32 %v6832_v55, %v6672_v57 }
 0x80f   : > { %v6429_v56 = vpop.f32.mrf.mxu0  ;;  %v7939_v58 = vpop.f32.mrf.mxu1 }
 0x810   : > { %v6504_v8 = vadd.f32 %v6429_v56, %v6338_v51 }
 0x811   : > { %v6431_v59 = vpop.f32.mrf.mxu0 }
 0x812   : > { %v6505_v10 = vadd.f32 %v6431_v59, %v6339_v7 }
 0x813   : > { %v6595_v44 = vpop.f32.mrf.mxu0 }
 0x814   : > { %v6670_v12 = vadd.f32 %v6595_v44, %v6504_v8 }
 0x815   : > { %v6597_v2 = vpop.f32.mrf.mxu0 }
 0x816   : > { %v6998_v3 = vpop.f32.mrf.mxu1  ;;  %v6671_v14 = vadd.f32 %v6597_v2, %v6505_v10 }
 0x817   : > { %v6761_v63 = vpop.f32.mrf.mxu0  ;;  %v7004_v16 = vadd.f32 %v6998_v3, %v6838_v11 }
 0x818   : > { %v7944_v6 = vpop.f32.mrf.mxu1  ;;  %v6836_v17 = vadd.f32 %v6761_v63, %v6670_v12 }
 0x819   : > { %v6763_v9 = vpop.f32.mrf.mxu0 }
 0x81a   : > { %v6837_v20 = vadd.f32 %v6763_v9, %v6671_v14 }
 0x81b   : > { %v6927_v13 = vpop.f32.mrf.mxu0 }
 0x81c   : > { %v7002_v22 = vadd.f32 %v6927_v13, %v6836_v17 }
 0x81d   : > { %v6929_v18 = vpop.f32.mrf.mxu0  ;;  %v7164_v5 = vpop.f32.mrf.mxu1 }
 0x81e   : > { %v7170_v23 = vadd.f32 %v7164_v5, %v7004_v16  ;;  %v7003_v28 = vadd.f32 %v6929_v18, %v6837_v20 }
 0x81f   : > { %v7093_v24 = vpop.f32.mrf.mxu0  ;;  %v7949_v27 = vpop.f32.mrf.mxu1 }
 0x820   : > { %v7173_v30 = vmul.f32 %v7170_v23, %v552_v19  ;;  %v7168_v31 = vadd.f32 %v7093_v24, %v7002_v22 }
 0x821   : > { %v7095_v32 = vpop.f32.mrf.mxu0 }
 0x822   : > { %v7176_v33 = vadd.f32 %v7173_v30, %v558_v0  ;;  %v7171_v35 = vmul.f32 %v7168_v31, %v552_v19  ;;  %v7169_v36 = vadd.f32 %v7095_v32, %v7003_v28 }
 0x824   : > { %v7179_v15 = vsub.f32 0.0, %v7176_v33  ;;  %v7174_v37 = vadd.f32 %v7171_v35, %v558_v0  ;;  %v7172_v38 = vmul.f32 %v7169_v36, %v552_v19 }
 0x826   : > { %v7184_v21 = vmul.f32 1.442695, %v7179_v15  ;;  %v7177_v25 = vsub.f32 0.0, %v7174_v37  ;;  %v7175_v40 = vadd.f32 %v7172_v38, %v558_v0 }
 0x828   : > { %8037 = vpow2.f32 %v7184_v21  ;;  %v7180_v41 = vmul.f32 1.442695, %v7177_v25  ;;  %v7178_v42 = vsub.f32 0.0, %v7175_v40 }
 0x82a   : > { %8039 = vpow2.f32 %v7180_v41  ;;  %v7182_v26 = vmul.f32 1.442695, %v7178_v42 }
 0x82c   : > { %8041 = vpow2.f32 %v7182_v26 }
 0x835   : > { %v8038_v43 = vpop.eup %8037 }
 0x836   : > { %v7188_v46 = vadd.f32 1.0, %v8038_v43 }
 0x837   : > { %v8040_v47 = vpop.eup %8039 }
 0x838   : > { %8043 = vrcp.f32 %v7188_v46  ;;  %v7186_v49 = vadd.f32 1.0, %v8040_v47 }
 0x839   : > { %v8042_v29 = vpop.eup %8041 }
 0x83a   : > { %8045 = vrcp.f32 %v7186_v49  ;;  %v7187_v50 = vadd.f32 1.0, %v8042_v29 }
 0x83c   : > { %8047 = vrcp.f32 %v7187_v50 }
 0x845   : > { %v8044_v52 = vpop.eup %8043 }
 0x846   : > { %v7194_v34 = vmul.f32 %v8044_v52, %v7176_v33 }
 0x847   : > { %v8046_v53 = vpop.eup %8045 }
 0x848   : > { %v7197_v55 = vmul.f32 %v7194_v34, %v8417_v54  ;;  %v7192_v56 = vmul.f32 %v8046_v53, %v7174_v37 }
 0x849   : > { %v8048_v61 = vpop.eup %8047 }
 0x84a   : > { %7969 = vmatmul.mubr.msk.f32.vlgmr.msra.gmra.mxu1 %vm7198_vm4, %v7197_v55  ;;  %v7193_v58 = vmul.f32 %v8048_v61, %v7175_v40  ;;  %v7195_v39 = vmul.f32 %v7192_v56, %v8413_v45 }
 0x84c   : > { %v7196_v59 = vmul.f32 %v7193_v58, %v8415_v48 }
 0x84e   : > { %7269 = vmatprep.mubr.f32.mxu0 %v7196_v59 }
 0x84f   : > { %7270 = vmatmul.mubr.f32.vlgmr.msra.gmra.mxu0 %v7195_v39 }
 0x90a   : > { %v7341_v60 = vpop.f32.mrf.mxu1 }
 0x90c   : > { %v7970_v44 = vpop.f32.mrf.mxu1 }
 0x90f   : > { %v7742_v62 = vpop.f32.mrf.mxu0 }
 0x911   : > { %v7743_v1 = vpop.f32.mrf.mxu0 }
 0x912   : > { %v7744_v2 = vadd.f32 %v7743_v1, %v7742_v62 }
 0x914   : > { %v7342_v54 = vadd.f32 %v7744_v2, %v7341_v60 }
 0x916   : > { %7346 = vst.msk [vmem:[%s465_s20] sm:$0xf] %vm7345_vm5, %v7342_v54 }
 0x917 PF: > { %s24_s29 = sadd.s32 1, %s8056_s29  }
 0x918   : > { %p21_p4 = scmp.ge.s32.totalorder %s24_s29, 4  }
 0x91a   :  { %23 = sbr.rel (!%p21_p4) target bundleno = 1 (0x1), region = 130 }

</bundles_post_ra>
